<compile_context>
chip_gen: v6e
topology: v6e:2x2x1
jax: 0.10.0
libtpu: 0.0.40
codegen_flags: <defaults>
</compile_context>

<pallas_src>
import jax
import jax.numpy as jnp
import numpy as np
from jax import lax
from jax.experimental import pallas as pl
from jax.experimental.pallas import tpu as pltpu


# ---------------- Fused CNN + embedding-gather + LSTM + head + log_softmax ------------

def rnn_kernel(img_ref, lab_ref, wimg_ref, bimg_ref, table_ref, wih_ref, whh_ref,
               b_ref, wout_ref, bout_ref, out_ref, xg_scr, h_scr):
    Bp = img_ref.shape[0]
    Hp = whh_ref.shape[0]               # lane-padded hidden (128): each gate owns a lane block
    V = table_ref.shape[0]
    TBp = lab_ref.shape[0]              # T * Bp (time-major label rows)
    T1 = TBp // Bp + 1                  # T + 1 (image step prepended)
    H3 = 3 * Hp

    # --- fused image CNN (two linears pre-fused at param-prep time): one MXU matmul ---
    x0 = (jnp.dot(img_ref[...], wimg_ref[...], preferred_element_type=jnp.float32)
          + bimg_ref[...])                                                # (Bp, E)

    # --- in-kernel embedding gather: one_hot(labels) @ table on the MXU ---------------
    lab = lab_ref[...]                                                    # (TBp, 1) int32
    vocab_iota = lax.broadcasted_iota(jnp.int32, (TBp, V), 1)
    onehot = (lab == vocab_iota).astype(jnp.float32)                      # (TBp, V)
    emb = jnp.dot(onehot, table_ref[...],
                  preferred_element_type=jnp.float32)                     # (TBp, E)

    # --- single fused input projection for all T+1 steps (one wih push, one bias) -----
    x_all = jnp.concatenate([x0, emb], axis=0)                            # (T1*Bp, E)
    xg_scr[...] = (jnp.dot(x_all, wih_ref[...], preferred_element_type=jnp.float32)
                   + b_ref[...])                                          # (T1*Bp, 4Hp)

    # --- recurrence: only (Bp, Hp) @ (Hp, 4Hp) per step on the serial path ------------
    # whh is streamed from its VMEM ref inside each dot (no 256 KiB value held live
    # across the unrolled loop).  Gate packing is (i, f, o, g): one sigmoid slab + one
    # tanh per step; all slices are 128-lane aligned.
    h = jnp.zeros((Bp, Hp), jnp.float32)
    c = jnp.zeros((Bp, Hp), jnp.float32)
    for t in range(T1):                  # static, fully unrolled (T1 = 9)
        g = xg_scr[pl.ds(t * Bp, Bp), :] + jnp.dot(
            h, whh_ref[...], preferred_element_type=jnp.float32)          # (Bp, 4Hp)
        sig = jax.nn.sigmoid(g[:, 0:H3])          # i | f | o  (contiguous 3*Hp lanes)
        g_g = jnp.tanh(g[:, H3:4 * Hp])           # g
        i_g = sig[:, 0:Hp]
        f_g = sig[:, Hp:2 * Hp]
        o_g = sig[:, 2 * Hp:H3]
        c = f_g * c + i_g * g_g
        h = o_g * jnp.tanh(c)
        h_scr[pl.ds(t * Bp, Bp), :] = h

    # --- output head + log_softmax for steps 1..T: one matmul + lane-dense store ------
    h_tail = h_scr[pl.ds(Bp, TBp), :]                                     # drop image step
    logits = (jnp.dot(h_tail, wout_ref[...], preferred_element_type=jnp.float32)
              + bout_ref[...])                                            # (TBp, V)
    m = jnp.max(logits, axis=-1, keepdims=True)
    lse = jnp.log(jnp.sum(jnp.exp(logits - m), axis=-1, keepdims=True)) + m
    out_ref[...] = (logits - lse).astype(out_ref.dtype)


def fused_rnn_forward(img_flat_p, lab_tm, p):
    Bp = img_flat_p.shape[0]
    TBp = lab_tm.shape[0]
    Hp = p["whh"].shape[0]
    V = p["wout"].shape[1]
    T1Bp = TBp + Bp
    return pl.pallas_call(
        rnn_kernel,
        out_shape=jax.ShapeDtypeStruct((TBp, V), jnp.float32),
        scratch_shapes=[pltpu.VMEM((T1Bp, 4 * Hp), jnp.float32),   # hoisted x-gates
                        pltpu.VMEM((T1Bp, Hp), jnp.float32)],      # stacked hidden states
    )(img_flat_p, lab_tm, p["w_img"], p["b_img"], p["table"], p["wih"], p["whh"],
      p["bias"], p["wout"], p["bout"])


# --------------- One-time parameter preparation (NOT on the per-call path) ------------

def prepare_params(params):
    """Fuse/re-pack parameters once at load time.

    * image-CNN: the two linears have no nonlinearity between them -> one matmul.
    * LSTM gates reordered (i, f, g, o) -> (i, f, o, g) and each gate zero-padded to a
      full 128-lane block so the kernel can apply one sigmoid over 3*Hp lanes and one
      tanh over the last Hp lanes.
    * whh rows / wout rows padded to Hp with zeros (padded h lanes are exactly zero, so
      results are bit-identical on the real lanes).
    """
    H = params["whh_t"].shape[0]
    Hp = ((H + 127) // 128) * 128
    perm = jnp.array([0, 1, 3, 2], dtype=jnp.int32)          # i, f, g, o -> i, f, o, g

    w_img = params["cnn_w1"] @ params["cnn_w2"]                           # (FEAT, E)
    b_img = params["cnn_b1"] @ params["cnn_w2"] + params["cnn_b2"]        # (1, E)

    def regate(w):                     # (..., 4H) -> (..., 4Hp), reordered + zero-padded
        r = w.reshape(w.shape[:-1] + (4, H))
        r = jnp.take(r, perm, axis=-2)
        r = jnp.pad(r, [(0, 0)] * (r.ndim - 1) + [(0, Hp - H)])
        return r.reshape(w.shape[:-1] + (4 * Hp,))

    wih_p = regate(params["wih_t"])                                       # (E, 4Hp)
    whh_p = jnp.pad(regate(params["whh_t"]), ((0, Hp - H), (0, 0)))       # (Hp, 4Hp)
    bias_p = regate(params["bias"])                                       # (1, 4Hp)
    wout_p = jnp.pad(params["wout_t"], ((0, Hp - H), (0, 0)))             # (Hp, V)

    return {"w_img": w_img, "b_img": b_img, "table": params["embedding"],
            "wih": wih_p, "whh": whh_p, "bias": bias_p,
            "wout": wout_p, "bout": params["bout"]}


# ---------------------------------- Full forward ------------------------------------

def rnn_model_forward(imgs, labels, prepped):
    """Teacher-forcing forward of RNNModel. Returns (B, T, vocab) log-probs."""
    B = imgs.shape[0]
    T = labels.shape[1]
    V = prepped["wout"].shape[1]
    Bp = ((B + 7) // 8) * 8          # pad batch to sublane width

    img_flat = jnp.pad(imgs.reshape(B, -1), ((0, Bp - B), (0, 0)))        # (Bp, FEAT)
    lab_tm = jnp.pad(jnp.swapaxes(labels, 0, 1).astype(jnp.int32),
                     ((0, 0), (0, Bp - B))).reshape(T * Bp, 1)            # (T*Bp, 1)

    out_flat = fused_rnn_forward(img_flat, lab_tm, prepped)               # (T*Bp, V)
    out = out_flat.reshape(T, Bp, V)
    return jnp.swapaxes(out, 0, 1)[:B]                                    # (B, T, V)


# ------------------------ Pure-JAX reference (correctness only) ----------------------

def _reference(imgs, labels, params):
    B = imgs.shape[0]
    H = params["whh_t"].shape[0]
    x_flat = imgs.reshape(B, -1)
    feats = x_flat @ params["cnn_w1"] + params["cnn_b1"]
    img_h = feats @ params["cnn_w2"] + params["cnn_b2"]
    embeds = jnp.take(params["embedding"], labels, axis=0)
    seq = jnp.concatenate([img_h[:, None, :], embeds], axis=1)

    def step(carry, x_t):
        h, c = carry
        g = x_t @ params["wih_t"] + h @ params["whh_t"] + params["bias"]
        i = jax.nn.sigmoid(g[:, :H]); f = jax.nn.sigmoid(g[:, H:2 * H])
        gg = jnp.tanh(g[:, 2 * H:3 * H]); o = jax.nn.sigmoid(g[:, 3 * H:])
        c = f * c + i * gg
        h = o * jnp.tanh(c)
        logits = h @ params["wout_t"] + params["bout"]
        return (h, c), jax.nn.log_softmax(logits, axis=-1)

    init = (jnp.zeros((B, H), jnp.float32), jnp.zeros((B, H), jnp.float32))
    _, outs = lax.scan(step, init, jnp.swapaxes(seq, 0, 1))
    return jnp.swapaxes(outs, 0, 1)[:, 1:, :]


if __name__ == "__main__":
    # Small shapes consistent with the module's forward.
    B, C, HW = 2, 3, 16          # imgs: (B, 3, 16, 16)
    T = 8                        # labels: (B, T)
    E = 32                       # embedding_dim (output_dim of image CNN)
    HID = 32                     # hidden_dim
    VOCAB = 128                  # vocabulary_size == n_classes
    FEAT = C * HW * HW           # flattened image features
    BACKBONE = 1000              # MobileNet classifier output size

    key = jax.random.PRNGKey(0)
    ks = jax.random.split(key, 12)
    s = 0.02
    params = {
        "cnn_w1": jax.random.normal(ks[0], (FEAT, BACKBONE), jnp.float32) * s,
        "cnn_b1": jax.random.normal(ks[1], (1, BACKBONE), jnp.float32) * s,
        "cnn_w2": jax.random.normal(ks[2], (BACKBONE, E), jnp.float32) * s,
        "cnn_b2": jax.random.normal(ks[3], (1, E), jnp.float32) * s,
        "embedding": jax.random.normal(ks[4], (VOCAB, E), jnp.float32) * 0.1,
        # PyTorch LSTM weights are (4H, E)/(4H, H); stored transposed here,
        # gate order i, f, g, o; bias = bias_ih + bias_hh.
        "wih_t": jax.random.normal(ks[5], (E, 4 * HID), jnp.float32) * 0.1,
        "whh_t": jax.random.normal(ks[6], (HID, 4 * HID), jnp.float32) * 0.1,
        "bias": jax.random.normal(ks[7], (1, 4 * HID), jnp.float32) * 0.1,
        "wout_t": jax.random.normal(ks[8], (HID, VOCAB), jnp.float32) * 0.1,
        "bout": jax.random.normal(ks[9], (1, VOCAB), jnp.float32) * 0.1,
    }

    imgs = jax.random.normal(ks[10], (B, C, HW, HW), jnp.float32)
    labels = jax.random.randint(ks[11], (B, T), 0, VOCAB, dtype=jnp.int32)

    # One-time parameter preparation (outside the per-call jit).
    prepped = jax.block_until_ready(prepare_params(params))

    fwd = jax.jit(rnn_model_forward)
    out = jax.block_until_ready(fwd(imgs, labels, prepped))
    ref = jax.block_until_ready(_reference(imgs, labels, params))

    assert out.shape == (B, T, VOCAB), out.shape
    np.testing.assert_allclose(np.asarray(out), np.asarray(ref), atol=1e-4, rtol=1e-4)
    print("KERNEL_OK")
</pallas_src>

<mosaic_0001>
module attributes {stable_mosaic.version = 11 : i64} {
  func.func @rnn_kernel(%arg0: memref<8x768xf32, #tpu.memory_space<vmem>>, %arg1: memref<64x1xi32, #tpu.memory_space<vmem>>, %arg2: memref<768x32xf32, #tpu.memory_space<vmem>>, %arg3: memref<1x32xf32, #tpu.memory_space<vmem>>, %arg4: memref<128x32xf32, #tpu.memory_space<vmem>>, %arg5: memref<32x512xf32, #tpu.memory_space<vmem>>, %arg6: memref<128x512xf32, #tpu.memory_space<vmem>>, %arg7: memref<1x512xf32, #tpu.memory_space<vmem>>, %arg8: memref<128x128xf32, #tpu.memory_space<vmem>>, %arg9: memref<1x128xf32, #tpu.memory_space<vmem>>, %arg10: memref<64x128xf32, #tpu.memory_space<vmem>>, %arg11: memref<72x512xf32, #tpu.memory_space<vmem>>, %arg12: memref<72x128xf32, #tpu.memory_space<vmem>>) attributes {dimension_semantics = [], scalar_prefetch = 0 : i64, scratch_operands = 2 : i64, tpu.core_type = #tpu.core_type<tc>} {
    %c0 = arith.constant 0 : index
    %c0_0 = arith.constant 0 : index
    %0 = vector.load %arg0[%c0, %c0_0] : memref<8x768xf32, #tpu.memory_space<vmem>>, vector<8x768xf32>
    %c0_1 = arith.constant 0 : index
    %c0_2 = arith.constant 0 : index
    %1 = vector.load %arg2[%c0_1, %c0_2] : memref<768x32xf32, #tpu.memory_space<vmem>>, vector<768x32xf32>
    %cst = arith.constant dense<0.000000e+00> : vector<8x32xf32>
    %2 = tpu.matmul %0, %1, %cst {dimension_numbers = #tpu.dot_dimension_numbers<[1], [0], [0], [1], [0, 0, 1, 1], [], []>} : vector<8x768xf32>, vector<768x32xf32>, vector<8x32xf32> -> vector<8x32xf32>
    %c0_3 = arith.constant 0 : index
    %c0_4 = arith.constant 0 : index
    %3 = vector.load %arg3[%c0_3, %c0_4] : memref<1x32xf32, #tpu.memory_space<vmem>>, vector<1x32xf32>
    %4 = vector.broadcast %3 : vector<1x32xf32> to vector<8x32xf32>
    %5 = arith.addf %2, %4 : vector<8x32xf32>
    %c0_5 = arith.constant 0 : index
    %c0_6 = arith.constant 0 : index
    %6 = vector.load %arg1[%c0_5, %c0_6] : memref<64x1xi32, #tpu.memory_space<vmem>>, vector<64x1xi32>
    %7 = tpu.iota {dimensions = array<i32: 1>} : vector<64x128xi32>
    %8 = vector.broadcast %6 : vector<64x1xi32> to vector<64x128xi32>
    %9 = arith.cmpi eq, %8, %7 : vector<64x128xi32>
    %10 = arith.extui %9 : vector<64x128xi1> to vector<64x128xi32>
    %11 = arith.sitofp %10 : vector<64x128xi32> to vector<64x128xf32>
    %c0_7 = arith.constant 0 : index
    %c0_8 = arith.constant 0 : index
    %12 = vector.load %arg4[%c0_7, %c0_8] : memref<128x32xf32, #tpu.memory_space<vmem>>, vector<128x32xf32>
    %cst_9 = arith.constant dense<0.000000e+00> : vector<64x32xf32>
    %13 = tpu.matmul %11, %12, %cst_9 {dimension_numbers = #tpu.dot_dimension_numbers<[1], [0], [0], [1], [0, 0, 1, 1], [], []>} : vector<64x128xf32>, vector<128x32xf32>, vector<64x32xf32> -> vector<64x32xf32>
    %14 = tpu.concatenate %5, %13 in 0 : vector<8x32xf32>, vector<64x32xf32> -> vector<72x32xf32>
    %c0_10 = arith.constant 0 : index
    %c0_11 = arith.constant 0 : index
    %15 = vector.load %arg5[%c0_10, %c0_11] : memref<32x512xf32, #tpu.memory_space<vmem>>, vector<32x512xf32>
    %cst_12 = arith.constant dense<0.000000e+00> : vector<72x512xf32>
    %16 = tpu.matmul %14, %15, %cst_12 {dimension_numbers = #tpu.dot_dimension_numbers<[1], [0], [0], [1], [0, 0, 1, 1], [], []>} : vector<72x32xf32>, vector<32x512xf32>, vector<72x512xf32> -> vector<72x512xf32>
    %c0_13 = arith.constant 0 : index
    %c0_14 = arith.constant 0 : index
    %17 = vector.load %arg7[%c0_13, %c0_14] : memref<1x512xf32, #tpu.memory_space<vmem>>, vector<1x512xf32>
    %18 = vector.broadcast %17 : vector<1x512xf32> to vector<72x512xf32>
    %19 = arith.addf %16, %18 : vector<72x512xf32>
    %c0_15 = arith.constant 0 : index
    %c0_16 = arith.constant 0 : index
    %20 = vector.load %arg11[%c0_15, %c0_16] : memref<72x512xf32, #tpu.memory_space<vmem>>, vector<72x512xf32>
    tpu.vector_store %arg11[%c0_15, %c0_16], %19 {strides = array<i32>} : memref<72x512xf32, #tpu.memory_space<vmem>>, vector<72x512xf32>,
    %cst_17 = arith.constant 0.000000e+00 : f32
    %21 = vector.broadcast %cst_17 : f32 to vector<8x128xf32>
    %cst_18 = arith.constant 0.000000e+00 : f32
    %22 = vector.broadcast %cst_18 : f32 to vector<8x128xf32>
    %c0_19 = arith.constant 0 : index
    %c0_20 = arith.constant 0 : index
    %23 = vector.load %arg11[%c0_19, %c0_20] : memref<72x512xf32, #tpu.memory_space<vmem>>, vector<8x512xf32>
    %c0_21 = arith.constant 0 : index
    %c0_22 = arith.constant 0 : index
    %24 = vector.load %arg6[%c0_21, %c0_22] : memref<128x512xf32, #tpu.memory_space<vmem>>, vector<128x512xf32>
    %cst_23 = arith.constant dense<0.000000e+00> : vector<8x512xf32>
    %25 = tpu.matmul %21, %24, %cst_23 {dimension_numbers = #tpu.dot_dimension_numbers<[1], [0], [0], [1], [0, 0, 1, 1], [], []>} : vector<8x128xf32>, vector<128x512xf32>, vector<8x512xf32> -> vector<8x512xf32>
    %26 = arith.addf %23, %25 : vector<8x512xf32>
    %27 = vector.extract_strided_slice %26 {offsets = [0, 0], sizes = [8, 384], strides = [1, 1]} : vector<8x512xf32> to vector<8x384xf32>
    %28 = arith.negf %27 : vector<8x384xf32>
    %29 = math.exp %28 : vector<8x384xf32>
    %cst_24 = arith.constant 1.000000e+00 : f32
    %30 = vector.broadcast %cst_24 : f32 to vector<8x384xf32>
    %31 = arith.addf %30, %29 : vector<8x384xf32>
    %32 = arith.divf %30, %31 : vector<8x384xf32>
    %33 = vector.extract_strided_slice %26 {offsets = [0, 384], sizes = [8, 128], strides = [1, 1]} : vector<8x512xf32> to vector<8x128xf32>
    %34 = math.tanh %33 : vector<8x128xf32>
    %35 = vector.extract_strided_slice %32 {offsets = [0, 0], sizes = [8, 128], strides = [1, 1]} : vector<8x384xf32> to vector<8x128xf32>
    %36 = vector.extract_strided_slice %32 {offsets = [0, 128], sizes = [8, 128], strides = [1, 1]} : vector<8x384xf32> to vector<8x128xf32>
    %37 = vector.extract_strided_slice %32 {offsets = [0, 256], sizes = [8, 128], strides = [1, 1]} : vector<8x384xf32> to vector<8x128xf32>
    %38 = arith.mulf %36, %22 : vector<8x128xf32>
    %39 = arith.mulf %35, %34 : vector<8x128xf32>
    %40 = arith.addf %38, %39 : vector<8x128xf32>
    %41 = math.tanh %40 : vector<8x128xf32>
    %42 = arith.mulf %37, %41 : vector<8x128xf32>
    %c0_25 = arith.constant 0 : index
    %c0_26 = arith.constant 0 : index
    %43 = vector.load %arg12[%c0_25, %c0_26] : memref<72x128xf32, #tpu.memory_space<vmem>>, vector<8x128xf32>
    tpu.vector_store %arg12[%c0_25, %c0_26], %42 {strides = array<i32>} : memref<72x128xf32, #tpu.memory_space<vmem>>, vector<8x128xf32>,
    %c8 = arith.constant 8 : index
    %c0_27 = arith.constant 0 : index
    %44 = vector.load %arg11[%c8, %c0_27] : memref<72x512xf32, #tpu.memory_space<vmem>>, vector<8x512xf32>
    %c0_28 = arith.constant 0 : index
    %c0_29 = arith.constant 0 : index
    %45 = vector.load %arg6[%c0_28, %c0_29] : memref<128x512xf32, #tpu.memory_space<vmem>>, vector<128x512xf32>
    %cst_30 = arith.constant dense<0.000000e+00> : vector<8x512xf32>
    %46 = tpu.matmul %42, %45, %cst_30 {dimension_numbers = #tpu.dot_dimension_numbers<[1], [0], [0], [1], [0, 0, 1, 1], [], []>} : vector<8x128xf32>, vector<128x512xf32>, vector<8x512xf32> -> vector<8x512xf32>
    %47 = arith.addf %44, %46 : vector<8x512xf32>
    %48 = vector.extract_strided_slice %47 {offsets = [0, 0], sizes = [8, 384], strides = [1, 1]} : vector<8x512xf32> to vector<8x384xf32>
    %49 = arith.negf %48 : vector<8x384xf32>
    %50 = math.exp %49 : vector<8x384xf32>
    %cst_31 = arith.constant 1.000000e+00 : f32
    %51 = vector.broadcast %cst_31 : f32 to vector<8x384xf32>
    %52 = arith.addf %51, %50 : vector<8x384xf32>
    %53 = arith.divf %51, %52 : vector<8x384xf32>
    %54 = vector.extract_strided_slice %47 {offsets = [0, 384], sizes = [8, 128], strides = [1, 1]} : vector<8x512xf32> to vector<8x128xf32>
    %55 = math.tanh %54 : vector<8x128xf32>
    %56 = vector.extract_strided_slice %53 {offsets = [0, 0], sizes = [8, 128], strides = [1, 1]} : vector<8x384xf32> to vector<8x128xf32>
    %57 = vector.extract_strided_slice %53 {offsets = [0, 128], sizes = [8, 128], strides = [1, 1]} : vector<8x384xf32> to vector<8x128xf32>
    %58 = vector.extract_strided_slice %53 {offsets = [0, 256], sizes = [8, 128], strides = [1, 1]} : vector<8x384xf32> to vector<8x128xf32>
    %59 = arith.mulf %57, %40 : vector<8x128xf32>
    %60 = arith.mulf %56, %55 : vector<8x128xf32>
    %61 = arith.addf %59, %60 : vector<8x128xf32>
    %62 = math.tanh %61 : vector<8x128xf32>
    %63 = arith.mulf %58, %62 : vector<8x128xf32>
    %c8_32 = arith.constant 8 : index
    %c0_33 = arith.constant 0 : index
    %64 = vector.load %arg12[%c8_32, %c0_33] : memref<72x128xf32, #tpu.memory_space<vmem>>, vector<8x128xf32>
    tpu.vector_store %arg12[%c8_32, %c0_33], %63 {strides = array<i32>} : memref<72x128xf32, #tpu.memory_space<vmem>>, vector<8x128xf32>,
    %c16 = arith.constant 16 : index
    %c0_34 = arith.constant 0 : index
    %65 = vector.load %arg11[%c16, %c0_34] : memref<72x512xf32, #tpu.memory_space<vmem>>, vector<8x512xf32>
    %c0_35 = arith.constant 0 : index
    %c0_36 = arith.constant 0 : index
    %66 = vector.load %arg6[%c0_35, %c0_36] : memref<128x512xf32, #tpu.memory_space<vmem>>, vector<128x512xf32>
    %cst_37 = arith.constant dense<0.000000e+00> : vector<8x512xf32>
    %67 = tpu.matmul %63, %66, %cst_37 {dimension_numbers = #tpu.dot_dimension_numbers<[1], [0], [0], [1], [0, 0, 1, 1], [], []>} : vector<8x128xf32>, vector<128x512xf32>, vector<8x512xf32> -> vector<8x512xf32>
    %68 = arith.addf %65, %67 : vector<8x512xf32>
    %69 = vector.extract_strided_slice %68 {offsets = [0, 0], sizes = [8, 384], strides = [1, 1]} : vector<8x512xf32> to vector<8x384xf32>
    %70 = arith.negf %69 : vector<8x384xf32>
    %71 = math.exp %70 : vector<8x384xf32>
    %cst_38 = arith.constant 1.000000e+00 : f32
    %72 = vector.broadcast %cst_38 : f32 to vector<8x384xf32>
    %73 = arith.addf %72, %71 : vector<8x384xf32>
    %74 = arith.divf %72, %73 : vector<8x384xf32>
    %75 = vector.extract_strided_slice %68 {offsets = [0, 384], sizes = [8, 128], strides = [1, 1]} : vector<8x512xf32> to vector<8x128xf32>
    %76 = math.tanh %75 : vector<8x128xf32>
    %77 = vector.extract_strided_slice %74 {offsets = [0, 0], sizes = [8, 128], strides = [1, 1]} : vector<8x384xf32> to vector<8x128xf32>
    %78 = vector.extract_strided_slice %74 {offsets = [0, 128], sizes = [8, 128], strides = [1, 1]} : vector<8x384xf32> to vector<8x128xf32>
    %79 = vector.extract_strided_slice %74 {offsets = [0, 256], sizes = [8, 128], strides = [1, 1]} : vector<8x384xf32> to vector<8x128xf32>
    %80 = arith.mulf %78, %61 : vector<8x128xf32>
    %81 = arith.mulf %77, %76 : vector<8x128xf32>
    %82 = arith.addf %80, %81 : vector<8x128xf32>
    %83 = math.tanh %82 : vector<8x128xf32>
    %84 = arith.mulf %79, %83 : vector<8x128xf32>
    %c16_39 = arith.constant 16 : index
    %c0_40 = arith.constant 0 : index
    %85 = vector.load %arg12[%c16_39, %c0_40] : memref<72x128xf32, #tpu.memory_space<vmem>>, vector<8x128xf32>
    tpu.vector_store %arg12[%c16_39, %c0_40], %84 {strides = array<i32>} : memref<72x128xf32, #tpu.memory_space<vmem>>, vector<8x128xf32>,
    %c24 = arith.constant 24 : index
    %c0_41 = arith.constant 0 : index
    %86 = vector.load %arg11[%c24, %c0_41] : memref<72x512xf32, #tpu.memory_space<vmem>>, vector<8x512xf32>
    %c0_42 = arith.constant 0 : index
    %c0_43 = arith.constant 0 : index
    %87 = vector.load %arg6[%c0_42, %c0_43] : memref<128x512xf32, #tpu.memory_space<vmem>>, vector<128x512xf32>
    %cst_44 = arith.constant dense<0.000000e+00> : vector<8x512xf32>
    %88 = tpu.matmul %84, %87, %cst_44 {dimension_numbers = #tpu.dot_dimension_numbers<[1], [0], [0], [1], [0, 0, 1, 1], [], []>} : vector<8x128xf32>, vector<128x512xf32>, vector<8x512xf32> -> vector<8x512xf32>
    %89 = arith.addf %86, %88 : vector<8x512xf32>
    %90 = vector.extract_strided_slice %89 {offsets = [0, 0], sizes = [8, 384], strides = [1, 1]} : vector<8x512xf32> to vector<8x384xf32>
    %91 = arith.negf %90 : vector<8x384xf32>
    %92 = math.exp %91 : vector<8x384xf32>
    %cst_45 = arith.constant 1.000000e+00 : f32
    %93 = vector.broadcast %cst_45 : f32 to vector<8x384xf32>
    %94 = arith.addf %93, %92 : vector<8x384xf32>
    %95 = arith.divf %93, %94 : vector<8x384xf32>
    %96 = vector.extract_strided_slice %89 {offsets = [0, 384], sizes = [8, 128], strides = [1, 1]} : vector<8x512xf32> to vector<8x128xf32>
    %97 = math.tanh %96 : vector<8x128xf32>
    %98 = vector.extract_strided_slice %95 {offsets = [0, 0], sizes = [8, 128], strides = [1, 1]} : vector<8x384xf32> to vector<8x128xf32>
    %99 = vector.extract_strided_slice %95 {offsets = [0, 128], sizes = [8, 128], strides = [1, 1]} : vector<8x384xf32> to vector<8x128xf32>
    %100 = vector.extract_strided_slice %95 {offsets = [0, 256], sizes = [8, 128], strides = [1, 1]} : vector<8x384xf32> to vector<8x128xf32>
    %101 = arith.mulf %99, %82 : vector<8x128xf32>
    %102 = arith.mulf %98, %97 : vector<8x128xf32>
    %103 = arith.addf %101, %102 : vector<8x128xf32>
    %104 = math.tanh %103 : vector<8x128xf32>
    %105 = arith.mulf %100, %104 : vector<8x128xf32>
    %c24_46 = arith.constant 24 : index
    %c0_47 = arith.constant 0 : index
    %106 = vector.load %arg12[%c24_46, %c0_47] : memref<72x128xf32, #tpu.memory_space<vmem>>, vector<8x128xf32>
    tpu.vector_store %arg12[%c24_46, %c0_47], %105 {strides = array<i32>} : memref<72x128xf32, #tpu.memory_space<vmem>>, vector<8x128xf32>,
    %c32 = arith.constant 32 : index
    %c0_48 = arith.constant 0 : index
    %107 = vector.load %arg11[%c32, %c0_48] : memref<72x512xf32, #tpu.memory_space<vmem>>, vector<8x512xf32>
    %c0_49 = arith.constant 0 : index
    %c0_50 = arith.constant 0 : index
    %108 = vector.load %arg6[%c0_49, %c0_50] : memref<128x512xf32, #tpu.memory_space<vmem>>, vector<128x512xf32>
    %cst_51 = arith.constant dense<0.000000e+00> : vector<8x512xf32>
    %109 = tpu.matmul %105, %108, %cst_51 {dimension_numbers = #tpu.dot_dimension_numbers<[1], [0], [0], [1], [0, 0, 1, 1], [], []>} : vector<8x128xf32>, vector<128x512xf32>, vector<8x512xf32> -> vector<8x512xf32>
    %110 = arith.addf %107, %109 : vector<8x512xf32>
    %111 = vector.extract_strided_slice %110 {offsets = [0, 0], sizes = [8, 384], strides = [1, 1]} : vector<8x512xf32> to vector<8x384xf32>
    %112 = arith.negf %111 : vector<8x384xf32>
    %113 = math.exp %112 : vector<8x384xf32>
    %cst_52 = arith.constant 1.000000e+00 : f32
    %114 = vector.broadcast %cst_52 : f32 to vector<8x384xf32>
    %115 = arith.addf %114, %113 : vector<8x384xf32>
    %116 = arith.divf %114, %115 : vector<8x384xf32>
    %117 = vector.extract_strided_slice %110 {offsets = [0, 384], sizes = [8, 128], strides = [1, 1]} : vector<8x512xf32> to vector<8x128xf32>
    %118 = math.tanh %117 : vector<8x128xf32>
    %119 = vector.extract_strided_slice %116 {offsets = [0, 0], sizes = [8, 128], strides = [1, 1]} : vector<8x384xf32> to vector<8x128xf32>
    %120 = vector.extract_strided_slice %116 {offsets = [0, 128], sizes = [8, 128], strides = [1, 1]} : vector<8x384xf32> to vector<8x128xf32>
    %121 = vector.extract_strided_slice %116 {offsets = [0, 256], sizes = [8, 128], strides = [1, 1]} : vector<8x384xf32> to vector<8x128xf32>
    %122 = arith.mulf %120, %103 : vector<8x128xf32>
    %123 = arith.mulf %119, %118 : vector<8x128xf32>
    %124 = arith.addf %122, %123 : vector<8x128xf32>
    %125 = math.tanh %124 : vector<8x128xf32>
    %126 = arith.mulf %121, %125 : vector<8x128xf32>
    %c32_53 = arith.constant 32 : index
    %c0_54 = arith.constant 0 : index
    %127 = vector.load %arg12[%c32_53, %c0_54] : memref<72x128xf32, #tpu.memory_space<vmem>>, vector<8x128xf32>
    tpu.vector_store %arg12[%c32_53, %c0_54], %126 {strides = array<i32>} : memref<72x128xf32, #tpu.memory_space<vmem>>, vector<8x128xf32>,
    %c40 = arith.constant 40 : index
    %c0_55 = arith.constant 0 : index
    %128 = vector.load %arg11[%c40, %c0_55] : memref<72x512xf32, #tpu.memory_space<vmem>>, vector<8x512xf32>
    %c0_56 = arith.constant 0 : index
    %c0_57 = arith.constant 0 : index
    %129 = vector.load %arg6[%c0_56, %c0_57] : memref<128x512xf32, #tpu.memory_space<vmem>>, vector<128x512xf32>
    %cst_58 = arith.constant dense<0.000000e+00> : vector<8x512xf32>
    %130 = tpu.matmul %126, %129, %cst_58 {dimension_numbers = #tpu.dot_dimension_numbers<[1], [0], [0], [1], [0, 0, 1, 1], [], []>} : vector<8x128xf32>, vector<128x512xf32>, vector<8x512xf32> -> vector<8x512xf32>
    %131 = arith.addf %128, %130 : vector<8x512xf32>
    %132 = vector.extract_strided_slice %131 {offsets = [0, 0], sizes = [8, 384], strides = [1, 1]} : vector<8x512xf32> to vector<8x384xf32>
    %133 = arith.negf %132 : vector<8x384xf32>
    %134 = math.exp %133 : vector<8x384xf32>
    %cst_59 = arith.constant 1.000000e+00 : f32
    %135 = vector.broadcast %cst_59 : f32 to vector<8x384xf32>
    %136 = arith.addf %135, %134 : vector<8x384xf32>
    %137 = arith.divf %135, %136 : vector<8x384xf32>
    %138 = vector.extract_strided_slice %131 {offsets = [0, 384], sizes = [8, 128], strides = [1, 1]} : vector<8x512xf32> to vector<8x128xf32>
    %139 = math.tanh %138 : vector<8x128xf32>
    %140 = vector.extract_strided_slice %137 {offsets = [0, 0], sizes = [8, 128], strides = [1, 1]} : vector<8x384xf32> to vector<8x128xf32>
    %141 = vector.extract_strided_slice %137 {offsets = [0, 128], sizes = [8, 128], strides = [1, 1]} : vector<8x384xf32> to vector<8x128xf32>
    %142 = vector.extract_strided_slice %137 {offsets = [0, 256], sizes = [8, 128], strides = [1, 1]} : vector<8x384xf32> to vector<8x128xf32>
    %143 = arith.mulf %141, %124 : vector<8x128xf32>
    %144 = arith.mulf %140, %139 : vector<8x128xf32>
    %145 = arith.addf %143, %144 : vector<8x128xf32>
    %146 = math.tanh %145 : vector<8x128xf32>
    %147 = arith.mulf %142, %146 : vector<8x128xf32>
    %c40_60 = arith.constant 40 : index
    %c0_61 = arith.constant 0 : index
    %148 = vector.load %arg12[%c40_60, %c0_61] : memref<72x128xf32, #tpu.memory_space<vmem>>, vector<8x128xf32>
    tpu.vector_store %arg12[%c40_60, %c0_61], %147 {strides = array<i32>} : memref<72x128xf32, #tpu.memory_space<vmem>>, vector<8x128xf32>,
    %c48 = arith.constant 48 : index
    %c0_62 = arith.constant 0 : index
    %149 = vector.load %arg11[%c48, %c0_62] : memref<72x512xf32, #tpu.memory_space<vmem>>, vector<8x512xf32>
    %c0_63 = arith.constant 0 : index
    %c0_64 = arith.constant 0 : index
    %150 = vector.load %arg6[%c0_63, %c0_64] : memref<128x512xf32, #tpu.memory_space<vmem>>, vector<128x512xf32>
    %cst_65 = arith.constant dense<0.000000e+00> : vector<8x512xf32>
    %151 = tpu.matmul %147, %150, %cst_65 {dimension_numbers = #tpu.dot_dimension_numbers<[1], [0], [0], [1], [0, 0, 1, 1], [], []>} : vector<8x128xf32>, vector<128x512xf32>, vector<8x512xf32> -> vector<8x512xf32>
    %152 = arith.addf %149, %151 : vector<8x512xf32>
    %153 = vector.extract_strided_slice %152 {offsets = [0, 0], sizes = [8, 384], strides = [1, 1]} : vector<8x512xf32> to vector<8x384xf32>
    %154 = arith.negf %153 : vector<8x384xf32>
    %155 = math.exp %154 : vector<8x384xf32>
    %cst_66 = arith.constant 1.000000e+00 : f32
    %156 = vector.broadcast %cst_66 : f32 to vector<8x384xf32>
    %157 = arith.addf %156, %155 : vector<8x384xf32>
    %158 = arith.divf %156, %157 : vector<8x384xf32>
    %159 = vector.extract_strided_slice %152 {offsets = [0, 384], sizes = [8, 128], strides = [1, 1]} : vector<8x512xf32> to vector<8x128xf32>
    %160 = math.tanh %159 : vector<8x128xf32>
    %161 = vector.extract_strided_slice %158 {offsets = [0, 0], sizes = [8, 128], strides = [1, 1]} : vector<8x384xf32> to vector<8x128xf32>
    %162 = vector.extract_strided_slice %158 {offsets = [0, 128], sizes = [8, 128], strides = [1, 1]} : vector<8x384xf32> to vector<8x128xf32>
    %163 = vector.extract_strided_slice %158 {offsets = [0, 256], sizes = [8, 128], strides = [1, 1]} : vector<8x384xf32> to vector<8x128xf32>
    %164 = arith.mulf %162, %145 : vector<8x128xf32>
    %165 = arith.mulf %161, %160 : vector<8x128xf32>
    %166 = arith.addf %164, %165 : vector<8x128xf32>
    %167 = math.tanh %166 : vector<8x128xf32>
    %168 = arith.mulf %163, %167 : vector<8x128xf32>
    %c48_67 = arith.constant 48 : index
    %c0_68 = arith.constant 0 : index
    %169 = vector.load %arg12[%c48_67, %c0_68] : memref<72x128xf32, #tpu.memory_space<vmem>>, vector<8x128xf32>
    tpu.vector_store %arg12[%c48_67, %c0_68], %168 {strides = array<i32>} : memref<72x128xf32, #tpu.memory_space<vmem>>, vector<8x128xf32>,
    %c56 = arith.constant 56 : index
    %c0_69 = arith.constant 0 : index
    %170 = vector.load %arg11[%c56, %c0_69] : memref<72x512xf32, #tpu.memory_space<vmem>>, vector<8x512xf32>
    %c0_70 = arith.constant 0 : index
    %c0_71 = arith.constant 0 : index
    %171 = vector.load %arg6[%c0_70, %c0_71] : memref<128x512xf32, #tpu.memory_space<vmem>>, vector<128x512xf32>
    %cst_72 = arith.constant dense<0.000000e+00> : vector<8x512xf32>
    %172 = tpu.matmul %168, %171, %cst_72 {dimension_numbers = #tpu.dot_dimension_numbers<[1], [0], [0], [1], [0, 0, 1, 1], [], []>} : vector<8x128xf32>, vector<128x512xf32>, vector<8x512xf32> -> vector<8x512xf32>
    %173 = arith.addf %170, %172 : vector<8x512xf32>
    %174 = vector.extract_strided_slice %173 {offsets = [0, 0], sizes = [8, 384], strides = [1, 1]} : vector<8x512xf32> to vector<8x384xf32>
    %175 = arith.negf %174 : vector<8x384xf32>
    %176 = math.exp %175 : vector<8x384xf32>
    %cst_73 = arith.constant 1.000000e+00 : f32
    %177 = vector.broadcast %cst_73 : f32 to vector<8x384xf32>
    %178 = arith.addf %177, %176 : vector<8x384xf32>
    %179 = arith.divf %177, %178 : vector<8x384xf32>
    %180 = vector.extract_strided_slice %173 {offsets = [0, 384], sizes = [8, 128], strides = [1, 1]} : vector<8x512xf32> to vector<8x128xf32>
    %181 = math.tanh %180 : vector<8x128xf32>
    %182 = vector.extract_strided_slice %179 {offsets = [0, 0], sizes = [8, 128], strides = [1, 1]} : vector<8x384xf32> to vector<8x128xf32>
    %183 = vector.extract_strided_slice %179 {offsets = [0, 128], sizes = [8, 128], strides = [1, 1]} : vector<8x384xf32> to vector<8x128xf32>
    %184 = vector.extract_strided_slice %179 {offsets = [0, 256], sizes = [8, 128], strides = [1, 1]} : vector<8x384xf32> to vector<8x128xf32>
    %185 = arith.mulf %183, %166 : vector<8x128xf32>
    %186 = arith.mulf %182, %181 : vector<8x128xf32>
    %187 = arith.addf %185, %186 : vector<8x128xf32>
    %188 = math.tanh %187 : vector<8x128xf32>
    %189 = arith.mulf %184, %188 : vector<8x128xf32>
    %c56_74 = arith.constant 56 : index
    %c0_75 = arith.constant 0 : index
    %190 = vector.load %arg12[%c56_74, %c0_75] : memref<72x128xf32, #tpu.memory_space<vmem>>, vector<8x128xf32>
    tpu.vector_store %arg12[%c56_74, %c0_75], %189 {strides = array<i32>} : memref<72x128xf32, #tpu.memory_space<vmem>>, vector<8x128xf32>,
    %c64 = arith.constant 64 : index
    %c0_76 = arith.constant 0 : index
    %191 = vector.load %arg11[%c64, %c0_76] : memref<72x512xf32, #tpu.memory_space<vmem>>, vector<8x512xf32>
    %c0_77 = arith.constant 0 : index
    %c0_78 = arith.constant 0 : index
    %192 = vector.load %arg6[%c0_77, %c0_78] : memref<128x512xf32, #tpu.memory_space<vmem>>, vector<128x512xf32>
    %cst_79 = arith.constant dense<0.000000e+00> : vector<8x512xf32>
    %193 = tpu.matmul %189, %192, %cst_79 {dimension_numbers = #tpu.dot_dimension_numbers<[1], [0], [0], [1], [0, 0, 1, 1], [], []>} : vector<8x128xf32>, vector<128x512xf32>, vector<8x512xf32> -> vector<8x512xf32>
    %194 = arith.addf %191, %193 : vector<8x512xf32>
    %195 = vector.extract_strided_slice %194 {offsets = [0, 0], sizes = [8, 384], strides = [1, 1]} : vector<8x512xf32> to vector<8x384xf32>
    %196 = arith.negf %195 : vector<8x384xf32>
    %197 = math.exp %196 : vector<8x384xf32>
    %cst_80 = arith.constant 1.000000e+00 : f32
    %198 = vector.broadcast %cst_80 : f32 to vector<8x384xf32>
    %199 = arith.addf %198, %197 : vector<8x384xf32>
    %200 = arith.divf %198, %199 : vector<8x384xf32>
    %201 = vector.extract_strided_slice %194 {offsets = [0, 384], sizes = [8, 128], strides = [1, 1]} : vector<8x512xf32> to vector<8x128xf32>
    %202 = math.tanh %201 : vector<8x128xf32>
    %203 = vector.extract_strided_slice %200 {offsets = [0, 0], sizes = [8, 128], strides = [1, 1]} : vector<8x384xf32> to vector<8x128xf32>
    %204 = vector.extract_strided_slice %200 {offsets = [0, 128], sizes = [8, 128], strides = [1, 1]} : vector<8x384xf32> to vector<8x128xf32>
    %205 = vector.extract_strided_slice %200 {offsets = [0, 256], sizes = [8, 128], strides = [1, 1]} : vector<8x384xf32> to vector<8x128xf32>
    %206 = arith.mulf %204, %187 : vector<8x128xf32>
    %207 = arith.mulf %203, %202 : vector<8x128xf32>
    %208 = arith.addf %206, %207 : vector<8x128xf32>
    %209 = math.tanh %208 : vector<8x128xf32>
    %210 = arith.mulf %205, %209 : vector<8x128xf32>
    %c64_81 = arith.constant 64 : index
    %c0_82 = arith.constant 0 : index
    %211 = vector.load %arg12[%c64_81, %c0_82] : memref<72x128xf32, #tpu.memory_space<vmem>>, vector<8x128xf32>
    tpu.vector_store %arg12[%c64_81, %c0_82], %210 {strides = array<i32>} : memref<72x128xf32, #tpu.memory_space<vmem>>, vector<8x128xf32>,
    %c8_83 = arith.constant 8 : index
    %c0_84 = arith.constant 0 : index
    %212 = vector.load %arg12[%c8_83, %c0_84] : memref<72x128xf32, #tpu.memory_space<vmem>>, vector<64x128xf32>
    %c0_85 = arith.constant 0 : index
    %c0_86 = arith.constant 0 : index
    %213 = vector.load %arg8[%c0_85, %c0_86] : memref<128x128xf32, #tpu.memory_space<vmem>>, vector<128x128xf32>
    %cst_87 = arith.constant dense<0.000000e+00> : vector<64x128xf32>
    %214 = tpu.matmul %212, %213, %cst_87 {dimension_numbers = #tpu.dot_dimension_numbers<[1], [0], [0], [1], [0, 0, 1, 1], [], []>} : vector<64x128xf32>, vector<128x128xf32>, vector<64x128xf32> -> vector<64x128xf32>
    %c0_88 = arith.constant 0 : index
    %c0_89 = arith.constant 0 : index
    %215 = vector.load %arg9[%c0_88, %c0_89] : memref<1x128xf32, #tpu.memory_space<vmem>>, vector<1x128xf32>
    %216 = vector.broadcast %215 : vector<1x128xf32> to vector<64x128xf32>
    %217 = arith.addf %214, %216 : vector<64x128xf32>
    %cst_90 = arith.constant dense<0xFF800000> : vector<64xf32>
    %218 = vector.multi_reduction <maximumf>, %217, %cst_90 [1] : vector<64x128xf32> to vector<64xf32>
    %219 = vector.shape_cast %218 : vector<64xf32> to vector<64x1xf32>
    %220 = vector.broadcast %219 : vector<64x1xf32> to vector<64x128xf32>
    %221 = arith.subf %217, %220 : vector<64x128xf32>
    %222 = math.exp %221 : vector<64x128xf32>
    %cst_91 = arith.constant dense<0.000000e+00> : vector<64xf32>
    %223 = vector.multi_reduction <add>, %222, %cst_91 [1] : vector<64x128xf32> to vector<64xf32>
    %224 = vector.shape_cast %223 : vector<64xf32> to vector<64x1xf32>
    %225 = math.log %224 : vector<64x1xf32>
    %226 = arith.addf %225, %219 : vector<64x1xf32>
    %227 = vector.broadcast %226 : vector<64x1xf32> to vector<64x128xf32>
    %228 = arith.subf %217, %227 : vector<64x128xf32>
    %c0_92 = arith.constant 0 : index
    %c0_93 = arith.constant 0 : index
    %229 = vector.load %arg10[%c0_92, %c0_93] : memref<64x128xf32, #tpu.memory_space<vmem>>, vector<64x128xf32>
    tpu.vector_store %arg10[%c0_92, %c0_93], %228 {strides = array<i32>} : memref<64x128xf32, #tpu.memory_space<vmem>>, vector<64x128xf32>,
    return
  }
}

</mosaic_0001>

<bundles_post_ra>
// kernel: rnn_model_forward.1
= control target key start
LH: loop header
LB: loop body
LE: loop exit
PB: predicated region body
PF: predicated region fallthrough
CT: control target
= control target key end

     0   :  { %v3745_v0 = vmov 0   ;;  %vm571_vm8 = vcmask 261120   ;;  %s6186_s2 = inlined_call_operand.vmem [shape: f32[768,32], index: 2, kind: input, shape index: {}]   ;;  %s6187_s1 = inlined_call_operand.vmem [shape: s32[64,1], index: 1, kind: input, shape index: {}]   ;;  %s6188_s0 = inlined_call_operand.vmem [shape: f32[8,768], index: 0, kind: input, shape index: {}]   ;;  %s6189_s4 = inlined_call_operand.vmem [shape: f32[128,32], index: 4, kind: input, shape index: {}]   ;;  %s6190_s5 = inlined_call_operand.vmem [shape: f32[32,512], index: 5, kind: input, shape index: {}]   ;;  %s6191_s6 = inlined_call_operand.vmem [shape: f32[128,512], index: 6, kind: input, shape index: {}]   ;;  %s6192_s3 = inlined_call_operand.vmem [shape: f32[1,32], index: 3, kind: input, shape index: {}]   ;;  %s6193_s7 = inlined_call_operand.vmem [shape: f32[1,512], index: 7, kind: input, shape index: {}]   ;;  %s6194_s8 = inlined_call_operand.vmem [shape: f32[128,128], index: 8, kind: input, shape index: {}]   ;;  %s6195_s9 = inlined_call_operand.vmem [shape: f32[1,128], index: 9, kind: input, shape index: {}]   ;;  %s6196_s10 = inlined_call_operand.vmem [shape: f32[64,128], index: 10, kind: output, shape index: {}]  }
   0x1   :  { %3568 = vset.pattern.permute.xlu1 %v3745_v0  ;;  %3567 = vset.pattern.permute.xlu0 %v3745_v0  ;;  %v72_v1 = vld [vmem:[%s6186_s2 + $0xf8] sm:$0xff]  ;;  %v356_v2 = vld [vmem:[%s6187_s1 + $0x10] sm:$0xff]  ;;  %v354_v3 = vld [vmem:[%s6187_s1] sm:$0xff] }
   0x2   :  { %3323 = vmatprep.subr.mxu1 %v72_v1  ;;  %371 = vperm.xlu1 %3568, %v356_v2   ;;  %v56_v4 = vld [vmem:[%s6186_s2 + $0x78] sm:$0xff]  ;;  %v71_v5 = vld [vmem:[%s6186_s2 + $0xf0] sm:$0xff]  ;;  %v70_v7 = vld [vmem:[%s6186_s2 + $0xe8] sm:$0xff] }
   0x3   :  { %v55_v6 = vld [vmem:[%s6186_s2 + $0x70] sm:$0xff]  ;;  %365 = vperm.xlu0 %3567, %v354_v3   ;;  %3324 = vmatpush3.msra.mxu1 %v56_v4  ;;  %v357_v8 = vld [vmem:[%s6187_s1 + $0x18] sm:$0xff]  ;;  %v355_v9 = vld [vmem:[%s6187_s1 + $0x8] sm:$0xff] }
   0x4   :  { %3325 = vmatprep.subr.mxu1 %v71_v5  ;;  %v54_v10 = vld [vmem:[%s6186_s2 + $0x68] sm:$0xff]  ;;  %v69_v11 = vld [vmem:[%s6186_s2 + $0xe0] sm:$0xff]  ;;  %v68_v13 = vld [vmem:[%s6186_s2 + $0xd8] sm:$0xff] }
   0x5   :  { %3326 = vmatpush3.msra.mxu1 %v55_v6  ;;  %v53_v12 = vld [vmem:[%s6186_s2 + $0x60] sm:$0xff]  ;;  %v359_v14 = vld [vmem:[%s6187_s1 + $0x28] sm:$0xff]  ;;  %v52_v16 = vld [vmem:[%s6186_s2 + $0x58] sm:$0xff] }
   0x6   :  { %3327 = vmatprep.subr.mxu1 %v70_v7  ;;  %374 = vperm.xlu1 %3568, %v357_v8   ;;  %v358_v15 = vld [vmem:[%s6187_s1 + $0x20] sm:$0xff]  ;;  %v67_v17 = vld [vmem:[%s6186_s2 + $0xd0] sm:$0xff]  ;;  %v66_v19 = vld [vmem:[%s6186_s2 + $0xc8] sm:$0xff] }
   0x7   :  { %368 = vperm.xlu0 %3567, %v355_v9   ;;  %3328 = vmatpush3.msra.mxu1 %v54_v10  ;;  %v51_v18 = vld [vmem:[%s6186_s2 + $0x50] sm:$0xff]  ;;  %v361_v20 = vld [vmem:[%s6187_s1 + $0x38] sm:$0xff]  ;;  %v50_v22 = vld [vmem:[%s6186_s2 + $0x48] sm:$0xff] }
   0x8   :  { %3329 = vmatprep.subr.mxu1 %v69_v11  ;;  %v360_v21 = vld [vmem:[%s6187_s1 + $0x30] sm:$0xff]  ;;  %v65_v23 = vld [vmem:[%s6186_s2 + $0xc0] sm:$0xff]  ;;  %v36_v25 = vld [vmem:[%s6188_s0 + $0x8] sm:$0xff] }
   0x9   :  { %3330 = vmatpush3.msra.mxu1 %v53_v12  ;;  %v49_v24 = vld [vmem:[%s6186_s2 + $0x40] sm:$0xff]  ;;  %v64_v26 = vld [vmem:[%s6186_s2 + $0xb8] sm:$0xff]  ;;  %208 = vmatprep.mubr.f32.mxu1 %v36_v25  ;;  %v63_v30 = vld [vmem:[%s6186_s2 + $0xb0] sm:$0xff] }
   0xa   :  { %3331 = vmatprep.subr.mxu1 %v68_v13  ;;  %380 = vperm.xlu1 %3568, %v359_v14   ;;  %v48_v27 = vld [vmem:[%s6186_s2 + $0x38] sm:$0xff]  ;;  %v135_v31 = vld [vmem:[%s6186_s2 + $0x2f0] sm:$0xff]  ;;  %v134_v34 = vld [vmem:[%s6186_s2 + $0x2e8] sm:$0xff] }
   0xb   :  { %377 = vperm.xlu0 %3567, %v358_v15   ;;  %3332 = vmatpush3.msra.mxu1 %v52_v16  ;;  %v136_v28 = vld [vmem:[%s6186_s2 + $0x2f8] sm:$0xff]  ;;  %v47_v32 = vld [vmem:[%s6186_s2 + $0x30] sm:$0xff]  ;;  %v62_v35 = vld [vmem:[%s6186_s2 + $0xa8] sm:$0xff] }
   0xc   :  { %3333 = vmatprep.subr.mxu1 %v67_v17  ;;  %v120_v29 = vld [vmem:[%s6186_s2 + $0x278] sm:$0xff]  ;;  %3393 = vmatprep.subr.mxu0 %v136_v28  ;;  %v119_v33 = vld [vmem:[%s6186_s2 + $0x270] sm:$0xff]  ;;  %v118_v36 = vld [vmem:[%s6186_s2 + $0x268] sm:$0xff] }
   0xd   :  { %3334 = vmatpush3.msra.mxu1 %v51_v18  ;;  %3394 = vmatpush3.msra.mxu0 %v120_v29  ;;  %v46_v37 = vld [vmem:[%s6186_s2 + $0x28] sm:$0xff]  ;;  %v133_v38 = vld [vmem:[%s6186_s2 + $0x2e0] sm:$0xff]  ;;  %v132_v42 = vld [vmem:[%s6186_s2 + $0x2d8] sm:$0xff] }
   0xe   :  { %3335 = vmatprep.subr.mxu1 %v66_v19  ;;  %386 = vperm.xlu1 %3568, %v361_v20   ;;  %v61_v39 = vld [vmem:[%s6186_s2 + $0xa0] sm:$0xff]  ;;  %v60_v43 = vld [vmem:[%s6186_s2 + $0x98] sm:$0xff]  ;;  %v131_v46 = vld [vmem:[%s6186_s2 + $0x2d0] sm:$0xff] }
   0xf   :  { %383 = vperm.xlu0 %3567, %v360_v21   ;;  %3336 = vmatpush3.msra.mxu1 %v50_v22  ;;  %v117_v40 = vld [vmem:[%s6186_s2 + $0x260] sm:$0xff]  ;;  %v116_v44 = vld [vmem:[%s6186_s2 + $0x258] sm:$0xff]  ;;  %v59_v47 = vld [vmem:[%s6186_s2 + $0x90] sm:$0xff] }
  0x10   :  { %3337 = vmatprep.subr.mxu1 %v65_v23  ;;  %3395 = vmatprep.subr.mxu0 %v135_v31  ;;  %v45_v41 = vld [vmem:[%s6186_s2 + $0x20] sm:$0xff]  ;;  %v44_v45 = vld [vmem:[%s6186_s2 + $0x18] sm:$0xff]  ;;  %v115_v48 = vld [vmem:[%s6186_s2 + $0x250] sm:$0xff] }
  0x11   :  { %3338 = vmatpush3.msra.mxu1 %v49_v24  ;;  %3396 = vmatpush3.msra.mxu0 %v119_v33  ;;  %v43_v49 = vld [vmem:[%s6186_s2 + $0x10] sm:$0xff]  ;;  %v130_v50 = vld [vmem:[%s6186_s2 + $0x2c8] sm:$0xff]  ;;  %v129_v54 = vld [vmem:[%s6186_s2 + $0x2c0] sm:$0xff] }
  0x12   :  { %3339 = vmatprep.subr.mxu1 %v64_v26  ;;  %3397 = vmatprep.subr.mxu0 %v134_v34  ;;  %v58_v51 = vld [vmem:[%s6186_s2 + $0x88] sm:$0xff]  ;;  %v57_v55 = vld [vmem:[%s6186_s2 + $0x80] sm:$0xff]  ;;  %v128_v58 = vld [vmem:[%s6186_s2 + $0x2b8] sm:$0xff] }
  0x13   :  { %3340 = vmatpush3.msra.mxu1 %v48_v27  ;;  %3398 = vmatpush3.msra.mxu0 %v118_v36  ;;  %v114_v52 = vld [vmem:[%s6186_s2 + $0x248] sm:$0xff]  ;;  %v113_v56 = vld [vmem:[%s6186_s2 + $0x240] sm:$0xff]  ;;  %v104_v59 = vld [vmem:[%s6186_s2 + $0x1f8] sm:$0xff] }
  0x14   :  { %3341 = vmatprep.subr.mxu1 %v63_v30  ;;  %3399 = vmatprep.subr.mxu0 %v133_v38  ;;  %v42_v53 = vld [vmem:[%s6186_s2 + $0x8] sm:$0xff]  ;;  %v41_v57 = vld [vmem:[%s6186_s2] sm:$0xff]  ;;  %v88_v61 = vld [vmem:[%s6186_s2 + $0x178] sm:$0xff] }
  0x15   :  { %3342 = vmatpush3.msra.mxu1 %v47_v32  ;;  %3400 = vmatpush3.msra.mxu0 %v117_v40  ;;  %v35_v60 = vld [vmem:[%s6188_s0] sm:$0xff]  ;;  %v112_v62 = vld [vmem:[%s6186_s2 + $0x238] sm:$0xff]  ;;  %v103_v63 = vld [vmem:[%s6186_s2 + $0x1f0] sm:$0xff] }
  0x16   :  { %3343 = vmatprep.subr.mxu1 %v62_v35  ;;  %3401 = vmatprep.subr.mxu0 %v132_v42  ;;  %v127_v0 = vld [vmem:[%s6186_s2 + $0x2b0] sm:$0xff]  ;;  %v102_v3 = vld [vmem:[%s6186_s2 + $0x1e8] sm:$0xff]  ;;  %v101_v7 = vld [vmem:[%s6186_s2 + $0x1e0] sm:$0xff] }
  0x17   :  { %3344 = vmatpush3.msra.mxu1 %v46_v37  ;;  %3402 = vmatpush3.msra.mxu0 %v116_v44  ;;  %v87_v1 = vld [vmem:[%s6186_s2 + $0x170] sm:$0xff]  ;;  %v126_v4 = vld [vmem:[%s6186_s2 + $0x2a8] sm:$0xff]  ;;  %v125_v8 = vld [vmem:[%s6186_s2 + $0x2a0] sm:$0xff] }
  0x18   :  { %3345 = vmatprep.subr.mxu1 %v61_v39  ;;  %3403 = vmatprep.subr.mxu0 %v131_v46  ;;  %v111_v2 = vld [vmem:[%s6186_s2 + $0x230] sm:$0xff]  ;;  %v86_v5 = vld [vmem:[%s6186_s2 + $0x168] sm:$0xff]  ;;  %v85_v9 = vld [vmem:[%s6186_s2 + $0x160] sm:$0xff] }
  0x19   :  { %3346 = vmatpush3.msra.mxu1 %v45_v41  ;;  %3404 = vmatpush3.msra.mxu0 %v115_v48  ;;  %v110_v6 = vld [vmem:[%s6186_s2 + $0x228] sm:$0xff]  ;;  %v109_v10 = vld [vmem:[%s6186_s2 + $0x220] sm:$0xff]  ;;  %v100_v11 = vld [vmem:[%s6186_s2 + $0x1d8] sm:$0xff] }
  0x1a   :  { %3347 = vmatprep.subr.mxu1 %v60_v43  ;;  %3405 = vmatprep.subr.mxu0 %v130_v50  ;;  %v124_v12 = vld [vmem:[%s6186_s2 + $0x298] sm:$0xff]  ;;  %v99_v15 = vld [vmem:[%s6186_s2 + $0x1d0] sm:$0xff]  ;;  %v98_v19 = vld [vmem:[%s6186_s2 + $0x1c8] sm:$0xff] }
  0x1b   :  { %3348 = vmatpush3.msra.mxu1 %v44_v45  ;;  %3406 = vmatpush3.msra.mxu0 %v114_v52  ;;  %v84_v13 = vld [vmem:[%s6186_s2 + $0x158] sm:$0xff]  ;;  %v123_v16 = vld [vmem:[%s6186_s2 + $0x290] sm:$0xff]  ;;  %v122_v20 = vld [vmem:[%s6186_s2 + $0x288] sm:$0xff] }
  0x1c   :  { %3349 = vmatprep.subr.mxu1 %v59_v47  ;;  %3407 = vmatprep.subr.mxu0 %v129_v54  ;;  %v108_v14 = vld [vmem:[%s6186_s2 + $0x218] sm:$0xff]  ;;  %v83_v17 = vld [vmem:[%s6186_s2 + $0x150] sm:$0xff]  ;;  %v82_v21 = vld [vmem:[%s6186_s2 + $0x148] sm:$0xff] }
  0x1d   :  { %3350 = vmatpush3.msra.mxu1 %v43_v49  ;;  %3408 = vmatpush3.msra.mxu0 %v113_v56  ;;  %v107_v18 = vld [vmem:[%s6186_s2 + $0x210] sm:$0xff]  ;;  %v38_v22 = vld [vmem:[%s6188_s0 + $0x18] sm:$0xff]  ;;  %v97_v23 = vld [vmem:[%s6186_s2 + $0x1c0] sm:$0xff] }
  0x1e   :  { %3351 = vmatprep.subr.mxu1 %v58_v51  ;;  %3409 = vmatprep.subr.mxu0 %v128_v58  ;;  %v106_v24 = vld [vmem:[%s6186_s2 + $0x208] sm:$0xff]  ;;  %v81_v25 = vld [vmem:[%s6186_s2 + $0x140] sm:$0xff]  ;;  %v96_v27 = vld [vmem:[%s6186_s2 + $0x1b8] sm:$0xff] }
  0x1f   :  { %3352 = vmatpush3.msra.mxu1 %v42_v53  ;;  %3410 = vmatpush3.msra.mxu0 %v112_v62  ;;  %v121_v26 = vld [vmem:[%s6186_s2 + $0x280] sm:$0xff]  ;;  %v80_v29 = vld [vmem:[%s6186_s2 + $0x138] sm:$0xff]  ;;  %v40_v30 = vld [vmem:[%s6188_s0 + $0x28] sm:$0xff] }
  0x20   :  { %3353 = vmatprep.subr.mxu1 %v57_v55  ;;  %3411 = vmatprep.subr.mxu0 %v127_v0  ;;  %v105_v28 = vld [vmem:[%s6186_s2 + $0x200] sm:$0xff]  ;;  %v95_v31 = vld [vmem:[%s6186_s2 + $0x1b0] sm:$0xff]  ;;  %v94_v34 = vld [vmem:[%s6186_s2 + $0x1a8] sm:$0xff] }
  0x21   :  { %3354 = vmatpush3.msra.mxu1 %v41_v57  ;;  %3412 = vmatpush3.msra.mxu0 %v111_v2  ;;  %v39_v32 = vld [vmem:[%s6188_s0 + $0x20] sm:$0xff]  ;;  %v79_v33 = vld [vmem:[%s6186_s2 + $0x130] sm:$0xff]  ;;  %v78_v35 = vld [vmem:[%s6186_s2 + $0x128] sm:$0xff] }
  0x22   :  { %3358 = vmatprep.subr.mxu1 %v104_v59  ;;  %209 = vmatmul.mubr.f32.vlgmr.msra.gmra.mxu1 %v35_v60  ;;  %v93_v36 = vld [vmem:[%s6186_s2 + $0x1a0] sm:$0xff]  ;;  %v92_v38 = vld [vmem:[%s6186_s2 + $0x198] sm:$0xff]  ;;  %v91_v40 = vld [vmem:[%s6186_s2 + $0x190] sm:$0xff] }
  0x23   :  { %3359 = vmatpush3.msra.mxu1 %v88_v61  ;;  %3413 = vmatprep.subr.mxu0 %v126_v4  ;;  %v77_v37 = vld [vmem:[%s6186_s2 + $0x120] sm:$0xff]  ;;  %v76_v39 = vld [vmem:[%s6186_s2 + $0x118] sm:$0xff]  ;;  %v75_v41 = vld [vmem:[%s6186_s2 + $0x110] sm:$0xff] }
  0x24   :  { %3360 = vmatprep.subr.mxu1 %v103_v63  ;;  %3414 = vmatpush3.msra.mxu0 %v110_v6  ;;  %v90_v42 = vld [vmem:[%s6186_s2 + $0x188] sm:$0xff]  ;;  %v89_v44 = vld [vmem:[%s6186_s2 + $0x180] sm:$0xff]  ;;  %v37_v46 = vld [vmem:[%s6188_s0 + $0x10] sm:$0xff]  ;;  %v6197_v63 = vlaneseq }
  0x25   :  { %3361 = vmatpush3.msra.mxu1 %v87_v1  ;;  %3415 = vmatprep.subr.mxu0 %v125_v8  ;;  %v74_v43 = vld [vmem:[%s6186_s2 + $0x108] sm:$0xff]  ;;  %v73_v45 = vld [vmem:[%s6186_s2 + $0x100] sm:$0xff]  ;;  %v427_v47 = vld [vmem:[%s6189_s4 + $0x78] sm:$0xff] }
  0x26   :  { %3362 = vmatprep.subr.mxu1 %v102_v3  ;;  %3416 = vmatpush3.msra.mxu0 %v109_v10  ;;  %v426_v48 = vld [vmem:[%s6189_s4 + $0x70] sm:$0xff]  ;;  %v425_v49 = vld [vmem:[%s6189_s4 + $0x68] sm:$0xff]  ;;  %v424_v50 = vld [vmem:[%s6189_s4 + $0x60] sm:$0xff]  ;;  %v4182_v0 = vand.u32 127, %v6197_v63  ;;  %v3746_v3 = vmov 1.0  }
  0x27   :  { %3363 = vmatpush3.msra.mxu1 %v86_v5  ;;  %3417 = vmatprep.subr.mxu0 %v124_v12  ;;  %v423_v51 = vld [vmem:[%s6189_s4 + $0x58] sm:$0xff]  ;;  %v422_v52 = vld [vmem:[%s6189_s4 + $0x50] sm:$0xff]  ;;  %v421_v53 = vld [vmem:[%s6189_s4 + $0x48] sm:$0xff] }
  0x28   :  { %3364 = vmatprep.subr.mxu1 %v101_v7  ;;  %3418 = vmatpush3.msra.mxu0 %v108_v14  ;;  %v420_v54 = vld [vmem:[%s6189_s4 + $0x40] sm:$0xff]  ;;  %v419_v55 = vld [vmem:[%s6189_s4 + $0x38] sm:$0xff]  ;;  %v418_v56 = vld [vmem:[%s6189_s4 + $0x30] sm:$0xff] }
  0x29   :  { %3365 = vmatpush3.msra.mxu1 %v85_v9  ;;  %3419 = vmatprep.subr.mxu0 %v123_v16  ;;  %v417_v57 = vld [vmem:[%s6189_s4 + $0x28] sm:$0xff]  ;;  %v416_v58 = vld [vmem:[%s6189_s4 + $0x20] sm:$0xff]  ;;  %v415_v59 = vld [vmem:[%s6189_s4 + $0x18] sm:$0xff] }
  0x2a   :  { %3366 = vmatprep.subr.mxu1 %v100_v11  ;;  %3420 = vmatpush3.msra.mxu0 %v107_v18  ;;  %v414_v60 = vld [vmem:[%s6189_s4 + $0x10] sm:$0xff]  ;;  %v413_v61 = vld [vmem:[%s6189_s4 + $0x8] sm:$0xff]  ;;  %v412_v62 = vld [vmem:[%s6189_s4] sm:$0xff] }
  0x2b   :  { %3367 = vmatpush3.msra.mxu1 %v84_v13  ;;  %3421 = vmatprep.subr.mxu0 %v122_v20  ;;  %v546_v6 = vld [vmem:[%s6190_s5 + $0x68] sm:$0xff]  ;;  %v548_v7 = vld [vmem:[%s6190_s5 + $0x78] sm:$0xff]  ;;  %v545_v8 = vld [vmem:[%s6190_s5 + $0x60] sm:$0xff] }
  0x2c   :  { %3368 = vmatprep.subr.mxu1 %v99_v15  ;;  %278 = vmatprep.mubr.f32.mxu1 %v38_v22  ;;  %v547_v9 = vld [vmem:[%s6190_s5 + $0x70] sm:$0xff]  ;;  %v542_v10 = vld [vmem:[%s6190_s5 + $0x48] sm:$0xff]  ;;  %v544_v11 = vld [vmem:[%s6190_s5 + $0x58] sm:$0xff] }
  0x2d   :  { %3369 = vmatpush3.msra.mxu1 %v83_v17  ;;  %3422 = vmatpush3.msra.mxu0 %v106_v24  ;;  %v541_v14 = vld [vmem:[%s6190_s5 + $0x40] sm:$0xff]  ;;  %v543_v15 = vld [vmem:[%s6190_s5 + $0x50] sm:$0xff]  ;;  %v538_v16 = vld [vmem:[%s6190_s5 + $0x28] sm:$0xff] }
  0x2e   :  { %3370 = vmatprep.subr.mxu1 %v98_v19  ;;  %3423 = vmatprep.subr.mxu0 %v121_v26  ;;  %v540_v17 = vld [vmem:[%s6190_s5 + $0x38] sm:$0xff]  ;;  %v537_v18 = vld [vmem:[%s6190_s5 + $0x20] sm:$0xff]  ;;  %v539_v19 = vld [vmem:[%s6190_s5 + $0x30] sm:$0xff] }
  0x2f   :  { %3371 = vmatpush3.msra.mxu1 %v82_v21  ;;  %3424 = vmatpush3.msra.mxu0 %v105_v28  ;;  %v534_v20 = vld [vmem:[%s6190_s5 + $0x8] sm:$0xff]  ;;  %v536_v22 = vld [vmem:[%s6190_s5 + $0x18] sm:$0xff] }
  0x30   :  { %3372 = vmatprep.subr.mxu1 %v97_v23  ;;  %348 = vmatprep.mubr.f32.mxu0 %v40_v30  ;;  %v533_v23 = vld [vmem:[%s6190_s5] sm:$0xff]  ;;  %v4244_v26 = vld [vmem:[%s6191_s6 + $0x1e8] sm:$0xff]  ;;  %v4253_v28 = vld [vmem:[%s6191_s6 + $0x1f8] sm:$0xff] }
  0x31   :  { %3373 = vmatpush3.msra.mxu1 %v81_v25  ;;  %349 = vmatmul.mubr.f32.vlgmr.msra.gmra.mxu0 %v39_v32  ;;  %v535_v25 = vld [vmem:[%s6190_s5 + $0x10] sm:$0xff]  ;;  %6306 = vst [vmem:[#allocation4_spill] sm:$0xff] %v4253_v28  ;;  %v4622_v63 = vld [vmem:[%s6191_s6 + $0x18] sm:$0xff] }
  0x32   :  { %3374 = vmatprep.subr.mxu1 %v96_v27  ;;  %623 = vmatprep.subr.mxu0 %v546_v6  ;;  %v6198_v27 = vmov 0.0   ;;  %v4423_v6 = vld [vmem:[%s6191_s6 + $0x130] sm:$0xff]  ;;  %6325 = vst [vmem:[#allocation23_spill] sm:$0xff] %v4622_v63 }
  0x33   :  { %3375 = vmatpush3.msra.mxu1 %v80_v29  ;;  %624 = vmatpush1.msra.mxu0 %v545_v8  ;;  %v4435_v8 = vld [vmem:[%s6191_s6 + $0x118] sm:$0xff] }
  0x34   :  { %3376 = vmatprep.subr.mxu1 %v95_v31  ;;  %625 = vmatprep.subr.mxu0 %v542_v10  ;;  %v4447_v10 = vld [vmem:[%s6191_s6 + $0x110] sm:$0xff] }
  0x35   :  { %3377 = vmatpush3.msra.mxu1 %v79_v33  ;;  %626 = vmatpush1.msra.mxu0 %v541_v14  ;;  %v3260_v33 = vld [vmem:[%s6192_s3] ss:$0 sm:$0xff]  ;;  %v4471_v14 = vld [vmem:[%s6191_s6 + $0xf0] sm:$0xff] }
  0x36   :  { %3378 = vmatprep.subr.mxu1 %v94_v34  ;;  %627 = vmatprep.subr.mxu0 %v538_v16  ;;  %v4483_v16 = vld [vmem:[%s6191_s6 + $0xd8] sm:$0xff] }
  0x37   :  { %3379 = vmatpush3.msra.mxu1 %v78_v35  ;;  %628 = vmatpush1.msra.mxu0 %v537_v18  ;;  %v4495_v18 = vld [vmem:[%s6191_s6 + $0xd0] sm:$0xff] }
  0x38   :  { %3380 = vmatprep.subr.mxu1 %v93_v36  ;;  %629 = vmatprep.subr.mxu0 %v534_v20  ;;  %v4507_v20 = vld [vmem:[%s6191_s6 + $0xb8] sm:$0xff] }
  0x39   :  { %3381 = vmatpush3.msra.mxu1 %v77_v37  ;;  %630 = vmatpush1.msra.mxu0 %v533_v23  ;;  %v4526_v23 = vld [vmem:[%s6191_s6 + $0x68] sm:$0xff] }
  0x3a   :  { %3382 = vmatprep.subr.mxu1 %v92_v38  ;;  %663 = vmatprep.mubr.f32.mxu0 %v6198_v27  ;;  %6309 = vst [vmem:[#allocation7_spill] sm:$0xff] %v4526_v23 }
  0x3b   :  { %3383 = vmatpush3.msra.mxu1 %v76_v39  ;;  %941 = vmatprep.subr.mxu0 %v4244_v26 }
  0x3c   :  { %3384 = vmatprep.subr.mxu1 %v91_v40 }
  0x3d   :  { %3385 = vmatpush3.msra.mxu1 %v75_v41 }
  0x3e   :  { %3386 = vmatprep.subr.mxu1 %v90_v42  ;;  %v4262_v42 = vld [vmem:[%s6191_s6 + $0x1e0] sm:$0xff] }
  0x3f   :  { %3387 = vmatpush3.msra.mxu1 %v74_v43  ;;  %v4267_v43 = vld [vmem:[%s6191_s6 + $0x1c8] sm:$0xff] }
  0x40   :  { %3388 = vmatprep.subr.mxu1 %v89_v44  ;;  %v4274_v44 = vld [vmem:[%s6191_s6 + $0x1c0] sm:$0xff] }
  0x41   :  { %3389 = vmatpush3.msra.mxu1 %v73_v45  ;;  %v4279_v45 = vld [vmem:[%s6191_s6 + $0x1f0] sm:$0xff] }
  0x42   :  { %279 = vmatmul.mubr.f32.vlgmr.msra.gmra.mxu1 %v37_v46  ;;  %3476 = vmatprep.subr.mxu1 %v427_v47  ;;  %v4286_v46 = vld [vmem:[%s6191_s6 + $0x1a8] sm:$0xff] }
  0x43   :  { %3477 = vmatpush3.msra.mxu1 %v427_v47  ;;  %v4291_v47 = vld [vmem:[%s6191_s6 + $0x1d8] sm:$0xff] }
  0x44   :  { %3478 = vmatprep.subr.mxu1 %v426_v48 }
  0x45   :  { %3479 = vmatpush3.msra.mxu1 %v426_v48  ;;  %v4298_v48 = vld [vmem:[%s6191_s6 + $0x1a0] sm:$0xff] }
  0x46   :  { %3480 = vmatprep.subr.mxu1 %v425_v49 }
  0x47   :  { %3481 = vmatpush3.msra.mxu1 %v425_v49  ;;  %v4303_v49 = vld [vmem:[%s6191_s6 + $0x1d0] sm:$0xff] }
  0x48   :  { %3482 = vmatprep.subr.mxu1 %v424_v50 }
  0x49   :  { %3483 = vmatpush3.msra.mxu1 %v424_v50  ;;  %v4310_v50 = vld [vmem:[%s6191_s6 + $0x188] sm:$0xff] }
  0x4a   :  { %3484 = vmatprep.subr.mxu1 %v423_v51 }
  0x4b   :  { %3485 = vmatpush3.msra.mxu1 %v423_v51  ;;  %v4315_v51 = vld [vmem:[%s6191_s6 + $0x1b8] sm:$0xff] }
  0x4c   :  { %3486 = vmatprep.subr.mxu1 %v422_v52 }
  0x4d   :  { %3487 = vmatpush3.msra.mxu1 %v422_v52  ;;  %v4322_v52 = vld [vmem:[%s6191_s6 + $0x180] sm:$0xff] }
  0x4e   :  { %3488 = vmatprep.subr.mxu1 %v421_v53 }
  0x4f   :  { %3489 = vmatpush3.msra.mxu1 %v421_v53  ;;  %v4327_v53 = vld [vmem:[%s6191_s6 + $0x1b0] sm:$0xff] }
  0x50   :  { %3490 = vmatprep.subr.mxu1 %v420_v54 }
  0x51   :  { %3491 = vmatpush3.msra.mxu1 %v420_v54  ;;  %v4334_v54 = vld [vmem:[%s6191_s6 + $0x168] sm:$0xff] }
  0x52   :  { %3492 = vmatprep.subr.mxu1 %v419_v55 }
  0x53   :  { %3493 = vmatpush3.msra.mxu1 %v419_v55  ;;  %v4339_v55 = vld [vmem:[%s6191_s6 + $0x198] sm:$0xff] }
  0x54   :  { %3494 = vmatprep.subr.mxu1 %v418_v56 }
  0x55   :  { %3495 = vmatpush3.msra.mxu1 %v418_v56  ;;  %v4346_v56 = vld [vmem:[%s6191_s6 + $0x160] sm:$0xff] }
  0x56   :  { %3496 = vmatprep.subr.mxu1 %v417_v57 }
  0x57   :  { %3497 = vmatpush3.msra.mxu1 %v417_v57  ;;  %v4351_v57 = vld [vmem:[%s6191_s6 + $0x190] sm:$0xff] }
  0x58   :  { %3498 = vmatprep.subr.mxu1 %v416_v58 }
  0x59   :  { %3499 = vmatpush3.msra.mxu1 %v416_v58  ;;  %v4358_v58 = vld [vmem:[%s6191_s6 + $0x148] sm:$0xff] }
  0x5a   :  { %3500 = vmatprep.subr.mxu1 %v415_v59 }
  0x5b   :  { %3501 = vmatpush3.msra.mxu1 %v415_v59  ;;  %v4363_v59 = vld [vmem:[%s6191_s6 + $0x178] sm:$0xff] }
  0x5c   :  { %3502 = vmatprep.subr.mxu1 %v414_v60 }
  0x5d   :  { %3503 = vmatpush3.msra.mxu1 %v414_v60  ;;  %v4370_v60 = vld [vmem:[%s6191_s6 + $0x140] sm:$0xff] }
  0x5e   :  { %3504 = vmatprep.subr.mxu1 %v413_v61 }
  0x5f   :  { %3505 = vmatpush3.msra.mxu1 %v413_v61  ;;  %v4375_v61 = vld [vmem:[%s6191_s6 + $0x170] sm:$0xff] }
  0x60   :  { %3506 = vmatprep.subr.mxu1 %v412_v62 }
  0x61   :  { %3507 = vmatpush3.msra.mxu1 %v412_v62  ;;  %v4382_v62 = vld [vmem:[%s6191_s6 + $0x128] sm:$0xff] }
  0x62   :  { %742 = vmatprep.subr.mxu1 %v548_v7  ;;  %v4430_v7 = vld [vmem:[%s6191_s6 + $0xe8] sm:$0xff] }
  0x7d   :  { %v372_v1 = vpop.permute.xlu1 %371 }
  0x7e   :  { %v366_v2 = vpop.permute.xlu0 %365  ;;  %vm390_vm1 = vcmp.eq.s32.totalorder %v372_v1, %v4182_v0  ;;  %v4394_v1 = vld [vmem:[%s6191_s6 + $0x120] sm:$0xff] }
  0x7f   :  { %vm388_vm0 = vcmp.eq.s32.totalorder %v366_v2, %v4182_v0  ;;  %v4399_v2 = vld [vmem:[%s6191_s6 + $0x150] sm:$0xff] }
  0x80   :  { %3508 = vmatprep.mubr.msk.f32.mxu1 %vm388_vm0, %v3746_v3 }
  0x81   :  { %v375_v4 = vpop.permute.xlu1 %374 }
  0x82   :  { %v369_v5 = vpop.permute.xlu0 %368  ;;  %vm391_vm3 = vcmp.eq.s32.totalorder %v375_v4, %v4182_v0  ;;  %v4411_v4 = vld [vmem:[%s6191_s6 + $0x138] sm:$0xff] }
  0x83   :  { %vm389_vm2 = vcmp.eq.s32.totalorder %v369_v5, %v4182_v0  ;;  %v4418_v5 = vld [vmem:[%s6191_s6 + $0x100] sm:$0xff] }
  0x84   :  { %3509 = vmatmul.mubr.msk.f32.vlgmr.msra.gmra.mxu1 %vm389_vm2, %v3746_v3 }
  0x85   :  { %3511 = vmatprep.mubr.msk.f32.mxu1 %vm390_vm1, %v3746_v3  ;;  %v381_v12 = vpop.permute.xlu1 %380  ;;  %743 = vmatpush1.msra.mxu1 %v547_v9  ;;  %v4442_v9 = vld [vmem:[%s6191_s6 + $0xe0] sm:$0xff] }
  0x86   :  { %v378_v13 = vpop.permute.xlu0 %377  ;;  %744 = vmatprep.subr.mxu1 %v544_v11  ;;  %vm393_vm5 = vcmp.eq.s32.totalorder %v381_v12, %v4182_v0  ;;  %v4454_v11 = vld [vmem:[%s6191_s6 + $0xc8] sm:$0xff]  ;;  %v4459_v12 = vld [vmem:[%s6191_s6 + $0xf8] sm:$0xff] }
  0x87   :  { %vm392_vm4 = vcmp.eq.s32.totalorder %v378_v13, %v4182_v0  ;;  %745 = vmatpush1.msra.mxu1 %v543_v15  ;;  %v4466_v13 = vld [vmem:[%s6191_s6 + $0xc0] sm:$0xff]  ;;  %v4478_v15 = vld [vmem:[%s6191_s6 + $0xa8] sm:$0xff] }
  0x88   :  { %3512 = vmatmul.mubr.msk.f32.gmra.mxu1 %vm391_vm3, %v3746_v3  ;;  %746 = vmatprep.subr.mxu1 %v540_v17  ;;  %v4490_v17 = vld [vmem:[%s6191_s6 + $0xa0] sm:$0xff] }
  0x89   :  { %3514 = vmatprep.mubr.msk.f32.mxu1 %vm392_vm4, %v3746_v3  ;;  %747 = vmatpush1.msra.mxu1 %v539_v19  ;;  %v387_v24 = vpop.permute.xlu1 %386  ;;  %v4502_v19 = vld [vmem:[%s6191_s6 + $0x88] sm:$0xff] }
  0x8a   :  { %v384_v21 = vpop.permute.xlu0 %383  ;;  %748 = vmatprep.subr.mxu1 %v536_v22  ;;  %vm395_vm7 = vcmp.eq.s32.totalorder %v387_v24, %v4182_v0  ;;  %6307 = vst [vmem:[#allocation5_spill] sm:$0xff] %v4502_v19  ;;  %v4519_v22 = vld [vmem:[%s6191_s6 + $0xb0] sm:$0xff]  ;;  %v4531_v24 = vld [vmem:[%s6191_s6 + $0x98] sm:$0xff] }
  0x8b   :  { %vm394_vm6 = vcmp.eq.s32.totalorder %v384_v21, %v4182_v0  ;;  %749 = vmatpush1.msra.mxu1 %v535_v25  ;;  %v4387_v0 = vld [vmem:[%s6191_s6 + $0x158] sm:$0xff]  ;;  %v4514_v21 = vld [vmem:[%s6191_s6 + $0x80] sm:$0xff]  ;;  %6310 = vst [vmem:[#allocation8_spill] sm:$0xff] %v4531_v24 }
  0x8c   :  { %3515 = vmatmul.mubr.msk.f32.gmra.mxu1 %vm393_vm5, %v3746_v3  ;;  %1012 = vmatprep.subr.mxu1 %v4253_v28  ;;  %6308 = vst [vmem:[#allocation6_spill] sm:$0xff] %v4514_v21  ;;  %v4538_v25 = vld [vmem:[%s6191_s6 + $0x60] sm:$0xff] }
  0x8d   :  { %3517 = vmatprep.mubr.msk.f32.mxu1 %vm394_vm6, %v3746_v3  ;;  %6311 = vst [vmem:[#allocation9_spill] sm:$0xff] %v4538_v25 }
  0x90   :  { %3518 = vmatmul.mubr.msk.f32.gmra.mxu1 %vm395_vm7, %v3746_v3  ;;  %v4406_v3 = vld [vmem:[%s6191_s6 + $0x108] sm:$0xff] }
  0x91   :  { %782 = vmatprep.mubr.f32.mxu1 %v6198_v27 }
  0xe2   :  { %v3355_v29 = vpop.f32.mrf.mxu1 }
  0xe4   :  { %v3356_v30 = vpop.f32.mrf.mxu1 }
  0xe5   :  { %v3357_v32 = vadd.f32 %v3356_v30, %v3355_v29  ;;  %v4543_v29 = vld [vmem:[%s6191_s6 + $0x90] sm:$0xff]  ;;  %v4550_v30 = vld [vmem:[%s6191_s6 + $0x78] sm:$0xff] }
  0xe6   :  { %6312 = vst [vmem:[#allocation10_spill] sm:$0xff] %v4543_v29  ;;  %6313 = vst [vmem:[#allocation11_spill] sm:$0xff] %v4550_v30 }
  0xe7   :  { %v211_v36 = vadd.f32 %v3357_v32, %v3260_v33  ;;  %v4562_v32 = vld [vmem:[%s6191_s6 + $0x70] sm:$0xff]  ;;  %v4567_v33 = vld [vmem:[%s6191_s6 + $0x40] sm:$0xff] }
  0xe8   :  { %6315 = vst [vmem:[#allocation13_spill] sm:$0xff] %v4562_v32  ;;  %6316 = vst [vmem:[#allocation14_spill] sm:$0xff] %v4567_v33 }
  0xf1   :  { %v3425_v31 = vpop.f32.mrf.mxu0 }
  0xf3   :  { %v3426_v35 = vpop.f32.mrf.mxu0 }
  0xf4   :  { %v3427_v39 = vadd.f32 %v3426_v35, %v3425_v31  ;;  %v4555_v31 = vld [vmem:[%s6191_s6 + $0x48] sm:$0xff] }
  0xf5   :  { %6314 = vst [vmem:[#allocation12_spill] sm:$0xff] %v4555_v31  ;;  %v4579_v35 = vld [vmem:[%s6191_s6 + $0x28] sm:$0xff] }
  0xf6   :  { %6318 = vst [vmem:[#allocation16_spill] sm:$0xff] %v4579_v35 }
 0x102   :  { %v3390_v34 = vpop.f32.mrf.mxu1 }
 0x104   :  { %v3391_v37 = vpop.f32.mrf.mxu1 }
 0x105   :  { %v3392_v38 = vadd.f32 %v3391_v37, %v3390_v34  ;;  %v4574_v34 = vld [vmem:[%s6191_s6 + $0x58] sm:$0xff]  ;;  %v4591_v37 = vld [vmem:[%s6191_s6 + $0x20] sm:$0xff] }
 0x106   :  { %6317 = vst [vmem:[#allocation15_spill] sm:$0xff] %v4574_v34  ;;  %6320 = vst [vmem:[#allocation18_spill] sm:$0xff] %v4591_v37 }
 0x107   :  { %v281_v40 = vadd.f32 %v3392_v38, %v211_v36  ;;  %v4586_v36 = vld [vmem:[%s6191_s6 + $0x50] sm:$0xff]  ;;  %v4598_v38 = vld [vmem:[%s6191_s6 + $0x38] sm:$0xff] }
 0x108   :  { %6319 = vst [vmem:[#allocation17_spill] sm:$0xff] %v4586_v36  ;;  %6321 = vst [vmem:[#allocation19_spill] sm:$0xff] %v4598_v38 }
 0x109   :  { %v351_v41 = vadd.f32 %v3427_v39, %v281_v40  ;;  %v4603_v39 = vld [vmem:[%s6191_s6 + $0x8] sm:$0xff]  ;;  %v4610_v40 = vld [vmem:[%s6191_s6 + $0x30] sm:$0xff] }
 0x10a   :  { %6322 = vst [vmem:[#allocation20_spill] sm:$0xff] %v4603_v39  ;;  %6323 = vst [vmem:[#allocation21_spill] sm:$0xff] %v4610_v40 }
 0x10b   :  { %3277 = vmatmul.mubr.msk.f32.vlgmr.msra.gmra.mxu0 %vm571_vm8, %v351_v41  ;;  %3286 = vmatmul.mubr.msk.f32.vlgmr.msra.gmra.mxu1 %vm571_vm8, %v351_v41  ;;  %v4615_v41 = vld [vmem:[%s6191_s6] sm:$0xff] }
 0x10c   :  { %942 = vmatpush1.msra.mxu0 %v4262_v42  ;;  %669 = vmatprep.mubr.f32.mxu0 %v6198_v27  ;;  %6324 = vst [vmem:[#allocation22_spill] sm:$0xff] %v4615_v41 }
 0x10d   :  { %943 = vmatprep.subr.mxu0 %v4267_v43  ;;  %788 = vmatprep.mubr.f32.mxu1 %v6198_v27  ;;  %v4629_v27 = vld [vmem:[%s6191_s6 + $0x10] sm:$0xff] }
 0x10e   :  { %944 = vmatpush1.msra.mxu0 %v4274_v44  ;;  %1013 = vmatpush1.msra.mxu1 %v4279_v45  ;;  %6326 = vst [vmem:[#allocation24_spill] sm:$0xff] %v4629_v27 }
 0x10f   :  { %945 = vmatprep.subr.mxu0 %v4286_v46  ;;  %1014 = vmatprep.subr.mxu1 %v4291_v47 }
 0x110   :  { %946 = vmatpush1.msra.mxu0 %v4298_v48  ;;  %1015 = vmatpush1.msra.mxu1 %v4303_v49 }
 0x111   :  { %947 = vmatprep.subr.mxu0 %v4310_v50  ;;  %1016 = vmatprep.subr.mxu1 %v4315_v51 }
 0x112   :  { %948 = vmatpush1.msra.mxu0 %v4322_v52  ;;  %1017 = vmatpush1.msra.mxu1 %v4327_v53 }
 0x113   :  { %949 = vmatprep.subr.mxu0 %v4334_v54  ;;  %1018 = vmatprep.subr.mxu1 %v4339_v55 }
 0x114   :  { %950 = vmatpush1.msra.mxu0 %v4346_v56  ;;  %1019 = vmatpush1.msra.mxu1 %v4351_v57 }
 0x115   :  { %951 = vmatprep.subr.mxu0 %v4358_v58  ;;  %1020 = vmatprep.subr.mxu1 %v4363_v59 }
 0x116   :  { %952 = vmatpush1.msra.mxu0 %v4370_v60  ;;  %1021 = vmatpush1.msra.mxu1 %v4375_v61 }
 0x117   :  { %953 = vmatprep.subr.mxu0 %v4382_v62  ;;  %1022 = vmatprep.subr.mxu1 %v4387_v0 }
 0x118   :  { %954 = vmatpush1.msra.mxu0 %v4394_v1  ;;  %1023 = vmatpush1.msra.mxu1 %v4399_v2 }
 0x119   :  { %955 = vmatprep.subr.mxu0 %v4406_v3  ;;  %1024 = vmatprep.subr.mxu1 %v4411_v4 }
 0x11a   :  { %956 = vmatpush1.msra.mxu0 %v4418_v5  ;;  %1025 = vmatpush1.msra.mxu1 %v4423_v6 }
 0x11b   :  { %957 = vmatprep.subr.mxu0 %v4430_v7  ;;  %1026 = vmatprep.subr.mxu1 %v4435_v8 }
 0x11c   :  { %958 = vmatpush1.msra.mxu0 %v4442_v9  ;;  %1027 = vmatpush1.msra.mxu1 %v4447_v10 }
 0x11d   :  { %959 = vmatprep.subr.mxu0 %v4454_v11  ;;  %1028 = vmatprep.subr.mxu1 %v4459_v12 }
 0x11e   :  { %960 = vmatpush1.msra.mxu0 %v4466_v13  ;;  %1029 = vmatpush1.msra.mxu1 %v4471_v14 }
 0x11f   :  { %961 = vmatprep.subr.mxu0 %v4478_v15  ;;  %1030 = vmatprep.subr.mxu1 %v4483_v16 }
 0x120   :  { %962 = vmatpush1.msra.mxu0 %v4490_v17  ;;  %1031 = vmatpush1.msra.mxu1 %v4495_v18 }
 0x121   :  { %963 = vmatprep.subr.mxu0 %v4502_v19  ;;  %1032 = vmatprep.subr.mxu1 %v4507_v20 }
 0x122   :  { %964 = vmatpush1.msra.mxu0 %v4514_v21  ;;  %1033 = vmatpush1.msra.mxu1 %v4519_v22 }
 0x123   :  { %965 = vmatprep.subr.mxu0 %v4526_v23  ;;  %1034 = vmatprep.subr.mxu1 %v4531_v24 }
 0x124   :  { %966 = vmatpush1.msra.mxu0 %v4538_v25  ;;  %1035 = vmatpush1.msra.mxu1 %v4543_v29 }
 0x125   :  { %1036 = vmatprep.subr.mxu1 %v4550_v30  ;;  %967 = vmatprep.subr.mxu0 %v4555_v31 }
 0x126   :  { %1037 = vmatpush1.msra.mxu1 %v4562_v32  ;;  %968 = vmatpush1.msra.mxu0 %v4567_v33 }
 0x127   :  { %1038 = vmatprep.subr.mxu1 %v4574_v34  ;;  %969 = vmatprep.subr.mxu0 %v4579_v35 }
 0x128   :  { %1039 = vmatpush1.msra.mxu1 %v4586_v36  ;;  %970 = vmatpush1.msra.mxu0 %v4591_v37 }
 0x129   :  { %1040 = vmatprep.subr.mxu1 %v4598_v38  ;;  %971 = vmatprep.subr.mxu0 %v4603_v39  ;;  %v6327_v39 = vmov 0.0  }
 0x12a   :  { %1041 = vmatpush1.msra.mxu1 %v4610_v40  ;;  %972 = vmatpush1.msra.mxu0 %v4615_v41 }
 0x12b   :  { %1042 = vmatprep.subr.mxu1 %v4622_v63  ;;  %1180 = vmatprep.subr.mxu0 %v4244_v26 }
 0x12c   :  { %1043 = vmatpush1.msra.mxu1 %v4629_v27 }
 0x12d   :  { %1251 = vmatprep.subr.mxu1 %v4253_v28 }
 0x144   :  { %v3510_v37 = vpop.f32.mrf.mxu1 }
 0x146   :  { %v494_v38 = vpop.f32.mrf.mxu1 }
 0x147   :  { %3278 = vmatmul.mubr.msk.f32.gmra.mxu0 %vm571_vm8, %v494_v38  ;;  %3287 = vmatmul.mubr.msk.f32.gmra.mxu1 %vm571_vm8, %v494_v38 }
 0x148   :  { %675 = vmatprep.mubr.f32.mxu0 %v6327_v39  ;;  %794 = vmatprep.mubr.f32.mxu1 %v6327_v39  ;;  %v3513_v40 = vpop.f32.mrf.mxu1 }
 0x14a   :  { %v504_v28 = vpop.f32.mrf.mxu1 }
 0x14b   :  { %3279 = vmatmul.mubr.msk.f32.gmra.mxu0 %vm571_vm8, %v3510_v37  ;;  %3288 = vmatmul.mubr.msk.f32.gmra.mxu1 %vm571_vm8, %v3510_v37 }
 0x14c   :  { %681 = vmatprep.mubr.f32.mxu0 %v6327_v39  ;;  %800 = vmatprep.mubr.f32.mxu1 %v6327_v39  ;;  %v3516_v38 = vpop.f32.mrf.mxu1 }
 0x14e   :  { %v514_v37 = vpop.f32.mrf.mxu1 }
 0x14f   :  { %3280 = vmatmul.mubr.msk.f32.gmra.mxu0 %vm571_vm8, %v504_v28  ;;  %3289 = vmatmul.mubr.msk.f32.gmra.mxu1 %vm571_vm8, %v504_v28 }
 0x150   :  { %687 = vmatprep.mubr.f32.mxu0 %v6327_v39  ;;  %806 = vmatprep.mubr.f32.mxu1 %v6327_v39  ;;  %v3519_v28 = vpop.f32.mrf.mxu1 }
 0x153   :  { %3281 = vmatmul.mubr.msk.f32.gmra.mxu0 %vm571_vm8, %v3513_v40  ;;  %3290 = vmatmul.mubr.msk.f32.gmra.mxu1 %vm571_vm8, %v3513_v40  ;;  %v524_v40 = vpop.f32.mrf.mxu1 }
 0x154   :  { %693 = vmatprep.mubr.f32.mxu0 %v6327_v39  ;;  %812 = vmatprep.mubr.f32.mxu1 %v6327_v39 }
 0x157   :  { %3282 = vmatmul.mubr.msk.f32.gmra.mxu0 %vm571_vm8, %v514_v37  ;;  %3291 = vmatmul.mubr.msk.f32.gmra.mxu1 %vm571_vm8, %v514_v37  ;;  %v6329_v37 = vld [vmem:[#allocation18_spill] sm:$0xff] }
 0x158   :  { %699 = vmatprep.mubr.f32.mxu0 %v6327_v39  ;;  %818 = vmatprep.mubr.f32.mxu1 %v6327_v39 }
 0x15b   :  { %3283 = vmatmul.mubr.msk.f32.gmra.mxu0 %vm571_vm8, %v3516_v38  ;;  %3292 = vmatmul.mubr.msk.f32.gmra.mxu1 %vm571_vm8, %v3516_v38  ;;  %v6328_v38 = vld [vmem:[#allocation19_spill] sm:$0xff] }
 0x15c   :  { %705 = vmatprep.mubr.f32.mxu0 %v6327_v39  ;;  %824 = vmatprep.mubr.f32.mxu1 %v6327_v39 }
 0x15f   :  { %3284 = vmatmul.mubr.msk.f32.gmra.mxu0 %vm571_vm8, %v524_v40  ;;  %3293 = vmatmul.mubr.msk.f32.gmra.mxu1 %vm571_vm8, %v524_v40  ;;  %v6331_v40 = vld [vmem:[#allocation20_spill] sm:$0xff] }
 0x160   :  { %711 = vmatprep.mubr.f32.mxu0 %v6327_v39  ;;  %830 = vmatprep.mubr.f32.mxu1 %v6327_v39 }
 0x163   :  { %3285 = vmatmul.mubr.msk.f32.gmra.mxu0 %vm571_vm8, %v3519_v28  ;;  %3294 = vmatmul.mubr.msk.f32.gmra.mxu1 %vm571_vm8, %v3519_v28  ;;  %v6330_v28 = vld [vmem:[#allocation21_spill] sm:$0xff] }
 0x164   :  { %1005 = vmatprep.mubr.f32.mxu0 %v6327_v39  ;;  %1076 = vmatprep.mubr.f32.mxu1 %v6327_v39 }
 0x167   :  { %1006 = vmatmul.mubr.f32.vlgmr.msra.gmra.mxu0 %v6327_v39  ;;  %1077 = vmatmul.mubr.f32.vlgmr.msra.gmra.mxu1 %v6327_v39 }
 0x168   :  { %1181 = vmatpush1.msra.mxu0 %v4262_v42  ;;  %1252 = vmatpush1.msra.mxu1 %v4279_v45 }
 0x169   :  { %1182 = vmatprep.subr.mxu0 %v4267_v43  ;;  %1253 = vmatprep.subr.mxu1 %v4291_v47 }
 0x16a   :  { %1183 = vmatpush1.msra.mxu0 %v4274_v44  ;;  %1254 = vmatpush1.msra.mxu1 %v4303_v49 }
 0x16b   :  { %1184 = vmatprep.subr.mxu0 %v4286_v46  ;;  %1255 = vmatprep.subr.mxu1 %v4315_v51 }
 0x16c   :  { %1185 = vmatpush1.msra.mxu0 %v4298_v48  ;;  %1256 = vmatpush1.msra.mxu1 %v4327_v53 }
 0x16d   :  { %1186 = vmatprep.subr.mxu0 %v4310_v50  ;;  %1257 = vmatprep.subr.mxu1 %v4339_v55 }
 0x16e   :  { %1187 = vmatpush1.msra.mxu0 %v4322_v52  ;;  %1258 = vmatpush1.msra.mxu1 %v4351_v57 }
 0x16f   :  { %1188 = vmatprep.subr.mxu0 %v4334_v54  ;;  %1259 = vmatprep.subr.mxu1 %v4363_v59 }
 0x170   :  { %1189 = vmatpush1.msra.mxu0 %v4346_v56  ;;  %1260 = vmatpush1.msra.mxu1 %v4375_v61 }
 0x171   :  { %1190 = vmatprep.subr.mxu0 %v4358_v58  ;;  %1261 = vmatprep.subr.mxu1 %v4387_v0 }
 0x172   :  { %1191 = vmatpush1.msra.mxu0 %v4370_v60  ;;  %1262 = vmatpush1.msra.mxu1 %v4399_v2 }
 0x173   :  { %1192 = vmatprep.subr.mxu0 %v4382_v62  ;;  %1263 = vmatprep.subr.mxu1 %v4411_v4 }
 0x174   :  { %1193 = vmatpush1.msra.mxu0 %v4394_v1  ;;  %1264 = vmatpush1.msra.mxu1 %v4423_v6 }
 0x175   :  { %1194 = vmatprep.subr.mxu0 %v4406_v3  ;;  %1265 = vmatprep.subr.mxu1 %v4435_v8 }
 0x176   :  { %1195 = vmatpush1.msra.mxu0 %v4418_v5  ;;  %1266 = vmatpush1.msra.mxu1 %v4447_v10 }
 0x177   :  { %1196 = vmatprep.subr.mxu0 %v4430_v7  ;;  %1267 = vmatprep.subr.mxu1 %v4459_v12 }
 0x178   :  { %1197 = vmatpush1.msra.mxu0 %v4442_v9  ;;  %1268 = vmatpush1.msra.mxu1 %v4471_v14 }
 0x179   :  { %1198 = vmatprep.subr.mxu0 %v4454_v11  ;;  %1269 = vmatprep.subr.mxu1 %v4483_v16 }
 0x17a   :  { %1199 = vmatpush1.msra.mxu0 %v4466_v13  ;;  %1270 = vmatpush1.msra.mxu1 %v4495_v18 }
 0x17b   :  { %1200 = vmatprep.subr.mxu0 %v4478_v15  ;;  %1271 = vmatprep.subr.mxu1 %v4507_v20 }
 0x17c   :  { %1201 = vmatpush1.msra.mxu0 %v4490_v17  ;;  %1272 = vmatpush1.msra.mxu1 %v4519_v22 }
 0x17d   :  { %1202 = vmatprep.subr.mxu0 %v4502_v19  ;;  %1273 = vmatprep.subr.mxu1 %v4531_v24 }
 0x17e   :  { %1203 = vmatpush1.msra.mxu0 %v4514_v21  ;;  %1274 = vmatpush1.msra.mxu1 %v4543_v29 }
 0x17f   :  { %1204 = vmatprep.subr.mxu0 %v4526_v23  ;;  %1275 = vmatprep.subr.mxu1 %v4550_v30 }
 0x180   :  { %1205 = vmatpush1.msra.mxu0 %v4538_v25  ;;  %1276 = vmatpush1.msra.mxu1 %v4562_v32 }
 0x181   :  { %1206 = vmatprep.subr.mxu0 %v4555_v31  ;;  %1277 = vmatprep.subr.mxu1 %v4574_v34 }
 0x182   :  { %1207 = vmatpush1.msra.mxu0 %v4567_v33  ;;  %1278 = vmatpush1.msra.mxu1 %v4586_v36 }
 0x183   :  { %1208 = vmatprep.subr.mxu0 %v4579_v35  ;;  %1279 = vmatprep.subr.mxu1 %v6328_v38  ;;  %v6332_v35 = vld [vmem:[#allocation4_spill] sm:$0xff] }
 0x184   :  { %1209 = vmatpush1.msra.mxu0 %v6329_v37  ;;  %1280 = vmatpush1.msra.mxu1 %v6330_v28 }
 0x185   :  { %1210 = vmatprep.subr.mxu0 %v6331_v40  ;;  %1281 = vmatprep.subr.mxu1 %v4622_v63 }
 0x186   :  { %1211 = vmatpush1.msra.mxu0 %v4615_v41  ;;  %1244 = vmatprep.mubr.f32.mxu0 %v6327_v39 }
 0x187   :  { %1282 = vmatpush1.msra.mxu1 %v4629_v27  ;;  %1315 = vmatprep.mubr.f32.mxu1 %v6327_v39 }
 0x188   :  { %1419 = vmatprep.subr.mxu0 %v4244_v26  ;;  %1490 = vmatprep.subr.mxu1 %v6332_v35 }
 0x1cb   :  { %v665_v38 = vpop.f32.mrf.mxu0  ;;  %v784_v37 = vpop.f32.mrf.mxu1 }
 0x1cd   :  { %v667_v36 = vpop.f32.mrf.mxu0  ;;  %v786_v28 = vpop.f32.mrf.mxu1 }
 0x207   :  { %v4737_v33 = vpop.f32.mrf.mxu0  ;;  %v4739_v40 = vpop.f32.mrf.mxu1 }
 0x208   :  { %6333 = vst [vmem:[#allocation4_spill] sm:$0xff] %v4737_v33  ;;  %6334 = vst [vmem:[#allocation25_spill] sm:$0xff] %v4739_v40 }
 0x209   :  { %v4741_v63 = vpop.f32.mrf.mxu0  ;;  %v4743_v41 = vpop.f32.mrf.mxu1 }
 0x20a   :  { %6335 = vst [vmem:[#allocation26_spill] sm:$0xff] %v4741_v63  ;;  %6336 = vst [vmem:[#allocation27_spill] sm:$0xff] %v4743_v41 }
 0x20b   :  { %v4745_v34 = vpop.f32.mrf.mxu0  ;;  %v4747_v27 = vpop.f32.mrf.mxu1 }
 0x20c   :  { %6337 = vst [vmem:[#allocation28_spill] sm:$0xff] %v4745_v34  ;;  %6338 = vst [vmem:[#allocation29_spill] sm:$0xff] %v4747_v27 }
 0x20d   :  { %v4749_v39 = vpop.f32.mrf.mxu0  ;;  %v4751_v26 = vpop.f32.mrf.mxu1 }
 0x20e   :  { %6339 = vst [vmem:[#allocation30_spill] sm:$0xff] %v4749_v39  ;;  %6340 = vst [vmem:[#allocation31_spill] sm:$0xff] %v4751_v26 }
 0x20f   :  { %v4753_v35 = vpop.f32.mrf.mxu0  ;;  %v4755_v31 = vpop.f32.mrf.mxu1 }
 0x210   :  { %6341 = vst [vmem:[#allocation32_spill] sm:$0xff] %v4753_v35  ;;  %6342 = vst [vmem:[#allocation33_spill] sm:$0xff] %v4755_v31  ;;  %v6353_v31 = vlaneseq }
 0x211   :  { %v4757_v32 = vpop.f32.mrf.mxu0  ;;  %v4759_v33 = vpop.f32.mrf.mxu1 }
 0x212   :  { %6343 = vst [vmem:[#allocation34_spill] sm:$0xff] %v4757_v32  ;;  %6344 = vst [vmem:[#allocation35_spill] sm:$0xff] %v4759_v33  ;;  %v552_v32 = vshrl.u32 %v6353_v31, 7 }
 0x213   :  { %v4761_v40 = vpop.f32.mrf.mxu0  ;;  %v4763_v63 = vpop.f32.mrf.mxu1 }
 0x214   :  { %6345 = vst [vmem:[#allocation36_spill] sm:$0xff] %v4761_v40  ;;  %6346 = vst [vmem:[#allocation37_spill] sm:$0xff] %v4763_v63  ;;  %v561_v21 = vsub.s32 2, %v552_v32 }
 0x215   :  { %v4765_v41 = vpop.f32.mrf.mxu0  ;;  %v4767_v34 = vpop.f32.mrf.mxu1 }
 0x216   :  { %6347 = vst [vmem:[#allocation38_spill] sm:$0xff] %v4765_v41  ;;  %6348 = vst [vmem:[#allocation39_spill] sm:$0xff] %v4767_v34  ;;  %v553_v41 = vsub.s32 0, %v552_v32 }
 0x217   :  { %v4769_v27 = vpop.f32.mrf.mxu0  ;;  %v4771_v39 = vpop.f32.mrf.mxu1 }
 0x218   :  { %6349 = vst [vmem:[#allocation40_spill] sm:$0xff] %v4769_v27  ;;  %6350 = vst [vmem:[#allocation41_spill] sm:$0xff] %v4771_v39  ;;  %v549_v27 = vld [vmem:[%s6193_s7] sm:$0xf] }
 0x219   :  { %v4773_v26 = vpop.f32.mrf.mxu0  ;;  %v4775_v35 = vpop.f32.mrf.mxu1  ;;  %v4795_v31 = vrot.slane %v549_v27, %v553_v41 }
 0x21a   :  { %6351 = vst [vmem:[#allocation42_spill] sm:$0xff] %v4773_v26  ;;  %6352 = vst [vmem:[#allocation43_spill] sm:$0xff] %v4775_v35  ;;  %v557_v26 = vsub.s32 1, %v552_v32 }
 0x21b   :  { %v4778_v25 = vpop.f32.mrf.mxu0  ;;  %v4780_v33 = vpop.f32.mrf.mxu1  ;;  %6361 = vst [vmem:[#allocation51_spill] sm:$0xff] %v4795_v31  ;;  %v666_v30 = vadd.f32 %v665_v38, %v4795_v31 }
 0x21c   :  { %6354 = vst [vmem:[#allocation44_spill] sm:$0xff] %v4778_v25  ;;  %6355 = vst [vmem:[#allocation45_spill] sm:$0xff] %v4780_v33  ;;  %v4799_v33 = vrot.slane %v549_v27, %v557_v26 }
 0x21d   :  { %v4782_v40 = vpop.f32.mrf.mxu0  ;;  %v4784_v63 = vpop.f32.mrf.mxu1 }
 0x21e   :  { %6356 = vst [vmem:[#allocation46_spill] sm:$0xff] %v4782_v40  ;;  %6357 = vst [vmem:[#allocation47_spill] sm:$0xff] %v4784_v63 }
 0x21f   :  { %v4789_v39 = vpop.f32.mrf.mxu0  ;;  %v4791_v34 = vpop.f32.mrf.mxu1 }
 0x220   :  { %6358 = vst [vmem:[#allocation48_spill] sm:$0xff] %v4789_v39  ;;  %6359 = vst [vmem:[#allocation49_spill] sm:$0xff] %v4791_v34  ;;  %v668_v39 = vadd.f32 %v667_v36, %v4799_v33 }
 0x221   :  { %v4793_v35 = vpop.f32.mrf.mxu0  ;;  %v4801_v40 = vpop.f32.mrf.mxu1 }
 0x222   :  { %6360 = vst [vmem:[#allocation50_spill] sm:$0xff] %v4793_v35  ;;  %6363 = vst [vmem:[#allocation53_spill] sm:$0xff] %v4801_v40 }
 0x223   :  { %v4797_v25 = vpop.f32.mrf.mxu0  ;;  %v4807_v29 = vpop.f32.mrf.mxu1 }
 0x224   :  { %6362 = vst [vmem:[#allocation52_spill] sm:$0xff] %v4797_v25  ;;  %6365 = vst [vmem:[#allocation55_spill] sm:$0xff] %v4807_v29  ;;  %v4811_v25 = vrot.slane %v549_v27, %v561_v21 }
 0x225   :  { %v4803_v63 = vpop.f32.mrf.mxu0  ;;  %v4809_v19 = vpop.f32.mrf.mxu1 }
 0x226   :  { %6364 = vst [vmem:[#allocation54_spill] sm:$0xff] %v4803_v63  ;;  %6366 = vst [vmem:[#allocation56_spill] sm:$0xff] %v4809_v19  ;;  %v565_v63 = vsub.s32 3, %v552_v32  ;;  %v785_v38 = vadd.f32 %v784_v37, %v4811_v25 }
 0x227   :  { %v1007_v23 = vpop.f32.mrf.mxu0  ;;  %v1078_v40 = vpop.f32.mrf.mxu1 }
 0x228   :  { %v1083_v34 = vadd.f32 %v1007_v23, %v666_v30  ;;  %v4814_v31 = vrot.slane %v549_v27, %v565_v63  ;;  %v1085_v36 = vadd.f32 %v1078_v40, %v785_v38 }
 0x229   :  { %v1009_v35 = vpop.f32.mrf.mxu0  ;;  %v1080_v29 = vpop.f32.mrf.mxu1 }
 0x22a   :  { %v3295_v41 = vmul.f32 -1.442695, %v1083_v34  ;;  %v1084_v24 = vadd.f32 %v1009_v35, %v668_v39  ;;  %v787_v23 = vadd.f32 %v786_v28, %v4814_v31  ;;  %v3297_v30 = vmul.f32 -1.442695, %v1085_v36 }
 0x22c   :  { %3569 = vpow2.f32 %v3295_v41  ;;  %v3296_v26 = vmul.f32 -1.442695, %v1084_v24  ;;  %v1086_v39 = vadd.f32 %v1080_v29, %v787_v23 }
 0x22e   :  { %3571 = vpow2.f32 %v3296_v26 }
 0x22f   :  { %3573 = vpow2.f32 %v3297_v30 }
 0x239   :  { %v3570_v34 = vpop.eup %3569 }
 0x23a   :  { %v1096_v35 = vadd.f32 1.0, %v3570_v34 }
 0x23b   :  { %v3572_v19 = vpop.eup %3571 }
 0x23c   :  { %3575 = vrcp.f32 %v1096_v35  ;;  %v1097_v21 = vadd.f32 1.0, %v3572_v19  ;;  %v3574_v24 = vpop.eup %3573 }
 0x23d   :  { %3577 = vtanh.f32 %v1086_v39  ;;  %v1098_v63 = vadd.f32 1.0, %v3574_v24 }
 0x23e   :  { %3579 = vrcp.f32 %v1097_v21 }
 0x23f   :  { %3581 = vrcp.f32 %v1098_v63 }
 0x249   :  { %v3576_v32 = vpop.eup %3575 }
 0x24a   :  { %v3578_v41 = vpop.eup %3577 }
 0x24b   :  { %v3580_v37 = vpop.eup %3579  ;;  %v1107_v40 = vmul.f32 %v3578_v41, %v3576_v32 }
 0x24c   :  { %v1106_v27 = vmul.f32 0.0, %v3580_v37  ;;  %v3582_v29 = vpop.eup %3581 }
 0x24e   :  { %v4817_v26 = vadd.f32 %v1107_v40, %v1106_v27  ;;  %v4905_v40 = vld [vmem:[%s6191_s6 + $0x1e8] sm:$0xff] }
 0x250   :  { %3583 = vtanh.f32 %v4817_v26 }
 0x25d   :  { %v3584_v28 = vpop.eup %3583 }
 0x25e   :  { %v1110_v38 = vmul.f32 %v3584_v28, %v3582_v29  ;;  %v4917_v29 = vld [vmem:[%s6191_s6 + $0x1e0] sm:$0xff]  ;;  %v4922_v28 = vld [vmem:[%s6191_s6 + $0x1f0] sm:$0xff] }
 0x260   :  { %1245 = vmatmul.mubr.f32.vlgmr.msra.gmra.mxu0 %v1110_v38  ;;  %1316 = vmatmul.mubr.f32.vlgmr.msra.gmra.mxu1 %v1110_v38  ;;  %v4929_v38 = vld [vmem:[%s6191_s6 + $0x1c8] sm:$0xff] }
 0x261   :  { %1420 = vmatpush1.msra.mxu0 %v4262_v42  ;;  %1491 = vmatpush1.msra.mxu1 %v4279_v45  ;;  %v6367_v42 = vld [vmem:[#allocation5_spill] sm:$0xff]  ;;  %v6370_v45 = vld [vmem:[#allocation10_spill] sm:$0xff] }
 0x262   :  { %1421 = vmatprep.subr.mxu0 %v4267_v43  ;;  %1492 = vmatprep.subr.mxu1 %v4291_v47  ;;  %v6368_v43 = vld [vmem:[#allocation8_spill] sm:$0xff]  ;;  %v6372_v47 = vld [vmem:[#allocation11_spill] sm:$0xff] }
 0x263   :  { %1422 = vmatpush1.msra.mxu0 %v4274_v44  ;;  %1493 = vmatpush1.msra.mxu1 %v4303_v49  ;;  %v6369_v44 = vld [vmem:[#allocation6_spill] sm:$0xff]  ;;  %v6374_v49 = vld [vmem:[#allocation13_spill] sm:$0xff]  ;;  %6394 = vst [vmem:[#allocation8_spill] sm:$0xff] %v4905_v40 }
 0x264   :  { %1423 = vmatprep.subr.mxu0 %v4286_v46  ;;  %1494 = vmatprep.subr.mxu1 %v4315_v51  ;;  %v6371_v46 = vld [vmem:[#allocation7_spill] sm:$0xff] }
 0x265   :  { %1424 = vmatpush1.msra.mxu0 %v4298_v48  ;;  %1495 = vmatpush1.msra.mxu1 %v4327_v53  ;;  %v6373_v48 = vld [vmem:[#allocation9_spill] sm:$0xff]  ;;  %v6376_v51 = vld [vmem:[#allocation15_spill] sm:$0xff] }
 0x266   :  { %1425 = vmatprep.subr.mxu0 %v4310_v50  ;;  %1496 = vmatprep.subr.mxu1 %v4339_v55  ;;  %v6375_v50 = vld [vmem:[#allocation12_spill] sm:$0xff]  ;;  %v6378_v53 = vld [vmem:[#allocation17_spill] sm:$0xff]  ;;  %v6380_v55 = vld [vmem:[#allocation19_spill] sm:$0xff] }
 0x267   :  { %1426 = vmatpush1.msra.mxu0 %v4322_v52  ;;  %1497 = vmatpush1.msra.mxu1 %v4351_v57  ;;  %v6377_v52 = vld [vmem:[#allocation14_spill] sm:$0xff]  ;;  %v6382_v57 = vld [vmem:[#allocation21_spill] sm:$0xff] }
 0x268   :  { %1427 = vmatprep.subr.mxu0 %v4334_v54  ;;  %1498 = vmatprep.subr.mxu1 %v4363_v59  ;;  %v6379_v54 = vld [vmem:[#allocation16_spill] sm:$0xff]  ;;  %v6384_v59 = vld [vmem:[#allocation23_spill] sm:$0xff] }
 0x269   :  { %1428 = vmatpush1.msra.mxu0 %v4346_v56  ;;  %1499 = vmatpush1.msra.mxu1 %v4375_v61  ;;  %v6381_v56 = vld [vmem:[#allocation18_spill] sm:$0xff]  ;;  %v6386_v61 = vmov 0.0  }
 0x26a   :  { %1429 = vmatprep.subr.mxu0 %v4358_v58  ;;  %1500 = vmatprep.subr.mxu1 %v4387_v0  ;;  %v6383_v58 = vld [vmem:[#allocation20_spill] sm:$0xff]  ;;  %v6388_v0 = vld [vmem:[#allocation51_spill] sm:$0xff] }
 0x26b   :  { %1430 = vmatpush1.msra.mxu0 %v4370_v60  ;;  %1501 = vmatpush1.msra.mxu1 %v4399_v2  ;;  %v6385_v60 = vld [vmem:[#allocation22_spill] sm:$0xff] }
 0x26c   :  { %1431 = vmatprep.subr.mxu0 %v4382_v62  ;;  %1502 = vmatprep.subr.mxu1 %v4411_v4  ;;  %v6387_v62 = vld [vmem:[#allocation24_spill] sm:$0xff]  ;;  %v6390_v4 = vld [vmem:[#allocation26_spill] sm:$0xff] }
 0x26d   :  { %1432 = vmatpush1.msra.mxu0 %v4394_v1  ;;  %1503 = vmatpush1.msra.mxu1 %v4423_v6  ;;  %v6389_v1 = vld [vmem:[#allocation4_spill] sm:$0xff] }
 0x26e   :  { %1433 = vmatprep.subr.mxu0 %v4406_v3  ;;  %1504 = vmatprep.subr.mxu1 %v4435_v8  ;;  %v672_v2 = vadd.f32 %v6389_v1, %v6388_v0  ;;  %v5054_v1 = vld [vmem:[%s6191_s6 + $0x138] sm:$0xff] }
 0x26f   :  { %1434 = vmatpush1.msra.mxu0 %v4418_v5  ;;  %1505 = vmatpush1.msra.mxu1 %v4447_v10  ;;  %v674_v5 = vadd.f32 %v6390_v4, %v4799_v33  ;;  %v5073_v4 = vld [vmem:[%s6191_s6 + $0x108] sm:$0xff] }
 0x270   :  { %1435 = vmatprep.subr.mxu0 %v4430_v7  ;;  %1506 = vmatprep.subr.mxu1 %v4459_v12  ;;  %v6391_v12 = vld [vmem:[#allocation25_spill] sm:$0xff] }
 0x271   :  { %1436 = vmatpush1.msra.mxu0 %v4442_v9  ;;  %1507 = vmatpush1.msra.mxu1 %v4471_v14 }
 0x272   :  { %1437 = vmatprep.subr.mxu0 %v4454_v11  ;;  %1508 = vmatprep.subr.mxu1 %v4483_v16  ;;  %v6392_v16 = vld [vmem:[#allocation27_spill] sm:$0xff] }
 0x273   :  { %1438 = vmatpush1.msra.mxu0 %v4466_v13  ;;  %1509 = vmatpush1.msra.mxu1 %v4495_v18  ;;  %v791_v13 = vadd.f32 %v6391_v12, %v4811_v25  ;;  %v5117_v12 = vld [vmem:[%s6191_s6 + $0xc8] sm:$0xff] }
 0x274   :  { %1439 = vmatprep.subr.mxu0 %v4478_v15  ;;  %1510 = vmatprep.subr.mxu1 %v4507_v20 }
 0x275   :  { %1440 = vmatpush1.msra.mxu0 %v4490_v17  ;;  %1511 = vmatpush1.msra.mxu1 %v4519_v22  ;;  %v793_v17 = vadd.f32 %v6392_v16, %v4814_v31  ;;  %v5141_v16 = vld [vmem:[%s6191_s6 + $0xa8] sm:$0xff] }
 0x276   :  { %1441 = vmatprep.subr.mxu0 %v6367_v42  ;;  %1512 = vmatprep.subr.mxu1 %v6368_v43  ;;  %v4934_v42 = vld [vmem:[%s6191_s6 + $0x1d8] sm:$0xff]  ;;  %v4941_v43 = vld [vmem:[%s6191_s6 + $0x1c0] sm:$0xff] }
 0x277   :  { %1442 = vmatpush1.msra.mxu0 %v6369_v44  ;;  %1513 = vmatpush1.msra.mxu1 %v6370_v45  ;;  %v4946_v44 = vld [vmem:[%s6191_s6 + $0x1d0] sm:$0xff]  ;;  %v4953_v45 = vld [vmem:[%s6191_s6 + $0x1a8] sm:$0xff] }
 0x278   :  { %1443 = vmatprep.subr.mxu0 %v6371_v46  ;;  %1514 = vmatprep.subr.mxu1 %v6372_v47  ;;  %v4958_v46 = vld [vmem:[%s6191_s6 + $0x1b8] sm:$0xff]  ;;  %v4965_v47 = vld [vmem:[%s6191_s6 + $0x1a0] sm:$0xff] }
 0x279   :  { %1444 = vmatpush1.msra.mxu0 %v6373_v48  ;;  %1515 = vmatpush1.msra.mxu1 %v6374_v49  ;;  %v4970_v48 = vld [vmem:[%s6191_s6 + $0x1b0] sm:$0xff]  ;;  %v4977_v49 = vld [vmem:[%s6191_s6 + $0x188] sm:$0xff] }
 0x27a   :  { %1445 = vmatprep.subr.mxu0 %v6375_v50  ;;  %1516 = vmatprep.subr.mxu1 %v6376_v51  ;;  %v4982_v50 = vld [vmem:[%s6191_s6 + $0x198] sm:$0xff]  ;;  %v4989_v51 = vld [vmem:[%s6191_s6 + $0x180] sm:$0xff] }
 0x27b   :  { %1446 = vmatpush1.msra.mxu0 %v6377_v52  ;;  %1517 = vmatpush1.msra.mxu1 %v6378_v53  ;;  %v4994_v52 = vld [vmem:[%s6191_s6 + $0x190] sm:$0xff]  ;;  %v5001_v53 = vld [vmem:[%s6191_s6 + $0x168] sm:$0xff] }
 0x27c   :  { %1447 = vmatprep.subr.mxu0 %v6379_v54  ;;  %1518 = vmatprep.subr.mxu1 %v6380_v55  ;;  %v5006_v54 = vld [vmem:[%s6191_s6 + $0x178] sm:$0xff]  ;;  %v5013_v55 = vld [vmem:[%s6191_s6 + $0x160] sm:$0xff] }
 0x27d   :  { %1448 = vmatpush1.msra.mxu0 %v6381_v56  ;;  %1519 = vmatpush1.msra.mxu1 %v6382_v57  ;;  %v5018_v56 = vld [vmem:[%s6191_s6 + $0x170] sm:$0xff]  ;;  %v5025_v57 = vld [vmem:[%s6191_s6 + $0x148] sm:$0xff] }
 0x27e   :  { %1449 = vmatprep.subr.mxu0 %v6383_v58  ;;  %1520 = vmatprep.subr.mxu1 %v6384_v59  ;;  %v5030_v58 = vld [vmem:[%s6191_s6 + $0x158] sm:$0xff]  ;;  %v5037_v59 = vld [vmem:[%s6191_s6 + $0x140] sm:$0xff] }
 0x27f   :  { %1450 = vmatpush1.msra.mxu0 %v6385_v60  ;;  %1483 = vmatprep.mubr.f32.mxu0 %v6386_v61  ;;  %v5042_v60 = vld [vmem:[%s6191_s6 + $0x150] sm:$0xff] }
 0x280   :  { %1521 = vmatpush1.msra.mxu1 %v6387_v62  ;;  %1554 = vmatprep.mubr.f32.mxu1 %v6386_v61  ;;  %v5049_v62 = vld [vmem:[%s6191_s6 + $0x128] sm:$0xff] }
 0x281   :  { %1658 = vmatprep.subr.mxu0 %v4905_v40 }
 0x320   :  { %v1246_v3 = vpop.f32.mrf.mxu0  ;;  %v1317_v11 = vpop.f32.mrf.mxu1 }
 0x321   :  { %v1322_v6 = vadd.f32 %v1246_v3, %v672_v2  ;;  %v1324_v14 = vadd.f32 %v1317_v11, %v791_v13  ;;  %v5061_v2 = vld [vmem:[%s6191_s6 + $0x120] sm:$0xff]  ;;  %v5066_v3 = vld [vmem:[%s6191_s6 + $0x130] sm:$0xff]  ;;  %v5124_v13 = vld [vmem:[%s6191_s6 + $0xd8] sm:$0xff] }
 0x322   :  { %v1248_v7 = vpop.f32.mrf.mxu0  ;;  %v1319_v15 = vpop.f32.mrf.mxu1  ;;  %v5112_v11 = vld [vmem:[%s6191_s6 + $0xf0] sm:$0xff] }
 0x323   :  { %v3298_v8 = vmul.f32 -1.442695, %v1322_v6  ;;  %v1323_v9 = vadd.f32 %v1248_v7, %v674_v5  ;;  %v3300_v18 = vmul.f32 -1.442695, %v1324_v14  ;;  %v1325_v19 = vadd.f32 %v1319_v15, %v793_v17  ;;  %v5078_v5 = vld [vmem:[%s6191_s6 + $0x118] sm:$0xff]  ;;  %v5083_v6 = vld [vmem:[%s6191_s6 + $0x100] sm:$0xff] }
 0x324   :  { %v5090_v7 = vld [vmem:[%s6191_s6 + $0x110] sm:$0xff]  ;;  %v5129_v14 = vld [vmem:[%s6191_s6 + $0xc0] sm:$0xff]  ;;  %v5146_v17 = vld [vmem:[%s6191_s6 + $0xb8] sm:$0xff] }
 0x325   :  { %3585 = vpow2.f32 %v3298_v8  ;;  %v3299_v10 = vmul.f32 -1.442695, %v1323_v9  ;;  %v5095_v8 = vld [vmem:[%s6191_s6 + $0xe8] sm:$0xff]  ;;  %v5100_v9 = vld [vmem:[%s6191_s6 + $0xf8] sm:$0xff]  ;;  %v5134_v15 = vld [vmem:[%s6191_s6 + $0xd0] sm:$0xff] }
 0x327   :  { %3587 = vpow2.f32 %v3299_v10  ;;  %v5107_v10 = vld [vmem:[%s6191_s6 + $0xe0] sm:$0xff] }
 0x328   :  { %3589 = vpow2.f32 %v3300_v18  ;;  %v5153_v18 = vld [vmem:[%s6191_s6 + $0xa0] sm:$0xff] }
 0x329   :  { %3591 = vtanh.f32 %v1325_v19  ;;  %v5158_v19 = vld [vmem:[%s6191_s6 + $0xb0] sm:$0xff] }
 0x32a   :  { %6396 = vst [vmem:[#allocation10_spill] sm:$0xff] %v5158_v19 }
 0x332   :  { %v3586_v20 = vpop.eup %3585 }
 0x333   :  { %v1335_v22 = vadd.f32 1.0, %v3586_v20  ;;  %v5165_v20 = vld [vmem:[%s6191_s6 + $0x88] sm:$0xff] }
 0x334   :  { %v3588_v36 = vpop.eup %3587  ;;  %6397 = vst [vmem:[#allocation7_spill] sm:$0xff] %v5165_v20 }
 0x335   :  { %3593 = vrcp.f32 %v1335_v22  ;;  %v1336_v23 = vadd.f32 1.0, %v3588_v36  ;;  %v3590_v30 = vpop.eup %3589  ;;  %v5170_v22 = vld [vmem:[%s6191_s6 + $0x98] sm:$0xff]  ;;  %v5177_v36 = vld [vmem:[%s6191_s6 + $0x80] sm:$0xff] }
 0x336   :  { %v3592_v34 = vpop.eup %3591  ;;  %v1337_v24 = vadd.f32 1.0, %v3590_v30  ;;  %6398 = vst [vmem:[#allocation11_spill] sm:$0xff] %v5170_v22  ;;  %6399 = vst [vmem:[#allocation9_spill] sm:$0xff] %v5177_v36  ;;  %v5189_v30 = vld [vmem:[%s6191_s6 + $0x68] sm:$0xff] }
 0x337   :  { %3595 = vrcp.f32 %v1336_v23  ;;  %v5182_v23 = vld [vmem:[%s6191_s6 + $0x90] sm:$0xff]  ;;  %6401 = vst [vmem:[#allocation12_spill] sm:$0xff] %v5189_v30 }
 0x338   :  { %3597 = vrcp.f32 %v1337_v24  ;;  %6400 = vst [vmem:[#allocation13_spill] sm:$0xff] %v5182_v23  ;;  %v5218_v24 = vld [vmem:[%s6191_s6 + $0x58] sm:$0xff] }
 0x339   :  { %6406 = vst [vmem:[#allocation19_spill] sm:$0xff] %v5218_v24 }
 0x342   :  { %v3594_v39 = vpop.eup %3593 }
 0x343   :  { %v1346_v35 = vmul.f32 %v3594_v39, %v3592_v34  ;;  %v5194_v34 = vld [vmem:[%s6191_s6 + $0x78] sm:$0xff]  ;;  %v5201_v39 = vld [vmem:[%s6191_s6 + $0x60] sm:$0xff] }
 0x344   :  { %v3596_v21 = vpop.eup %3595  ;;  %6402 = vst [vmem:[#allocation15_spill] sm:$0xff] %v5194_v34  ;;  %6403 = vst [vmem:[#allocation14_spill] sm:$0xff] %v5201_v39 }
 0x345   :  { %v1345_v32 = vmul.f32 %v3596_v21, %v4817_v26  ;;  %v3598_v37 = vpop.eup %3597  ;;  %v4910_v26 = vld [vmem:[%s6191_s6 + $0x1f8] sm:$0xff]  ;;  %v5213_v21 = vld [vmem:[%s6191_s6 + $0x48] sm:$0xff] }
 0x346   :  { %6395 = vst [vmem:[#allocation6_spill] sm:$0xff] %v4910_v26  ;;  %1729 = vmatprep.subr.mxu1 %v4910_v26  ;;  %6405 = vst [vmem:[#allocation16_spill] sm:$0xff] %v5213_v21 }
 0x347   :  { %v4893_v41 = vadd.f32 %v1346_v35, %v1345_v32  ;;  %v5206_v35 = vld [vmem:[%s6191_s6 + $0x70] sm:$0xff]  ;;  %v5225_v32 = vld [vmem:[%s6191_s6 + $0x40] sm:$0xff] }
 0x348   :  { %6404 = vst [vmem:[#allocation17_spill] sm:$0xff] %v5206_v35  ;;  %6407 = vst [vmem:[#allocation18_spill] sm:$0xff] %v5225_v32 }
 0x349   :  { %3599 = vtanh.f32 %v4893_v41 }
 0x356   :  { %v3600_v63 = vpop.eup %3599 }
 0x357   :  { %v4896_v27 = vmul.f32 %v3600_v63, %v3598_v37  ;;  %v5230_v37 = vld [vmem:[%s6191_s6 + $0x50] sm:$0xff]  ;;  %v5237_v63 = vld [vmem:[%s6191_s6 + $0x28] sm:$0xff] }
 0x358   :  { %6408 = vst [vmem:[#allocation21_spill] sm:$0xff] %v5230_v37  ;;  %6409 = vst [vmem:[#allocation20_spill] sm:$0xff] %v5237_v63 }
 0x359   :  { %6393 = vst [vmem:[#allocation5_spill] sm:$0xff] %v4896_v27  ;;  %1484 = vmatmul.mubr.f32.vlgmr.msra.gmra.mxu0 %v4896_v27  ;;  %1555 = vmatmul.mubr.f32.vlgmr.msra.gmra.mxu1 %v4896_v27  ;;  %v5242_v27 = vld [vmem:[%s6191_s6 + $0x38] sm:$0xff] }
 0x35a   :  { %1722 = vmatprep.mubr.f32.mxu0 %v6386_v61  ;;  %1793 = vmatprep.mubr.f32.mxu1 %v6386_v61  ;;  %6410 = vst [vmem:[#allocation23_spill] sm:$0xff] %v5242_v27  ;;  %v5249_v61 = vld [vmem:[%s6191_s6 + $0x20] sm:$0xff] }
 0x35b   :  { %1659 = vmatpush1.msra.mxu0 %v4917_v29  ;;  %1730 = vmatpush1.msra.mxu1 %v4922_v28  ;;  %6411 = vst [vmem:[#allocation22_spill] sm:$0xff] %v5249_v61 }
 0x35c   :  { %1660 = vmatprep.subr.mxu0 %v4929_v38  ;;  %1731 = vmatprep.subr.mxu1 %v4934_v42 }
 0x35d   :  { %1661 = vmatpush1.msra.mxu0 %v4941_v43  ;;  %1732 = vmatpush1.msra.mxu1 %v4946_v44 }
 0x35e   :  { %1662 = vmatprep.subr.mxu0 %v4953_v45  ;;  %1733 = vmatprep.subr.mxu1 %v4958_v46 }
 0x35f   :  { %1663 = vmatpush1.msra.mxu0 %v4965_v47  ;;  %1734 = vmatpush1.msra.mxu1 %v4970_v48 }
 0x360   :  { %1664 = vmatprep.subr.mxu0 %v4977_v49  ;;  %1735 = vmatprep.subr.mxu1 %v4982_v50 }
 0x361   :  { %1665 = vmatpush1.msra.mxu0 %v4989_v51  ;;  %1736 = vmatpush1.msra.mxu1 %v4994_v52 }
 0x362   :  { %1666 = vmatprep.subr.mxu0 %v5001_v53  ;;  %1737 = vmatprep.subr.mxu1 %v5006_v54 }
 0x363   :  { %1667 = vmatpush1.msra.mxu0 %v5013_v55  ;;  %1738 = vmatpush1.msra.mxu1 %v5018_v56 }
 0x364   :  { %1668 = vmatprep.subr.mxu0 %v5025_v57  ;;  %1739 = vmatprep.subr.mxu1 %v5030_v58 }
 0x365   :  { %1669 = vmatpush1.msra.mxu0 %v5037_v59  ;;  %1740 = vmatpush1.msra.mxu1 %v5042_v60 }
 0x366   :  { %1670 = vmatprep.subr.mxu0 %v5049_v62  ;;  %1741 = vmatprep.subr.mxu1 %v5054_v1 }
 0x367   :  { %1671 = vmatpush1.msra.mxu0 %v5061_v2  ;;  %1742 = vmatpush1.msra.mxu1 %v5066_v3 }
 0x368   :  { %1672 = vmatprep.subr.mxu0 %v5073_v4  ;;  %1743 = vmatprep.subr.mxu1 %v5078_v5 }
 0x369   :  { %1673 = vmatpush1.msra.mxu0 %v5083_v6  ;;  %1744 = vmatpush1.msra.mxu1 %v5090_v7 }
 0x36a   :  { %1674 = vmatprep.subr.mxu0 %v5095_v8  ;;  %1745 = vmatprep.subr.mxu1 %v5100_v9 }
 0x36b   :  { %1675 = vmatpush1.msra.mxu0 %v5107_v10  ;;  %1746 = vmatpush1.msra.mxu1 %v5112_v11 }
 0x36c   :  { %1676 = vmatprep.subr.mxu0 %v5117_v12  ;;  %1747 = vmatprep.subr.mxu1 %v5124_v13 }
 0x36d   :  { %1677 = vmatpush1.msra.mxu0 %v5129_v14  ;;  %1748 = vmatpush1.msra.mxu1 %v5134_v15 }
 0x36e   :  { %1678 = vmatprep.subr.mxu0 %v5141_v16  ;;  %1749 = vmatprep.subr.mxu1 %v5146_v17 }
 0x36f   :  { %1679 = vmatpush1.msra.mxu0 %v5153_v18  ;;  %1750 = vmatpush1.msra.mxu1 %v5158_v19 }
 0x370   :  { %1680 = vmatprep.subr.mxu0 %v5165_v20  ;;  %1751 = vmatprep.subr.mxu1 %v5170_v22  ;;  %v6420_v22 = vld [vmem:[#allocation31_spill] sm:$0xff] }
 0x371   :  { %1681 = vmatpush1.msra.mxu0 %v5177_v36  ;;  %1752 = vmatpush1.msra.mxu1 %v5182_v23 }
 0x372   :  { %1682 = vmatprep.subr.mxu0 %v5189_v30  ;;  %1753 = vmatprep.subr.mxu1 %v5194_v34 }
 0x373   :  { %1683 = vmatpush1.msra.mxu0 %v5201_v39  ;;  %1754 = vmatpush1.msra.mxu1 %v5206_v35  ;;  %v5254_v35 = vld [vmem:[%s6191_s6 + $0x30] sm:$0xff] }
 0x374   :  { %1684 = vmatprep.subr.mxu0 %v5213_v21  ;;  %1755 = vmatprep.subr.mxu1 %v5218_v24  ;;  %6412 = vst [vmem:[#allocation24_spill] sm:$0xff] %v5254_v35  ;;  %v5261_v21 = vld [vmem:[%s6191_s6 + $0x8] sm:$0xff]  ;;  %v5266_v24 = vld [vmem:[%s6191_s6 + $0x18] sm:$0xff] }
 0x375   :  { %1685 = vmatpush1.msra.mxu0 %v5225_v32  ;;  %1756 = vmatpush1.msra.mxu1 %v5230_v37  ;;  %6413 = vst [vmem:[#allocation4_spill] sm:$0xff] %v5261_v21  ;;  %6414 = vst [vmem:[#allocation26_spill] sm:$0xff] %v5266_v24  ;;  %v5273_v32 = vld [vmem:[%s6191_s6] sm:$0xff]  ;;  %v5278_v37 = vld [vmem:[%s6191_s6 + $0x10] sm:$0xff] }
 0x376   :  { %1686 = vmatprep.subr.mxu0 %v5237_v63  ;;  %1757 = vmatprep.subr.mxu1 %v5242_v27  ;;  %6415 = vst [vmem:[#allocation25_spill] sm:$0xff] %v5273_v32  ;;  %6416 = vst [vmem:[#allocation27_spill] sm:$0xff] %v5278_v37  ;;  %v6417_v27 = vld [vmem:[#allocation28_spill] sm:$0xff] }
 0x377   :  { %1687 = vmatpush1.msra.mxu0 %v5249_v61  ;;  %1758 = vmatpush1.msra.mxu1 %v5254_v35  ;;  %v678_v63 = vadd.f32 %v6417_v27, %v6388_v0  ;;  %v6418_v61 = vld [vmem:[#allocation30_spill] sm:$0xff]  ;;  %v799_v27 = vadd.f32 %v6420_v22, %v4814_v31  ;;  %v6424_v22 = vld [vmem:[#allocation11_spill] sm:$0xff] }
 0x378   :  { %1688 = vmatprep.subr.mxu0 %v5261_v21  ;;  %1759 = vmatprep.subr.mxu1 %v5266_v24  ;;  %v680_v34 = vadd.f32 %v6418_v61, %v4799_v33 }
 0x379   :  { %1689 = vmatpush1.msra.mxu0 %v5273_v32  ;;  %1760 = vmatpush1.msra.mxu1 %v5278_v37  ;;  %v6419_v37 = vld [vmem:[#allocation29_spill] sm:$0xff] }
 0x37a   :  { %1897 = vmatprep.subr.mxu0 %v4905_v40  ;;  %1968 = vmatprep.subr.mxu1 %v4910_v26  ;;  %v797_v40 = vadd.f32 %v6419_v37, %v4811_v25 }
 0x419   :  { %v1485_v39 = vpop.f32.mrf.mxu0  ;;  %v1556_v32 = vpop.f32.mrf.mxu1 }
 0x41a   :  { %v1561_v35 = vadd.f32 %v1485_v39, %v678_v63  ;;  %v1563_v36 = vadd.f32 %v1556_v32, %v797_v40  ;;  %v6426_v63 = vld [vmem:[#allocation13_spill] sm:$0xff] }
 0x41b   :  { %v1487_v30 = vpop.f32.mrf.mxu0  ;;  %v1558_v26 = vpop.f32.mrf.mxu1 }
 0x41c   :  { %v3301_v21 = vmul.f32 -1.442695, %v1561_v35  ;;  %v1562_v23 = vadd.f32 %v1487_v30, %v680_v34  ;;  %v3303_v0 = vmul.f32 -1.442695, %v1563_v36  ;;  %v1564_v20 = vadd.f32 %v1558_v26, %v799_v27  ;;  %v6425_v36 = vld [vmem:[#allocation9_spill] sm:$0xff]  ;;  %v6427_v27 = vld [vmem:[#allocation12_spill] sm:$0xff] }
 0x41e   :  { %3601 = vpow2.f32 %v3301_v21  ;;  %v3302_v24 = vmul.f32 -1.442695, %v1562_v23 }
 0x420   :  { %3603 = vpow2.f32 %v3302_v24 }
 0x421   :  { %3605 = vpow2.f32 %v3303_v0 }
 0x422   :  { %3607 = vtanh.f32 %v1564_v20  ;;  %v6423_v20 = vld [vmem:[#allocation7_spill] sm:$0xff] }
 0x42b   :  { %v3602_v19 = vpop.eup %3601 }
 0x42c   :  { %v1574_v61 = vadd.f32 1.0, %v3602_v19 }
 0x42d   :  { %v3604_v39 = vpop.eup %3603 }
 0x42e   :  { %3609 = vrcp.f32 %v1574_v61  ;;  %v1575_v30 = vadd.f32 1.0, %v3604_v39  ;;  %v3606_v23 = vpop.eup %3605  ;;  %v6428_v61 = vld [vmem:[#allocation15_spill] sm:$0xff]  ;;  %v6429_v39 = vld [vmem:[#allocation14_spill] sm:$0xff] }
 0x42f   :  { %v3608_v34 = vpop.eup %3607  ;;  %v1576_v40 = vadd.f32 1.0, %v3606_v23  ;;  %v6431_v23 = vld [vmem:[#allocation16_spill] sm:$0xff] }
 0x430   :  { %3611 = vrcp.f32 %v1575_v30  ;;  %v6430_v30 = vld [vmem:[#allocation17_spill] sm:$0xff] }
 0x431   :  { %3613 = vrcp.f32 %v1576_v40  ;;  %v6436_v40 = vld [vmem:[#allocation23_spill] sm:$0xff] }
 0x43b   :  { %v3610_v35 = vpop.eup %3609 }
 0x43c   :  { %v1585_v21 = vmul.f32 %v3610_v35, %v3608_v34  ;;  %v6432_v34 = vld [vmem:[#allocation19_spill] sm:$0xff]  ;;  %v6433_v35 = vld [vmem:[#allocation18_spill] sm:$0xff] }
 0x43d   :  { %v3612_v24 = vpop.eup %3611 }
 0x43e   :  { %v1584_v32 = vmul.f32 %v3612_v24, %v4893_v41  ;;  %v3614_v26 = vpop.eup %3613  ;;  %v6422_v41 = vld [vmem:[#allocation10_spill] sm:$0xff]  ;;  %v6435_v24 = vld [vmem:[#allocation20_spill] sm:$0xff] }
 0x440   :  { %v5297_v37 = vadd.f32 %v1585_v21, %v1584_v32  ;;  %v6434_v21 = vld [vmem:[#allocation21_spill] sm:$0xff]  ;;  %v6437_v32 = vld [vmem:[#allocation22_spill] sm:$0xff] }
 0x442   :  { %3615 = vtanh.f32 %v5297_v37 }
 0x44f   :  { %v3616_v0 = vpop.eup %3615 }
 0x450   :  { %v5300_v19 = vmul.f32 %v3616_v0, %v3614_v26  ;;  %v6438_v26 = vld [vmem:[#allocation24_spill] sm:$0xff] }
 0x451   :  { %v6439_v0 = vld [vmem:[#allocation4_spill] sm:$0xff] }
 0x452   :  { %6421 = vst [vmem:[#allocation28_spill] sm:$0xff] %v5300_v19  ;;  %1723 = vmatmul.mubr.f32.vlgmr.msra.gmra.mxu0 %v5300_v19  ;;  %1794 = vmatmul.mubr.f32.vlgmr.msra.gmra.mxu1 %v5300_v19  ;;  %v6440_v19 = vld [vmem:[#allocation26_spill] sm:$0xff] }
 0x453   :  { %1898 = vmatpush1.msra.mxu0 %v4917_v29  ;;  %1969 = vmatpush1.msra.mxu1 %v4922_v28 }
 0x454   :  { %1899 = vmatprep.subr.mxu0 %v4929_v38  ;;  %1970 = vmatprep.subr.mxu1 %v4934_v42 }
 0x455   :  { %1900 = vmatpush1.msra.mxu0 %v4941_v43  ;;  %1971 = vmatpush1.msra.mxu1 %v4946_v44 }
 0x456   :  { %1901 = vmatprep.subr.mxu0 %v4953_v45  ;;  %1972 = vmatprep.subr.mxu1 %v4958_v46 }
 0x457   :  { %1902 = vmatpush1.msra.mxu0 %v4965_v47  ;;  %1973 = vmatpush1.msra.mxu1 %v4970_v48 }
 0x458   :  { %1903 = vmatprep.subr.mxu0 %v4977_v49  ;;  %1974 = vmatprep.subr.mxu1 %v4982_v50 }
 0x459   :  { %1904 = vmatpush1.msra.mxu0 %v4989_v51  ;;  %1975 = vmatpush1.msra.mxu1 %v4994_v52 }
 0x45a   :  { %1905 = vmatprep.subr.mxu0 %v5001_v53  ;;  %1976 = vmatprep.subr.mxu1 %v5006_v54 }
 0x45b   :  { %1906 = vmatpush1.msra.mxu0 %v5013_v55  ;;  %1977 = vmatpush1.msra.mxu1 %v5018_v56 }
 0x45c   :  { %1907 = vmatprep.subr.mxu0 %v5025_v57  ;;  %1978 = vmatprep.subr.mxu1 %v5030_v58 }
 0x45d   :  { %1908 = vmatpush1.msra.mxu0 %v5037_v59  ;;  %1979 = vmatpush1.msra.mxu1 %v5042_v60 }
 0x45e   :  { %1909 = vmatprep.subr.mxu0 %v5049_v62  ;;  %1980 = vmatprep.subr.mxu1 %v5054_v1 }
 0x45f   :  { %1910 = vmatpush1.msra.mxu0 %v5061_v2  ;;  %1981 = vmatpush1.msra.mxu1 %v5066_v3 }
 0x460   :  { %1911 = vmatprep.subr.mxu0 %v5073_v4  ;;  %1982 = vmatprep.subr.mxu1 %v5078_v5 }
 0x461   :  { %1912 = vmatpush1.msra.mxu0 %v5083_v6  ;;  %1983 = vmatpush1.msra.mxu1 %v5090_v7 }
 0x462   :  { %1913 = vmatprep.subr.mxu0 %v5095_v8  ;;  %1984 = vmatprep.subr.mxu1 %v5100_v9 }
 0x463   :  { %1914 = vmatpush1.msra.mxu0 %v5107_v10  ;;  %1985 = vmatpush1.msra.mxu1 %v5112_v11 }
 0x464   :  { %1915 = vmatprep.subr.mxu0 %v5117_v12  ;;  %1986 = vmatprep.subr.mxu1 %v5124_v13 }
 0x465   :  { %1916 = vmatpush1.msra.mxu0 %v5129_v14  ;;  %1987 = vmatpush1.msra.mxu1 %v5134_v15 }
 0x466   :  { %1917 = vmatprep.subr.mxu0 %v5141_v16  ;;  %1988 = vmatprep.subr.mxu1 %v5146_v17 }
 0x467   :  { %1918 = vmatpush1.msra.mxu0 %v5153_v18  ;;  %1989 = vmatpush1.msra.mxu1 %v6422_v41 }
 0x468   :  { %1919 = vmatprep.subr.mxu0 %v6423_v20  ;;  %1990 = vmatprep.subr.mxu1 %v6424_v22  ;;  %v6450_v22 = vld [vmem:[#allocation35_spill] sm:$0xff] }
 0x469   :  { %1920 = vmatpush1.msra.mxu0 %v6425_v36  ;;  %1991 = vmatpush1.msra.mxu1 %v6426_v63 }
 0x46a   :  { %1921 = vmatprep.subr.mxu0 %v6427_v27  ;;  %1992 = vmatprep.subr.mxu1 %v6428_v61 }
 0x46b   :  { %1922 = vmatpush1.msra.mxu0 %v6429_v39  ;;  %1993 = vmatpush1.msra.mxu1 %v6430_v30  ;;  %v6441_v30 = vld [vmem:[#allocation25_spill] sm:$0xff] }
 0x46c   :  { %1923 = vmatprep.subr.mxu0 %v6431_v23  ;;  %1994 = vmatprep.subr.mxu1 %v6432_v34  ;;  %v6442_v23 = vmov 0.0   ;;  %v6443_v34 = vld [vmem:[#allocation27_spill] sm:$0xff] }
 0x46d   :  { %1924 = vmatpush1.msra.mxu0 %v6433_v35  ;;  %1995 = vmatpush1.msra.mxu1 %v6434_v21  ;;  %v6444_v21 = vld [vmem:[#allocation8_spill] sm:$0xff] }
 0x46e   :  { %1925 = vmatprep.subr.mxu0 %v6435_v24  ;;  %1996 = vmatprep.subr.mxu1 %v6436_v40  ;;  %v6445_v24 = vld [vmem:[#allocation6_spill] sm:$0xff]  ;;  %v6446_v40 = vld [vmem:[#allocation51_spill] sm:$0xff] }
 0x46f   :  { %1926 = vmatpush1.msra.mxu0 %v6437_v32  ;;  %1997 = vmatpush1.msra.mxu1 %v6438_v26  ;;  %v6447_v32 = vld [vmem:[#allocation32_spill] sm:$0xff] }
 0x470   :  { %1927 = vmatprep.subr.mxu0 %v6439_v0  ;;  %1998 = vmatprep.subr.mxu1 %v6440_v19  ;;  %v684_v35 = vadd.f32 %v6447_v32, %v6446_v40  ;;  %v6448_v0 = vld [vmem:[#allocation34_spill] sm:$0xff]  ;;  %v805_v32 = vadd.f32 %v6450_v22, %v4814_v31 }
 0x471   :  { %1928 = vmatpush1.msra.mxu0 %v6441_v30  ;;  %1961 = vmatprep.mubr.f32.mxu0 %v6442_v23  ;;  %v686_v39 = vadd.f32 %v6448_v0, %v4799_v33 }
 0x472   :  { %1999 = vmatpush1.msra.mxu1 %v6443_v34  ;;  %2032 = vmatprep.mubr.f32.mxu1 %v6442_v23  ;;  %v6449_v23 = vld [vmem:[#allocation33_spill] sm:$0xff] }
 0x473   :  { %2136 = vmatprep.subr.mxu0 %v6444_v21  ;;  %2207 = vmatprep.subr.mxu1 %v6445_v24  ;;  %v803_v21 = vadd.f32 %v6449_v23, %v4811_v25 }
 0x512   :  { %v1724_v26 = vpop.f32.mrf.mxu0  ;;  %v1795_v34 = vpop.f32.mrf.mxu1 }
 0x513   :  { %v1800_v19 = vadd.f32 %v1724_v26, %v684_v35  ;;  %v1802_v36 = vadd.f32 %v1795_v34, %v803_v21  ;;  %v6456_v26 = vld [vmem:[#allocation13_spill] sm:$0xff] }
 0x514   :  { %v1726_v61 = vpop.f32.mrf.mxu0  ;;  %v1797_v24 = vpop.f32.mrf.mxu1 }
 0x515   :  { %v3304_v30 = vmul.f32 -1.442695, %v1800_v19  ;;  %v1801_v27 = vadd.f32 %v1726_v61, %v686_v39  ;;  %v3306_v40 = vmul.f32 -1.442695, %v1802_v36  ;;  %v1803_v20 = vadd.f32 %v1797_v24, %v805_v32  ;;  %v6454_v24 = vld [vmem:[#allocation11_spill] sm:$0xff]  ;;  %v6457_v32 = vld [vmem:[#allocation12_spill] sm:$0xff] }
 0x517   :  { %3617 = vpow2.f32 %v3304_v30  ;;  %v3305_v63 = vmul.f32 -1.442695, %v1801_v27 }
 0x519   :  { %3619 = vpow2.f32 %v3305_v63 }
 0x51a   :  { %3621 = vpow2.f32 %v3306_v40  ;;  %v6455_v40 = vld [vmem:[#allocation9_spill] sm:$0xff] }
 0x51b   :  { %3623 = vtanh.f32 %v1803_v20  ;;  %v6453_v20 = vld [vmem:[#allocation7_spill] sm:$0xff] }
 0x524   :  { %v3618_v41 = vpop.eup %3617 }
 0x525   :  { %v1813_v0 = vadd.f32 1.0, %v3618_v41 }
 0x526   :  { %v3620_v35 = vpop.eup %3619 }
 0x527   :  { %3625 = vrcp.f32 %v1813_v0  ;;  %v1814_v19 = vadd.f32 1.0, %v3620_v35  ;;  %v3622_v63 = vpop.eup %3621  ;;  %v6458_v0 = vld [vmem:[#allocation15_spill] sm:$0xff]  ;;  %v6459_v35 = vld [vmem:[#allocation14_spill] sm:$0xff] }
 0x528   :  { %v3624_v27 = vpop.eup %3623  ;;  %v1815_v23 = vadd.f32 1.0, %v3622_v63  ;;  %v6461_v63 = vld [vmem:[#allocation16_spill] sm:$0xff] }
 0x529   :  { %3627 = vrcp.f32 %v1814_v19  ;;  %v6460_v19 = vld [vmem:[#allocation17_spill] sm:$0xff] }
 0x52a   :  { %3629 = vrcp.f32 %v1815_v23  ;;  %v6466_v23 = vld [vmem:[#allocation23_spill] sm:$0xff] }
 0x534   :  { %v3626_v61 = vpop.eup %3625 }
 0x535   :  { %v1824_v39 = vmul.f32 %v3626_v61, %v3624_v27  ;;  %v6462_v27 = vld [vmem:[#allocation19_spill] sm:$0xff]  ;;  %v6463_v61 = vld [vmem:[#allocation18_spill] sm:$0xff] }
 0x536   :  { %v3628_v30 = vpop.eup %3627 }
 0x537   :  { %v1823_v34 = vmul.f32 %v3628_v30, %v5297_v37  ;;  %v3630_v41 = vpop.eup %3629  ;;  %v6452_v37 = vld [vmem:[#allocation10_spill] sm:$0xff]  ;;  %v6465_v30 = vld [vmem:[#allocation20_spill] sm:$0xff] }
 0x539   :  { %v5379_v21 = vadd.f32 %v1824_v39, %v1823_v34  ;;  %v6464_v39 = vld [vmem:[#allocation21_spill] sm:$0xff]  ;;  %v6467_v34 = vld [vmem:[#allocation22_spill] sm:$0xff] }
 0x53b   :  { %3631 = vtanh.f32 %v5379_v21 }
 0x548   :  { %v3632_v22 = vpop.eup %3631 }
 0x549   :  { %v5382_v36 = vmul.f32 %v3632_v22, %v3630_v41  ;;  %v6468_v41 = vld [vmem:[#allocation24_spill] sm:$0xff] }
 0x54a   :  { %v6469_v22 = vld [vmem:[#allocation4_spill] sm:$0xff] }
 0x54b   :  { %6451 = vst [vmem:[#allocation30_spill] sm:$0xff] %v5382_v36  ;;  %1962 = vmatmul.mubr.f32.vlgmr.msra.gmra.mxu0 %v5382_v36  ;;  %2033 = vmatmul.mubr.f32.vlgmr.msra.gmra.mxu1 %v5382_v36  ;;  %v6470_v36 = vld [vmem:[#allocation26_spill] sm:$0xff] }
 0x54c   :  { %2137 = vmatpush1.msra.mxu0 %v4917_v29  ;;  %2208 = vmatpush1.msra.mxu1 %v4922_v28 }
 0x54d   :  { %2138 = vmatprep.subr.mxu0 %v4929_v38  ;;  %2209 = vmatprep.subr.mxu1 %v4934_v42 }
 0x54e   :  { %2139 = vmatpush1.msra.mxu0 %v4941_v43  ;;  %2210 = vmatpush1.msra.mxu1 %v4946_v44 }
 0x54f   :  { %2140 = vmatprep.subr.mxu0 %v4953_v45  ;;  %2211 = vmatprep.subr.mxu1 %v4958_v46 }
 0x550   :  { %2141 = vmatpush1.msra.mxu0 %v4965_v47  ;;  %2212 = vmatpush1.msra.mxu1 %v4970_v48 }
 0x551   :  { %2142 = vmatprep.subr.mxu0 %v4977_v49  ;;  %2213 = vmatprep.subr.mxu1 %v4982_v50 }
 0x552   :  { %2143 = vmatpush1.msra.mxu0 %v4989_v51  ;;  %2214 = vmatpush1.msra.mxu1 %v4994_v52 }
 0x553   :  { %2144 = vmatprep.subr.mxu0 %v5001_v53  ;;  %2215 = vmatprep.subr.mxu1 %v5006_v54 }
 0x554   :  { %2145 = vmatpush1.msra.mxu0 %v5013_v55  ;;  %2216 = vmatpush1.msra.mxu1 %v5018_v56 }
 0x555   :  { %2146 = vmatprep.subr.mxu0 %v5025_v57  ;;  %2217 = vmatprep.subr.mxu1 %v5030_v58 }
 0x556   :  { %2147 = vmatpush1.msra.mxu0 %v5037_v59  ;;  %2218 = vmatpush1.msra.mxu1 %v5042_v60 }
 0x557   :  { %2148 = vmatprep.subr.mxu0 %v5049_v62  ;;  %2219 = vmatprep.subr.mxu1 %v5054_v1 }
 0x558   :  { %2149 = vmatpush1.msra.mxu0 %v5061_v2  ;;  %2220 = vmatpush1.msra.mxu1 %v5066_v3 }
 0x559   :  { %2150 = vmatprep.subr.mxu0 %v5073_v4  ;;  %2221 = vmatprep.subr.mxu1 %v5078_v5 }
 0x55a   :  { %2151 = vmatpush1.msra.mxu0 %v5083_v6  ;;  %2222 = vmatpush1.msra.mxu1 %v5090_v7 }
 0x55b   :  { %2152 = vmatprep.subr.mxu0 %v5095_v8  ;;  %2223 = vmatprep.subr.mxu1 %v5100_v9 }
 0x55c   :  { %2153 = vmatpush1.msra.mxu0 %v5107_v10  ;;  %2224 = vmatpush1.msra.mxu1 %v5112_v11 }
 0x55d   :  { %2154 = vmatprep.subr.mxu0 %v5117_v12  ;;  %2225 = vmatprep.subr.mxu1 %v5124_v13 }
 0x55e   :  { %2155 = vmatpush1.msra.mxu0 %v5129_v14  ;;  %2226 = vmatpush1.msra.mxu1 %v5134_v15 }
 0x55f   :  { %2156 = vmatprep.subr.mxu0 %v5141_v16  ;;  %2227 = vmatprep.subr.mxu1 %v5146_v17 }
 0x560   :  { %2157 = vmatpush1.msra.mxu0 %v5153_v18  ;;  %2228 = vmatpush1.msra.mxu1 %v6452_v37 }
 0x561   :  { %2158 = vmatprep.subr.mxu0 %v6453_v20  ;;  %2229 = vmatprep.subr.mxu1 %v6454_v24  ;;  %v6480_v24 = vld [vmem:[#allocation39_spill] sm:$0xff] }
 0x562   :  { %2159 = vmatpush1.msra.mxu0 %v6455_v40  ;;  %2230 = vmatpush1.msra.mxu1 %v6456_v26 }
 0x563   :  { %2160 = vmatprep.subr.mxu0 %v6457_v32  ;;  %2231 = vmatprep.subr.mxu1 %v6458_v0 }
 0x564   :  { %2161 = vmatpush1.msra.mxu0 %v6459_v35  ;;  %2232 = vmatpush1.msra.mxu1 %v6460_v19  ;;  %v6471_v19 = vld [vmem:[#allocation25_spill] sm:$0xff] }
 0x565   :  { %2162 = vmatprep.subr.mxu0 %v6461_v63  ;;  %2233 = vmatprep.subr.mxu1 %v6462_v27  ;;  %v6472_v63 = vmov 0.0   ;;  %v6473_v27 = vld [vmem:[#allocation27_spill] sm:$0xff] }
 0x566   :  { %2163 = vmatpush1.msra.mxu0 %v6463_v61  ;;  %2234 = vmatpush1.msra.mxu1 %v6464_v39  ;;  %v6474_v39 = vld [vmem:[#allocation8_spill] sm:$0xff] }
 0x567   :  { %2164 = vmatprep.subr.mxu0 %v6465_v30  ;;  %2235 = vmatprep.subr.mxu1 %v6466_v23  ;;  %v6475_v30 = vld [vmem:[#allocation6_spill] sm:$0xff]  ;;  %v6476_v23 = vld [vmem:[#allocation51_spill] sm:$0xff] }
 0x568   :  { %2165 = vmatpush1.msra.mxu0 %v6467_v34  ;;  %2236 = vmatpush1.msra.mxu1 %v6468_v41  ;;  %v6477_v34 = vld [vmem:[#allocation36_spill] sm:$0xff] }
 0x569   :  { %2166 = vmatprep.subr.mxu0 %v6469_v22  ;;  %2237 = vmatprep.subr.mxu1 %v6470_v36  ;;  %v690_v61 = vadd.f32 %v6477_v34, %v6476_v23  ;;  %v6478_v22 = vld [vmem:[#allocation38_spill] sm:$0xff]  ;;  %v811_v34 = vadd.f32 %v6480_v24, %v4814_v31 }
 0x56a   :  { %2167 = vmatpush1.msra.mxu0 %v6471_v19  ;;  %2200 = vmatprep.mubr.f32.mxu0 %v6472_v63  ;;  %v692_v35 = vadd.f32 %v6478_v22, %v4799_v33 }
 0x56b   :  { %2238 = vmatpush1.msra.mxu1 %v6473_v27  ;;  %2271 = vmatprep.mubr.f32.mxu1 %v6472_v63  ;;  %v6479_v63 = vld [vmem:[#allocation37_spill] sm:$0xff] }
 0x56c   :  { %2375 = vmatprep.subr.mxu0 %v6474_v39  ;;  %2446 = vmatprep.subr.mxu1 %v6475_v30  ;;  %v809_v39 = vadd.f32 %v6479_v63, %v4811_v25 }
 0x60b   :  { %v1963_v41 = vpop.f32.mrf.mxu0  ;;  %v2034_v27 = vpop.f32.mrf.mxu1 }
 0x60c   :  { %v2039_v36 = vadd.f32 %v1963_v41, %v690_v61  ;;  %v2041_v40 = vadd.f32 %v2034_v27, %v809_v39 }
 0x60d   :  { %v1965_v0 = vpop.f32.mrf.mxu0  ;;  %v2036_v30 = vpop.f32.mrf.mxu1 }
 0x60e   :  { %v3307_v19 = vmul.f32 -1.442695, %v2039_v36  ;;  %v2040_v32 = vadd.f32 %v1965_v0, %v692_v35  ;;  %v3309_v23 = vmul.f32 -1.442695, %v2041_v40  ;;  %v2042_v20 = vadd.f32 %v2036_v30, %v811_v34 }
 0x610   :  { %3633 = vpow2.f32 %v3307_v19  ;;  %v3308_v26 = vmul.f32 -1.442695, %v2040_v32 }
 0x612   :  { %3635 = vpow2.f32 %v3308_v26 }
 0x613   :  { %3637 = vpow2.f32 %v3309_v23 }
 0x614   :  { %3639 = vtanh.f32 %v2042_v20 }
 0x61d   :  { %v3634_v37 = vpop.eup %3633 }
 0x61e   :  { %v2052_v22 = vadd.f32 1.0, %v3634_v37 }
 0x61f   :  { %v3636_v61 = vpop.eup %3635 }
 0x620   :  { %3641 = vrcp.f32 %v2052_v22  ;;  %v2053_v36 = vadd.f32 1.0, %v3636_v61  ;;  %v3638_v26 = vpop.eup %3637 }
 0x621   :  { %v3640_v32 = vpop.eup %3639  ;;  %v2054_v63 = vadd.f32 1.0, %v3638_v26 }
 0x622   :  { %3643 = vrcp.f32 %v2053_v36 }
 0x623   :  { %3645 = vrcp.f32 %v2054_v63 }
 0x62d   :  { %v3642_v0 = vpop.eup %3641 }
 0x62e   :  { %v2063_v35 = vmul.f32 %v3642_v0, %v3640_v32 }
 0x62f   :  { %v3644_v19 = vpop.eup %3643 }
 0x630   :  { %v2062_v27 = vmul.f32 %v3644_v19, %v5379_v21  ;;  %v3646_v37 = vpop.eup %3645 }
 0x632   :  { %v5461_v41 = vadd.f32 %v2063_v35, %v2062_v27 }
 0x634   :  { %3647 = vtanh.f32 %v5461_v41 }
 0x641   :  { %v3648_v24 = vpop.eup %3647 }
 0x642   :  { %v5464_v40 = vmul.f32 %v3648_v24, %v3646_v37  ;;  %v5558_v37 = vld [vmem:[%s6191_s6 + $0x1f8] sm:$0xff]  ;;  %v5565_v24 = vld [vmem:[%s6191_s6 + $0x1e0] sm:$0xff] }
 0x644   :  { %6481 = vst [vmem:[#allocation29_spill] sm:$0xff] %v5464_v40  ;;  %2201 = vmatmul.mubr.f32.vlgmr.msra.gmra.mxu0 %v5464_v40  ;;  %2272 = vmatmul.mubr.f32.vlgmr.msra.gmra.mxu1 %v5464_v40  ;;  %v5890_v40 = vld [vmem:[%s6191_s6 + $0x38] sm:$0xff] }
 0x645   :  { %2376 = vmatpush1.msra.mxu0 %v4917_v29  ;;  %2447 = vmatpush1.msra.mxu1 %v4922_v28  ;;  %v6482_v29 = vld [vmem:[#allocation10_spill] sm:$0xff]  ;;  %v6483_v28 = vld [vmem:[#allocation7_spill] sm:$0xff] }
 0x646   :  { %2377 = vmatprep.subr.mxu0 %v4929_v38  ;;  %2448 = vmatprep.subr.mxu1 %v4934_v42  ;;  %v6484_v38 = vld [vmem:[#allocation11_spill] sm:$0xff]  ;;  %v6485_v42 = vld [vmem:[#allocation9_spill] sm:$0xff] }
 0x647   :  { %2378 = vmatpush1.msra.mxu0 %v4941_v43  ;;  %2449 = vmatpush1.msra.mxu1 %v4946_v44  ;;  %v6486_v43 = vld [vmem:[#allocation13_spill] sm:$0xff]  ;;  %v6487_v44 = vld [vmem:[#allocation12_spill] sm:$0xff] }
 0x648   :  { %2379 = vmatprep.subr.mxu0 %v4953_v45  ;;  %2450 = vmatprep.subr.mxu1 %v4958_v46  ;;  %v6488_v45 = vld [vmem:[#allocation15_spill] sm:$0xff]  ;;  %v6489_v46 = vld [vmem:[#allocation14_spill] sm:$0xff]  ;;  %6524 = vst [vmem:[#allocation13_spill] sm:$0xff] %v5890_v40 }
 0x649   :  { %2380 = vmatpush1.msra.mxu0 %v4965_v47  ;;  %2451 = vmatpush1.msra.mxu1 %v4970_v48  ;;  %v6490_v47 = vld [vmem:[#allocation17_spill] sm:$0xff]  ;;  %v6491_v48 = vld [vmem:[#allocation16_spill] sm:$0xff] }
 0x64a   :  { %2381 = vmatprep.subr.mxu0 %v4977_v49  ;;  %2452 = vmatprep.subr.mxu1 %v4982_v50  ;;  %v6492_v49 = vld [vmem:[#allocation19_spill] sm:$0xff]  ;;  %v6493_v50 = vld [vmem:[#allocation18_spill] sm:$0xff] }
 0x64b   :  { %2382 = vmatpush1.msra.mxu0 %v4989_v51  ;;  %2453 = vmatpush1.msra.mxu1 %v4994_v52  ;;  %v6494_v51 = vld [vmem:[#allocation21_spill] sm:$0xff]  ;;  %v6495_v52 = vld [vmem:[#allocation20_spill] sm:$0xff] }
 0x64c   :  { %2383 = vmatprep.subr.mxu0 %v5001_v53  ;;  %2454 = vmatprep.subr.mxu1 %v5006_v54  ;;  %v6496_v53 = vld [vmem:[#allocation23_spill] sm:$0xff]  ;;  %v6497_v54 = vld [vmem:[#allocation22_spill] sm:$0xff] }
 0x64d   :  { %2384 = vmatpush1.msra.mxu0 %v5013_v55  ;;  %2455 = vmatpush1.msra.mxu1 %v5018_v56  ;;  %v6498_v55 = vld [vmem:[#allocation24_spill] sm:$0xff] }
 0x64e   :  { %2385 = vmatprep.subr.mxu0 %v5025_v57  ;;  %2456 = vmatprep.subr.mxu1 %v5030_v58  ;;  %v6499_v56 = vld [vmem:[#allocation4_spill] sm:$0xff]  ;;  %v6500_v57 = vld [vmem:[#allocation26_spill] sm:$0xff]  ;;  %v6501_v58 = vld [vmem:[#allocation25_spill] sm:$0xff] }
 0x64f   :  { %2386 = vmatpush1.msra.mxu0 %v5037_v59  ;;  %2457 = vmatpush1.msra.mxu1 %v5042_v60  ;;  %v6502_v59 = vmov 0.0   ;;  %v6503_v60 = vld [vmem:[#allocation27_spill] sm:$0xff] }
 0x650   :  { %2387 = vmatprep.subr.mxu0 %v5049_v62  ;;  %2458 = vmatprep.subr.mxu1 %v5054_v1  ;;  %v6504_v62 = vld [vmem:[#allocation51_spill] sm:$0xff]  ;;  %v6505_v1 = vld [vmem:[#allocation40_spill] sm:$0xff] }
 0x651   :  { %2388 = vmatpush1.msra.mxu0 %v5061_v2  ;;  %2459 = vmatpush1.msra.mxu1 %v5066_v3  ;;  %v696_v2 = vadd.f32 %v6505_v1, %v6504_v62  ;;  %v5697_v1 = vld [vmem:[%s6191_s6 + $0x128] sm:$0xff] }
 0x652   :  { %2389 = vmatprep.subr.mxu0 %v5073_v4  ;;  %2460 = vmatprep.subr.mxu1 %v5078_v5  ;;  %v6506_v4 = vld [vmem:[#allocation42_spill] sm:$0xff] }
 0x653   :  { %2390 = vmatpush1.msra.mxu0 %v5083_v6  ;;  %2461 = vmatpush1.msra.mxu1 %v5090_v7  ;;  %v698_v5 = vadd.f32 %v6506_v4, %v4799_v33  ;;  %v5714_v4 = vld [vmem:[%s6191_s6 + $0x130] sm:$0xff] }
 0x654   :  { %2391 = vmatprep.subr.mxu0 %v5095_v8  ;;  %2462 = vmatprep.subr.mxu1 %v5100_v9 }
 0x655   :  { %2392 = vmatpush1.msra.mxu0 %v5107_v10  ;;  %2463 = vmatpush1.msra.mxu1 %v5112_v11 }
 0x656   :  { %2393 = vmatprep.subr.mxu0 %v5117_v12  ;;  %2464 = vmatprep.subr.mxu1 %v5124_v13  ;;  %v6507_v12 = vld [vmem:[#allocation41_spill] sm:$0xff] }
 0x657   :  { %2394 = vmatpush1.msra.mxu0 %v5129_v14  ;;  %2465 = vmatpush1.msra.mxu1 %v5134_v15  ;;  %v815_v13 = vadd.f32 %v6507_v12, %v4811_v25  ;;  %v5760_v12 = vld [vmem:[%s6191_s6 + $0xf0] sm:$0xff] }
 0x658   :  { %2395 = vmatprep.subr.mxu0 %v5141_v16  ;;  %2466 = vmatprep.subr.mxu1 %v5146_v17  ;;  %v6508_v16 = vld [vmem:[#allocation43_spill] sm:$0xff] }
 0x659   :  { %2396 = vmatpush1.msra.mxu0 %v5153_v18  ;;  %2467 = vmatpush1.msra.mxu1 %v6482_v29  ;;  %v817_v17 = vadd.f32 %v6508_v16, %v4814_v31  ;;  %v5570_v29 = vld [vmem:[%s6191_s6 + $0x1f0] sm:$0xff] }
 0x65a   :  { %2397 = vmatprep.subr.mxu0 %v6483_v28  ;;  %2468 = vmatprep.subr.mxu1 %v6484_v38  ;;  %v5577_v28 = vld [vmem:[%s6191_s6 + $0x1c8] sm:$0xff]  ;;  %v5582_v38 = vld [vmem:[%s6191_s6 + $0x1d8] sm:$0xff]  ;;  %v5782_v16 = vld [vmem:[%s6191_s6 + $0xd0] sm:$0xff] }
 0x65b   :  { %2398 = vmatpush1.msra.mxu0 %v6485_v42  ;;  %2469 = vmatpush1.msra.mxu1 %v6486_v43  ;;  %v5589_v42 = vld [vmem:[%s6191_s6 + $0x1c0] sm:$0xff]  ;;  %v5594_v43 = vld [vmem:[%s6191_s6 + $0x1d0] sm:$0xff] }
 0x65c   :  { %2399 = vmatprep.subr.mxu0 %v6487_v44  ;;  %2470 = vmatprep.subr.mxu1 %v6488_v45  ;;  %v5601_v44 = vld [vmem:[%s6191_s6 + $0x1a8] sm:$0xff]  ;;  %v5606_v45 = vld [vmem:[%s6191_s6 + $0x1b8] sm:$0xff] }
 0x65d   :  { %2400 = vmatpush1.msra.mxu0 %v6489_v46  ;;  %2471 = vmatpush1.msra.mxu1 %v6490_v47  ;;  %v5613_v46 = vld [vmem:[%s6191_s6 + $0x1a0] sm:$0xff]  ;;  %v5618_v47 = vld [vmem:[%s6191_s6 + $0x1b0] sm:$0xff] }
 0x65e   :  { %2401 = vmatprep.subr.mxu0 %v6491_v48  ;;  %2472 = vmatprep.subr.mxu1 %v6492_v49  ;;  %v5625_v48 = vld [vmem:[%s6191_s6 + $0x188] sm:$0xff]  ;;  %v5630_v49 = vld [vmem:[%s6191_s6 + $0x198] sm:$0xff] }
 0x65f   :  { %2402 = vmatpush1.msra.mxu0 %v6493_v50  ;;  %2473 = vmatpush1.msra.mxu1 %v6494_v51  ;;  %v5637_v50 = vld [vmem:[%s6191_s6 + $0x180] sm:$0xff]  ;;  %v5642_v51 = vld [vmem:[%s6191_s6 + $0x190] sm:$0xff] }
 0x660   :  { %2403 = vmatprep.subr.mxu0 %v6495_v52  ;;  %2474 = vmatprep.subr.mxu1 %v6496_v53  ;;  %v5649_v52 = vld [vmem:[%s6191_s6 + $0x168] sm:$0xff]  ;;  %v5654_v53 = vld [vmem:[%s6191_s6 + $0x178] sm:$0xff] }
 0x661   :  { %2404 = vmatpush1.msra.mxu0 %v6497_v54  ;;  %2475 = vmatpush1.msra.mxu1 %v6498_v55  ;;  %v5661_v54 = vld [vmem:[%s6191_s6 + $0x160] sm:$0xff]  ;;  %v5666_v55 = vld [vmem:[%s6191_s6 + $0x170] sm:$0xff] }
 0x662   :  { %2405 = vmatprep.subr.mxu0 %v6499_v56  ;;  %2476 = vmatprep.subr.mxu1 %v6500_v57  ;;  %v5673_v56 = vld [vmem:[%s6191_s6 + $0x148] sm:$0xff]  ;;  %v5678_v57 = vld [vmem:[%s6191_s6 + $0x158] sm:$0xff] }
 0x663   :  { %2406 = vmatpush1.msra.mxu0 %v6501_v58  ;;  %2439 = vmatprep.mubr.f32.mxu0 %v6502_v59  ;;  %v5685_v58 = vld [vmem:[%s6191_s6 + $0x140] sm:$0xff] }
 0x664   :  { %2477 = vmatpush1.msra.mxu1 %v6503_v60  ;;  %2510 = vmatprep.mubr.f32.mxu1 %v6502_v59  ;;  %v5690_v60 = vld [vmem:[%s6191_s6 + $0x150] sm:$0xff] }
 0x665   :  { %2685 = vmatprep.subr.mxu1 %v5558_v37 }
 0x704   :  { %v2202_v3 = vpop.f32.mrf.mxu0  ;;  %v2273_v11 = vpop.f32.mrf.mxu1 }
 0x705   :  { %v2278_v6 = vadd.f32 %v2202_v3, %v696_v2  ;;  %v2280_v14 = vadd.f32 %v2273_v11, %v815_v13  ;;  %v5702_v2 = vld [vmem:[%s6191_s6 + $0x138] sm:$0xff]  ;;  %v5709_v3 = vld [vmem:[%s6191_s6 + $0x120] sm:$0xff]  ;;  %v5765_v13 = vld [vmem:[%s6191_s6 + $0xc8] sm:$0xff] }
 0x706   :  { %v2204_v7 = vpop.f32.mrf.mxu0  ;;  %v2275_v15 = vpop.f32.mrf.mxu1  ;;  %v5755_v11 = vld [vmem:[%s6191_s6 + $0xe0] sm:$0xff] }
 0x707   :  { %v3310_v8 = vmul.f32 -1.442695, %v2278_v6  ;;  %v2279_v9 = vadd.f32 %v2204_v7, %v698_v5  ;;  %v3312_v18 = vmul.f32 -1.442695, %v2280_v14  ;;  %v2281_v21 = vadd.f32 %v2275_v15, %v817_v17  ;;  %v5721_v5 = vld [vmem:[%s6191_s6 + $0x108] sm:$0xff]  ;;  %v5726_v6 = vld [vmem:[%s6191_s6 + $0x118] sm:$0xff] }
 0x708   :  { %v5731_v7 = vld [vmem:[%s6191_s6 + $0x100] sm:$0xff]  ;;  %v5772_v14 = vld [vmem:[%s6191_s6 + $0xd8] sm:$0xff]  ;;  %v5789_v17 = vld [vmem:[%s6191_s6 + $0xa8] sm:$0xff] }
 0x709   :  { %3649 = vpow2.f32 %v3310_v8  ;;  %v3311_v10 = vmul.f32 -1.442695, %v2279_v9  ;;  %v5738_v8 = vld [vmem:[%s6191_s6 + $0x110] sm:$0xff]  ;;  %v5743_v9 = vld [vmem:[%s6191_s6 + $0xe8] sm:$0xff]  ;;  %v5777_v15 = vld [vmem:[%s6191_s6 + $0xc0] sm:$0xff] }
 0x70b   :  { %3651 = vpow2.f32 %v3311_v10  ;;  %v5748_v10 = vld [vmem:[%s6191_s6 + $0xf8] sm:$0xff] }
 0x70c   :  { %3653 = vpow2.f32 %v3312_v18  ;;  %v5794_v18 = vld [vmem:[%s6191_s6 + $0xb8] sm:$0xff] }
 0x70d   :  { %3655 = vtanh.f32 %v2281_v21  ;;  %v5801_v21 = vld [vmem:[%s6191_s6 + $0xa0] sm:$0xff] }
 0x716   :  { %v3650_v20 = vpop.eup %3649 }
 0x717   :  { %v2291_v23 = vadd.f32 1.0, %v3650_v20  ;;  %v5806_v20 = vld [vmem:[%s6191_s6 + $0xb0] sm:$0xff] }
 0x718   :  { %v3652_v39 = vpop.eup %3651  ;;  %6510 = vst [vmem:[#allocation32_spill] sm:$0xff] %v5806_v20 }
 0x719   :  { %3657 = vrcp.f32 %v2291_v23  ;;  %v2292_v30 = vadd.f32 1.0, %v3652_v39  ;;  %v3654_v34 = vpop.eup %3653  ;;  %v5813_v23 = vld [vmem:[%s6191_s6 + $0x88] sm:$0xff]  ;;  %v5818_v39 = vld [vmem:[%s6191_s6 + $0x98] sm:$0xff] }
 0x71a   :  { %v3656_v22 = vpop.eup %3655  ;;  %v2293_v32 = vadd.f32 1.0, %v3654_v34  ;;  %6511 = vst [vmem:[#allocation34_spill] sm:$0xff] %v5813_v23  ;;  %6512 = vst [vmem:[#allocation33_spill] sm:$0xff] %v5818_v39  ;;  %v5830_v34 = vld [vmem:[%s6191_s6 + $0x90] sm:$0xff] }
 0x71b   :  { %3659 = vrcp.f32 %v2292_v30  ;;  %v5825_v30 = vld [vmem:[%s6191_s6 + $0x80] sm:$0xff]  ;;  %6514 = vst [vmem:[#allocation8_spill] sm:$0xff] %v5830_v34 }
 0x71c   :  { %3661 = vrcp.f32 %v2293_v32  ;;  %6513 = vst [vmem:[#allocation35_spill] sm:$0xff] %v5825_v30  ;;  %v5861_v32 = vld [vmem:[%s6191_s6 + $0x48] sm:$0xff] }
 0x71d   :  { %6519 = vst [vmem:[#allocation39_spill] sm:$0xff] %v5861_v32 }
 0x726   :  { %v3658_v61 = vpop.eup %3657 }
 0x727   :  { %v2302_v36 = vmul.f32 %v3658_v61, %v3656_v22  ;;  %v5837_v22 = vld [vmem:[%s6191_s6 + $0x68] sm:$0xff]  ;;  %v5842_v61 = vld [vmem:[%s6191_s6 + $0x78] sm:$0xff] }
 0x728   :  { %v3660_v26 = vpop.eup %3659  ;;  %6515 = vst [vmem:[#allocation6_spill] sm:$0xff] %v5837_v22  ;;  %6516 = vst [vmem:[#allocation36_spill] sm:$0xff] %v5842_v61 }
 0x729   :  { %v2301_v0 = vmul.f32 %v3660_v26, %v5461_v41  ;;  %v3662_v19 = vpop.eup %3661  ;;  %v5553_v41 = vld [vmem:[%s6191_s6 + $0x1e8] sm:$0xff]  ;;  %v5854_v26 = vld [vmem:[%s6191_s6 + $0x70] sm:$0xff] }
 0x72a   :  { %2614 = vmatprep.subr.mxu0 %v5553_v41  ;;  %6518 = vst [vmem:[#allocation37_spill] sm:$0xff] %v5854_v26 }
 0x72b   :  { %v5541_v35 = vadd.f32 %v2302_v36, %v2301_v0  ;;  %v5849_v36 = vld [vmem:[%s6191_s6 + $0x60] sm:$0xff]  ;;  %v5866_v0 = vld [vmem:[%s6191_s6 + $0x58] sm:$0xff] }
 0x72c   :  { %6517 = vst [vmem:[#allocation38_spill] sm:$0xff] %v5849_v36  ;;  %6520 = vst [vmem:[#allocation10_spill] sm:$0xff] %v5866_v0 }
 0x72d   :  { %3663 = vtanh.f32 %v5541_v35 }
 0x73a   :  { %v3664_v63 = vpop.eup %3663 }
 0x73b   :  { %v5544_v27 = vmul.f32 %v3664_v63, %v3662_v19  ;;  %v5873_v19 = vld [vmem:[%s6191_s6 + $0x40] sm:$0xff]  ;;  %v5878_v63 = vld [vmem:[%s6191_s6 + $0x50] sm:$0xff] }
 0x73c   :  { %6521 = vst [vmem:[#allocation7_spill] sm:$0xff] %v5873_v19  ;;  %6522 = vst [vmem:[#allocation11_spill] sm:$0xff] %v5878_v63 }
 0x73d   :  { %6509 = vst [vmem:[#allocation31_spill] sm:$0xff] %v5544_v27  ;;  %2440 = vmatmul.mubr.f32.vlgmr.msra.gmra.mxu0 %v5544_v27  ;;  %2511 = vmatmul.mubr.f32.vlgmr.msra.gmra.mxu1 %v5544_v27  ;;  %v5885_v27 = vld [vmem:[%s6191_s6 + $0x28] sm:$0xff] }
 0x73e   :  { %2678 = vmatprep.mubr.f32.mxu0 %v6502_v59  ;;  %2749 = vmatprep.mubr.f32.mxu1 %v6502_v59  ;;  %6523 = vst [vmem:[#allocation9_spill] sm:$0xff] %v5885_v27  ;;  %v5897_v59 = vld [vmem:[%s6191_s6 + $0x20] sm:$0xff] }
 0x73f   :  { %2615 = vmatpush1.msra.mxu0 %v5565_v24  ;;  %2686 = vmatpush1.msra.mxu1 %v5570_v29  ;;  %6525 = vst [vmem:[#allocation12_spill] sm:$0xff] %v5897_v59 }
 0x740   :  { %2616 = vmatprep.subr.mxu0 %v5577_v28  ;;  %2687 = vmatprep.subr.mxu1 %v5582_v38 }
 0x741   :  { %2617 = vmatpush1.msra.mxu0 %v5589_v42  ;;  %2688 = vmatpush1.msra.mxu1 %v5594_v43 }
 0x742   :  { %2618 = vmatprep.subr.mxu0 %v5601_v44  ;;  %2689 = vmatprep.subr.mxu1 %v5606_v45 }
 0x743   :  { %2619 = vmatpush1.msra.mxu0 %v5613_v46  ;;  %2690 = vmatpush1.msra.mxu1 %v5618_v47 }
 0x744   :  { %2620 = vmatprep.subr.mxu0 %v5625_v48  ;;  %2691 = vmatprep.subr.mxu1 %v5630_v49 }
 0x745   :  { %2621 = vmatpush1.msra.mxu0 %v5637_v50  ;;  %2692 = vmatpush1.msra.mxu1 %v5642_v51 }
 0x746   :  { %2622 = vmatprep.subr.mxu0 %v5649_v52  ;;  %2693 = vmatprep.subr.mxu1 %v5654_v53 }
 0x747   :  { %2623 = vmatpush1.msra.mxu0 %v5661_v54  ;;  %2694 = vmatpush1.msra.mxu1 %v5666_v55 }
 0x748   :  { %2624 = vmatprep.subr.mxu0 %v5673_v56  ;;  %2695 = vmatprep.subr.mxu1 %v5678_v57 }
 0x749   :  { %2625 = vmatpush1.msra.mxu0 %v5685_v58  ;;  %2696 = vmatpush1.msra.mxu1 %v5690_v60 }
 0x74a   :  { %2626 = vmatprep.subr.mxu0 %v5697_v1  ;;  %2697 = vmatprep.subr.mxu1 %v5702_v2 }
 0x74b   :  { %2627 = vmatpush1.msra.mxu0 %v5709_v3  ;;  %2698 = vmatpush1.msra.mxu1 %v5714_v4 }
 0x74c   :  { %2628 = vmatprep.subr.mxu0 %v5721_v5  ;;  %2699 = vmatprep.subr.mxu1 %v5726_v6 }
 0x74d   :  { %2629 = vmatpush1.msra.mxu0 %v5731_v7  ;;  %2700 = vmatpush1.msra.mxu1 %v5738_v8 }
 0x74e   :  { %2630 = vmatprep.subr.mxu0 %v5743_v9  ;;  %2701 = vmatprep.subr.mxu1 %v5748_v10 }
 0x74f   :  { %2631 = vmatpush1.msra.mxu0 %v5755_v11  ;;  %2702 = vmatpush1.msra.mxu1 %v5760_v12 }
 0x750   :  { %2632 = vmatprep.subr.mxu0 %v5765_v13  ;;  %2703 = vmatprep.subr.mxu1 %v5772_v14 }
 0x751   :  { %2633 = vmatpush1.msra.mxu0 %v5777_v15  ;;  %2704 = vmatpush1.msra.mxu1 %v5782_v16 }
 0x752   :  { %2634 = vmatprep.subr.mxu0 %v5789_v17  ;;  %2705 = vmatprep.subr.mxu1 %v5794_v18 }
 0x753   :  { %2635 = vmatpush1.msra.mxu0 %v5801_v21  ;;  %2706 = vmatpush1.msra.mxu1 %v5806_v20 }
 0x754   :  { %2636 = vmatprep.subr.mxu0 %v5813_v23  ;;  %2707 = vmatprep.subr.mxu1 %v5818_v39  ;;  %v6534_v39 = vld [vmem:[#allocation47_spill] sm:$0xff] }
 0x755   :  { %2637 = vmatpush1.msra.mxu0 %v5825_v30  ;;  %2708 = vmatpush1.msra.mxu1 %v5830_v34 }
 0x756   :  { %2638 = vmatprep.subr.mxu0 %v5837_v22  ;;  %2709 = vmatprep.subr.mxu1 %v5842_v61 }
 0x757   :  { %2639 = vmatpush1.msra.mxu0 %v5849_v36  ;;  %2710 = vmatpush1.msra.mxu1 %v5854_v26  ;;  %v5902_v26 = vld [vmem:[%s6191_s6 + $0x30] sm:$0xff] }
 0x758   :  { %2640 = vmatprep.subr.mxu0 %v5861_v32  ;;  %2711 = vmatprep.subr.mxu1 %v5866_v0  ;;  %6526 = vst [vmem:[#allocation15_spill] sm:$0xff] %v5902_v26  ;;  %v5909_v32 = vld [vmem:[%s6191_s6 + $0x8] sm:$0xff]  ;;  %v5914_v0 = vld [vmem:[%s6191_s6 + $0x18] sm:$0xff] }
 0x759   :  { %2641 = vmatpush1.msra.mxu0 %v5873_v19  ;;  %2712 = vmatpush1.msra.mxu1 %v5878_v63  ;;  %6527 = vst [vmem:[#allocation14_spill] sm:$0xff] %v5909_v32  ;;  %6528 = vst [vmem:[#allocation17_spill] sm:$0xff] %v5914_v0  ;;  %v5921_v19 = vld [vmem:[%s6191_s6] sm:$0xff]  ;;  %v5926_v63 = vld [vmem:[%s6191_s6 + $0x10] sm:$0xff] }
 0x75a   :  { %2642 = vmatprep.subr.mxu0 %v5885_v27  ;;  %2713 = vmatprep.subr.mxu1 %v5890_v40  ;;  %6529 = vst [vmem:[#allocation16_spill] sm:$0xff] %v5921_v19  ;;  %6530 = vst [vmem:[#allocation19_spill] sm:$0xff] %v5926_v63  ;;  %v6531_v40 = vld [vmem:[#allocation44_spill] sm:$0xff] }
 0x75b   :  { %2643 = vmatpush1.msra.mxu0 %v5897_v59  ;;  %2714 = vmatpush1.msra.mxu1 %v5902_v26  ;;  %v702_v27 = vadd.f32 %v6531_v40, %v6504_v62  ;;  %v6532_v59 = vld [vmem:[#allocation46_spill] sm:$0xff]  ;;  %v823_v40 = vadd.f32 %v6534_v39, %v4814_v31 }
 0x75c   :  { %2644 = vmatprep.subr.mxu0 %v5909_v32  ;;  %2715 = vmatprep.subr.mxu1 %v5914_v0  ;;  %v704_v61 = vadd.f32 %v6532_v59, %v4799_v33 }
 0x75d   :  { %2645 = vmatpush1.msra.mxu0 %v5921_v19  ;;  %2716 = vmatpush1.msra.mxu1 %v5926_v63  ;;  %v6533_v63 = vld [vmem:[#allocation45_spill] sm:$0xff] }
 0x75e   :  { %2853 = vmatprep.subr.mxu0 %v5553_v41  ;;  %2924 = vmatprep.subr.mxu1 %v5558_v37  ;;  %v821_v41 = vadd.f32 %v6533_v63, %v4811_v25 }
 0x7fd   :  { %v2441_v36 = vpop.f32.mrf.mxu0  ;;  %v2512_v19 = vpop.f32.mrf.mxu1 }
 0x7fe   :  { %v2517_v26 = vadd.f32 %v2441_v36, %v702_v27  ;;  %v2519_v30 = vadd.f32 %v2512_v19, %v821_v41 }
 0x7ff   :  { %v2443_v22 = vpop.f32.mrf.mxu0  ;;  %v2514_v37 = vpop.f32.mrf.mxu1 }
 0x800   :  { %v3313_v32 = vmul.f32 -1.442695, %v2517_v26  ;;  %v2518_v34 = vadd.f32 %v2443_v22, %v704_v61  ;;  %v3315_v62 = vmul.f32 -1.442695, %v2519_v30  ;;  %v2520_v23 = vadd.f32 %v2514_v37, %v823_v40 }
 0x802   :  { %3665 = vpow2.f32 %v3313_v32  ;;  %v3314_v0 = vmul.f32 -1.442695, %v2518_v34 }
 0x804   :  { %3667 = vpow2.f32 %v3314_v0 }
 0x805   :  { %3669 = vpow2.f32 %v3315_v62 }
 0x806   :  { %3671 = vtanh.f32 %v2520_v23 }
 0x80f   :  { %v3666_v20 = vpop.eup %3665 }
 0x810   :  { %v2530_v59 = vadd.f32 1.0, %v3666_v20 }
 0x811   :  { %v3668_v27 = vpop.eup %3667 }
 0x812   :  { %3673 = vrcp.f32 %v2530_v59  ;;  %v2531_v22 = vadd.f32 1.0, %v3668_v27  ;;  %v3670_v34 = vpop.eup %3669 }
 0x813   :  { %v3672_v61 = vpop.eup %3671  ;;  %v2532_v0 = vadd.f32 1.0, %v3670_v34 }
 0x814   :  { %3675 = vrcp.f32 %v2531_v22 }
 0x815   :  { %3677 = vrcp.f32 %v2532_v0 }
 0x81f   :  { %v3674_v36 = vpop.eup %3673 }
 0x820   :  { %v2541_v26 = vmul.f32 %v3674_v36, %v3672_v61 }
 0x821   :  { %v3676_v32 = vpop.eup %3675 }
 0x822   :  { %v2540_v19 = vmul.f32 %v3676_v32, %v5541_v35  ;;  %v3678_v20 = vpop.eup %3677  ;;  %v6535_v35 = vld [vmem:[#allocation32_spill] sm:$0xff] }
 0x824   :  { %v5945_v63 = vadd.f32 %v2541_v26, %v2540_v19 }
 0x826   :  { %3679 = vtanh.f32 %v5945_v63 }
 0x833   :  { %v3680_v62 = vpop.eup %3679 }
 0x834   :  { %v5948_v39 = vmul.f32 %v3680_v62, %v3678_v20  ;;  %v3046_v62 = vld [vmem:[%s6194_s8 + $0x70] sm:$0xff] }
 0x836   :  { %2679 = vmatmul.mubr.f32.vlgmr.msra.gmra.mxu0 %v5948_v39  ;;  %2750 = vmatmul.mubr.f32.vlgmr.msra.gmra.mxu1 %v5948_v39 }
 0x837   :  { %2854 = vmatpush1.msra.mxu0 %v5565_v24  ;;  %2925 = vmatpush1.msra.mxu1 %v5570_v29  ;;  %v6536_v24 = vld [vmem:[#allocation34_spill] sm:$0xff]  ;;  %v6537_v29 = vld [vmem:[#allocation33_spill] sm:$0xff] }
 0x838   :  { %2855 = vmatprep.subr.mxu0 %v5577_v28  ;;  %2926 = vmatprep.subr.mxu1 %v5582_v38  ;;  %v6538_v28 = vld [vmem:[#allocation35_spill] sm:$0xff]  ;;  %v6539_v38 = vld [vmem:[#allocation8_spill] sm:$0xff] }
 0x839   :  { %2856 = vmatpush1.msra.mxu0 %v5589_v42  ;;  %2927 = vmatpush1.msra.mxu1 %v5594_v43  ;;  %v6540_v42 = vld [vmem:[#allocation6_spill] sm:$0xff]  ;;  %v6541_v43 = vld [vmem:[#allocation36_spill] sm:$0xff] }
 0x83a   :  { %2857 = vmatprep.subr.mxu0 %v5601_v44  ;;  %2928 = vmatprep.subr.mxu1 %v5606_v45  ;;  %v6542_v44 = vld [vmem:[#allocation38_spill] sm:$0xff]  ;;  %v6543_v45 = vld [vmem:[#allocation37_spill] sm:$0xff] }
 0x83b   :  { %2858 = vmatpush1.msra.mxu0 %v5613_v46  ;;  %2929 = vmatpush1.msra.mxu1 %v5618_v47  ;;  %v6544_v46 = vld [vmem:[#allocation39_spill] sm:$0xff]  ;;  %v6545_v47 = vld [vmem:[#allocation10_spill] sm:$0xff] }
 0x83c   :  { %2859 = vmatprep.subr.mxu0 %v5625_v48  ;;  %2930 = vmatprep.subr.mxu1 %v5630_v49  ;;  %v6546_v48 = vld [vmem:[#allocation7_spill] sm:$0xff] }
 0x83d   :  { %2860 = vmatpush1.msra.mxu0 %v5637_v50  ;;  %2931 = vmatpush1.msra.mxu1 %v5642_v51  ;;  %v6547_v49 = vld [vmem:[#allocation11_spill] sm:$0xff]  ;;  %v6548_v50 = vld [vmem:[#allocation9_spill] sm:$0xff] }
 0x83e   :  { %2861 = vmatprep.subr.mxu0 %v5649_v52  ;;  %2932 = vmatprep.subr.mxu1 %v5654_v53  ;;  %v6549_v51 = vld [vmem:[#allocation13_spill] sm:$0xff]  ;;  %v6550_v52 = vld [vmem:[#allocation12_spill] sm:$0xff]  ;;  %v6551_v53 = vld [vmem:[#allocation15_spill] sm:$0xff] }
 0x83f   :  { %2862 = vmatpush1.msra.mxu0 %v5661_v54  ;;  %2933 = vmatpush1.msra.mxu1 %v5666_v55  ;;  %v6552_v54 = vld [vmem:[#allocation14_spill] sm:$0xff]  ;;  %v6553_v55 = vld [vmem:[#allocation17_spill] sm:$0xff] }
 0x840   :  { %2863 = vmatprep.subr.mxu0 %v5673_v56  ;;  %2934 = vmatprep.subr.mxu1 %v5678_v57  ;;  %v6554_v56 = vld [vmem:[#allocation16_spill] sm:$0xff]  ;;  %v6555_v57 = vmov 0.0  }
 0x841   :  { %2864 = vmatpush1.msra.mxu0 %v5685_v58  ;;  %2935 = vmatpush1.msra.mxu1 %v5690_v60  ;;  %v6556_v58 = vld [vmem:[#allocation19_spill] sm:$0xff] }
 0x842   :  { %2865 = vmatprep.subr.mxu0 %v5697_v1  ;;  %2936 = vmatprep.subr.mxu1 %v5702_v2  ;;  %v3047_v60 = vld [vmem:[%s6194_s8 + $0x78] sm:$0xff]  ;;  %v6558_v2 = vld [vmem:[#allocation48_spill] sm:$0xff] }
 0x843   :  { %2866 = vmatpush1.msra.mxu0 %v5709_v3  ;;  %2937 = vmatpush1.msra.mxu1 %v5714_v4  ;;  %v6557_v1 = vld [vmem:[#allocation51_spill] sm:$0xff] }
 0x844   :  { %2867 = vmatprep.subr.mxu0 %v5721_v5  ;;  %2938 = vmatprep.subr.mxu1 %v5726_v6  ;;  %v708_v3 = vadd.f32 %v6558_v2, %v6557_v1  ;;  %v6559_v5 = vld [vmem:[#allocation50_spill] sm:$0xff] }
 0x845   :  { %2868 = vmatpush1.msra.mxu0 %v5731_v7  ;;  %2939 = vmatpush1.msra.mxu1 %v5738_v8  ;;  %v710_v6 = vadd.f32 %v6559_v5, %v4799_v33 }
 0x846   :  { %2869 = vmatprep.subr.mxu0 %v5743_v9  ;;  %2940 = vmatprep.subr.mxu1 %v5748_v10 }
 0x847   :  { %2870 = vmatpush1.msra.mxu0 %v5755_v11  ;;  %2941 = vmatpush1.msra.mxu1 %v5760_v12 }
 0x848   :  { %2871 = vmatprep.subr.mxu0 %v5765_v13  ;;  %2942 = vmatprep.subr.mxu1 %v5772_v14  ;;  %v6560_v13 = vld [vmem:[#allocation49_spill] sm:$0xff] }
 0x849   :  { %2872 = vmatpush1.msra.mxu0 %v5777_v15  ;;  %2943 = vmatpush1.msra.mxu1 %v5782_v16  ;;  %v827_v14 = vadd.f32 %v6560_v13, %v4811_v25 }
 0x84a   :  { %2873 = vmatprep.subr.mxu0 %v5789_v17  ;;  %2944 = vmatprep.subr.mxu1 %v5794_v18  ;;  %v6561_v17 = vld [vmem:[#allocation53_spill] sm:$0xff] }
 0x84b   :  { %2874 = vmatpush1.msra.mxu0 %v5801_v21  ;;  %2945 = vmatpush1.msra.mxu1 %v6535_v35  ;;  %v829_v18 = vadd.f32 %v6561_v17, %v4814_v31  ;;  %v6562_v35 = vld [vmem:[#allocation5_spill] sm:$0xff]  ;;  %v3322_v17 = vld [vmem:[%s6195_s9] ss:$0 sm:$0xff] }
 0x84c   :  { %2875 = vmatprep.subr.mxu0 %v6536_v24  ;;  %2946 = vmatprep.subr.mxu1 %v6537_v29  ;;  %v3044_v24 = vld [vmem:[%s6194_s8 + $0x60] sm:$0xff]  ;;  %v3043_v29 = vld [vmem:[%s6194_s8 + $0x58] sm:$0xff] }
 0x84d   :  { %2876 = vmatpush1.msra.mxu0 %v6538_v28  ;;  %2947 = vmatpush1.msra.mxu1 %v6539_v38  ;;  %v3042_v28 = vld [vmem:[%s6194_s8 + $0x50] sm:$0xff]  ;;  %v3041_v38 = vld [vmem:[%s6194_s8 + $0x48] sm:$0xff] }
 0x84e   :  { %2877 = vmatprep.subr.mxu0 %v6540_v42  ;;  %2948 = vmatprep.subr.mxu1 %v6541_v43  ;;  %v3040_v42 = vld [vmem:[%s6194_s8 + $0x40] sm:$0xff]  ;;  %v3039_v43 = vld [vmem:[%s6194_s8 + $0x38] sm:$0xff] }
 0x84f   :  { %2878 = vmatpush1.msra.mxu0 %v6542_v44  ;;  %2949 = vmatpush1.msra.mxu1 %v6543_v45  ;;  %v3038_v44 = vld [vmem:[%s6194_s8 + $0x30] sm:$0xff]  ;;  %v3037_v45 = vld [vmem:[%s6194_s8 + $0x28] sm:$0xff] }
 0x850   :  { %2879 = vmatprep.subr.mxu0 %v6544_v46  ;;  %2950 = vmatprep.subr.mxu1 %v6545_v47  ;;  %v3036_v46 = vld [vmem:[%s6194_s8 + $0x20] sm:$0xff]  ;;  %v3035_v47 = vld [vmem:[%s6194_s8 + $0x18] sm:$0xff] }
 0x851   :  { %2880 = vmatpush1.msra.mxu0 %v6546_v48  ;;  %2951 = vmatpush1.msra.mxu1 %v6547_v49  ;;  %v3034_v48 = vld [vmem:[%s6194_s8 + $0x10] sm:$0xff]  ;;  %v3033_v49 = vld [vmem:[%s6194_s8 + $0x8] sm:$0xff] }
 0x852   :  { %2881 = vmatprep.subr.mxu0 %v6548_v50  ;;  %2952 = vmatprep.subr.mxu1 %v6549_v51  ;;  %v3032_v50 = vld [vmem:[%s6194_s8] sm:$0xff] }
 0x853   :  { %2882 = vmatpush1.msra.mxu0 %v6550_v52  ;;  %2953 = vmatpush1.msra.mxu1 %v6551_v53  ;;  %v6563_v51 = vld [vmem:[#allocation28_spill] sm:$0xff]  ;;  %v6564_v52 = vld [vmem:[#allocation30_spill] sm:$0xff]  ;;  %v6565_v53 = vld [vmem:[#allocation29_spill] sm:$0xff] }
 0x854   :  { %2883 = vmatprep.subr.mxu0 %v6552_v54  ;;  %2954 = vmatprep.subr.mxu1 %v6553_v55  ;;  %v6566_v54 = vld [vmem:[#allocation31_spill] sm:$0xff]  ;;  %v6567_v55 = vld [vmem:[#allocation52_spill] sm:$0xff] }
 0x855   :  { %2884 = vmatpush1.msra.mxu0 %v6554_v56  ;;  %2917 = vmatprep.mubr.f32.mxu0 %v6555_v57  ;;  %v714_v56 = vadd.f32 %v6567_v55, %v6557_v1 }
 0x856   :  { %2955 = vmatpush1.msra.mxu1 %v6556_v58  ;;  %2988 = vmatprep.mubr.f32.mxu1 %v6555_v57  ;;  %v6568_v58 = vld [vmem:[#allocation54_spill] sm:$0xff] }
 0x857   :  { %3520 = vmatprep.subr.mxu0 %v3047_v60 }
 0x8f6   :  { %v2680_v4 = vpop.f32.mrf.mxu0  ;;  %v2751_v12 = vpop.f32.mrf.mxu1 }
 0x8f7   :  { %v2756_v7 = vadd.f32 %v2680_v4, %v708_v3  ;;  %v2758_v15 = vadd.f32 %v2751_v12, %v827_v14 }
 0x8f8   :  { %v2682_v8 = vpop.f32.mrf.mxu0  ;;  %v2753_v16 = vpop.f32.mrf.mxu1 }
 0x8f9   :  { %v3316_v9 = vmul.f32 -1.442695, %v2756_v7  ;;  %v2757_v10 = vadd.f32 %v2682_v8, %v710_v6  ;;  %v3318_v21 = vmul.f32 -1.442695, %v2758_v15  ;;  %v2759_v23 = vadd.f32 %v2753_v16, %v829_v18  ;;  %v6569_v8 = vld [vmem:[#allocation55_spill] sm:$0xff] }
 0x8fb   :  { %3681 = vpow2.f32 %v3316_v9  ;;  %v3317_v11 = vmul.f32 -1.442695, %v2757_v10  ;;  %v833_v9 = vadd.f32 %v6569_v8, %v4811_v25 }
 0x8fd   :  { %3683 = vpow2.f32 %v3317_v11  ;;  %v6570_v11 = vld [vmem:[#allocation56_spill] sm:$0xff] }
 0x8fe   :  { %3685 = vpow2.f32 %v3318_v21  ;;  %v835_v1 = vadd.f32 %v6570_v11, %v4814_v31 }
 0x8ff   :  { %3687 = vtanh.f32 %v2759_v23 }
 0x908   :  { %v3682_v30 = vpop.eup %3681 }
 0x909   :  { %v2769_v41 = vadd.f32 1.0, %v3682_v30 }
 0x90a   :  { %v3684_v37 = vpop.eup %3683 }
 0x90b   :  { %3689 = vrcp.f32 %v2769_v41  ;;  %v2770_v40 = vadd.f32 1.0, %v3684_v37  ;;  %v3686_v59 = vpop.eup %3685 }
 0x90c   :  { %v3688_v27 = vpop.eup %3687  ;;  %v2771_v36 = vadd.f32 1.0, %v3686_v59 }
 0x90d   :  { %3691 = vrcp.f32 %v2770_v40 }
 0x90e   :  { %3693 = vrcp.f32 %v2771_v36 }
 0x918   :  { %v3690_v22 = vpop.eup %3689 }
 0x919   :  { %v2780_v34 = vmul.f32 %v3690_v22, %v3688_v27 }
 0x91a   :  { %v3692_v61 = vpop.eup %3691 }
 0x91b   :  { %v2779_v26 = vmul.f32 %v3692_v61, %v5945_v63  ;;  %v3694_v0 = vpop.eup %3693  ;;  %v3045_v63 = vld [vmem:[%s6194_s8 + $0x68] sm:$0xff] }
 0x91d   :  { %v6028_v32 = vadd.f32 %v2780_v34, %v2779_v26 }
 0x91f   :  { %3695 = vtanh.f32 %v6028_v32 }
 0x92c   :  { %v3696_v19 = vpop.eup %3695 }
 0x92d   :  { %v2783_v20 = vmul.f32 %v3696_v19, %v3694_v0 }
 0x92f   :  { %2918 = vmatmul.mubr.f32.vlgmr.msra.gmra.mxu0 %v2783_v20  ;;  %2989 = vmatmul.mubr.f32.vlgmr.msra.gmra.mxu1 %v2783_v20 }
 0x930   :  { %3521 = vmatpush3.msra.mxu0 %v3047_v60  ;;  %3552 = vmatprep.mubr.f32.mxu0 %v6562_v35  ;;  %v716_v60 = vadd.f32 %v6568_v58, %v4799_v33 }
 0x931   :  { %3522 = vmatprep.subr.mxu0 %v3046_v62 }
 0x932   :  { %3523 = vmatpush3.msra.mxu0 %v3046_v62 }
 0x933   :  { %3524 = vmatprep.subr.mxu0 %v3045_v63 }
 0x934   :  { %3525 = vmatpush3.msra.mxu0 %v3045_v63 }
 0x935   :  { %3526 = vmatprep.subr.mxu0 %v3044_v24 }
 0x936   :  { %3527 = vmatpush3.msra.mxu0 %v3044_v24 }
 0x937   :  { %3528 = vmatprep.subr.mxu0 %v3043_v29 }
 0x938   :  { %3529 = vmatpush3.msra.mxu0 %v3043_v29 }
 0x939   :  { %3530 = vmatprep.subr.mxu0 %v3042_v28 }
 0x93a   :  { %3531 = vmatpush3.msra.mxu0 %v3042_v28 }
 0x93b   :  { %3532 = vmatprep.subr.mxu0 %v3041_v38 }
 0x93c   :  { %3533 = vmatpush3.msra.mxu0 %v3041_v38 }
 0x93d   :  { %3534 = vmatprep.subr.mxu0 %v3040_v42 }
 0x93e   :  { %3535 = vmatpush3.msra.mxu0 %v3040_v42 }
 0x93f   :  { %3536 = vmatprep.subr.mxu0 %v3039_v43 }
 0x940   :  { %3537 = vmatpush3.msra.mxu0 %v3039_v43 }
 0x941   :  { %3538 = vmatprep.subr.mxu0 %v3038_v44 }
 0x942   :  { %3539 = vmatpush3.msra.mxu0 %v3038_v44 }
 0x943   :  { %3540 = vmatprep.subr.mxu0 %v3037_v45 }
 0x944   :  { %3541 = vmatpush3.msra.mxu0 %v3037_v45 }
 0x945   :  { %3542 = vmatprep.subr.mxu0 %v3036_v46 }
 0x946   :  { %3543 = vmatpush3.msra.mxu0 %v3036_v46 }
 0x947   :  { %3544 = vmatprep.subr.mxu0 %v3035_v47 }
 0x948   :  { %3545 = vmatpush3.msra.mxu0 %v3035_v47 }
 0x949   :  { %3546 = vmatprep.subr.mxu0 %v3034_v48 }
 0x94a   :  { %3547 = vmatpush3.msra.mxu0 %v3034_v48 }
 0x94b   :  { %3548 = vmatprep.subr.mxu0 %v3033_v49 }
 0x94c   :  { %3549 = vmatpush3.msra.mxu0 %v3033_v49 }
 0x94d   :  { %3550 = vmatprep.subr.mxu0 %v3032_v50 }
 0x94e   :  { %3551 = vmatpush3.msra.mxu0 %v3032_v50 }
 0x94f   :  { %3553 = vmatmul.mubr.f32.vlgmr.msra.gmra.mxu0 %v6563_v51 }
 0x950   :  { %3555 = vmatprep.mubr.f32.mxu0 %v6564_v52 }
 0x953   :  { %3556 = vmatmul.mubr.f32.gmra.mxu0 %v6565_v53 }
 0x954   :  { %3558 = vmatprep.mubr.f32.mxu0 %v6566_v54 }
 0x957   :  { %3559 = vmatmul.mubr.f32.gmra.mxu0 %v5948_v39 }
 0x958   :  { %3561 = vmatprep.mubr.f32.mxu0 %v2783_v20 }
 0x9ef   :  { %v2919_v57 = vpop.f32.mrf.mxu0  ;;  %v2990_v7 = vpop.f32.mrf.mxu1 }
 0x9f0   :  { %v2995_v2 = vadd.f32 %v2919_v57, %v714_v56  ;;  %v2997_v39 = vadd.f32 %v2990_v7, %v833_v9 }
 0x9f1   :  { %v2921_v3 = vpop.f32.mrf.mxu0  ;;  %v2992_v10 = vpop.f32.mrf.mxu1 }
 0x9f2   :  { %v3319_v4 = vmul.f32 -1.442695, %v2995_v2  ;;  %v2996_v5 = vadd.f32 %v2921_v3, %v716_v60  ;;  %v3321_v12 = vmul.f32 -1.442695, %v2997_v39  ;;  %v2998_v13 = vadd.f32 %v2992_v10, %v835_v1 }
 0x9f4   :  { %3697 = vpow2.f32 %v3319_v4  ;;  %v3320_v6 = vmul.f32 -1.442695, %v2996_v5 }
 0x9f6   :  { %3699 = vpow2.f32 %v3320_v6 }
 0x9f7   :  { %3701 = vpow2.f32 %v3321_v12 }
 0x9f8   :  { %3703 = vtanh.f32 %v2998_v13 }
 0xa01   :  { %v3698_v14 = vpop.eup %3697 }
 0xa02   :  { %v3008_v33 = vadd.f32 1.0, %v3698_v14 }
 0xa03   :  { %v3700_v15 = vpop.eup %3699 }
 0xa04   :  { %3705 = vrcp.f32 %v3008_v33  ;;  %v3009_v16 = vadd.f32 1.0, %v3700_v15  ;;  %v3702_v25 = vpop.eup %3701 }
 0xa05   :  { %v3704_v21 = vpop.eup %3703  ;;  %v3010_v59 = vadd.f32 1.0, %v3702_v25 }
 0xa06   :  { %3707 = vrcp.f32 %v3009_v16 }
 0xa07   :  { %3709 = vrcp.f32 %v3010_v59 }
 0xa0f   :  { %v3554_v18 = vpop.f32.mrf.mxu0 }
 0xa10   :  { %v6093_v23 = vadd.f32 %v3554_v18, %v3322_v17 }
 0xa11   :  { %v3706_v31 = vpop.eup %3705  ;;  %v3121_v30 = vpop.f32.mrf.mxu0 }
 0xa12   :  { %v3019_v41 = vmul.f32 %v3706_v31, %v3704_v21  ;;  %v6095_v37 = vadd.f32 %v3322_v17, %v3121_v30  ;;  %3162 = vmax.xlane.f32.xlu1 %v6093_v23 }
 0xa13   :  { %v3708_v40 = vpop.eup %3707  ;;  %v3557_v27 = vpop.f32.mrf.mxu0 }
 0xa14   :  { %v3018_v22 = vmul.f32 %v3708_v40, %v6028_v32  ;;  %3160 = vmax.xlane.f32.xlu0 %v6095_v37  ;;  %v6100_v36 = vadd.f32 %v3557_v27, %v3322_v17  ;;  %v3710_v62 = vpop.eup %3709 }
 0xa15   :  { %v3131_v34 = vpop.f32.mrf.mxu0 }
 0xa16   :  { %v3020_v61 = vadd.f32 %v3019_v41, %v3018_v22  ;;  %v6103_v19 = vadd.f32 %v3322_v17, %v3131_v34 }
 0xa17   :  { %v3560_v26 = vpop.f32.mrf.mxu0 }
 0xa18   :  { %3711 = vtanh.f32 %v3020_v61  ;;  %3166 = vmax.xlane.f32.xlu0 %v6100_v36  ;;  %v6109_v32 = vadd.f32 %v3560_v26, %v3322_v17 }
 0xa19   :  { %v3141_v0 = vpop.f32.mrf.mxu0 }
 0xa1a   :  { %v6105_v20 = vadd.f32 %v3322_v17, %v3141_v0 }
 0xa1c   :  { %3168 = vmax.xlane.f32.xlu1 %v6105_v20  ;;  %3164 = vmax.xlane.f32.xlu0 %v6103_v19 }
 0xa20   :  { %3170 = vmax.xlane.f32.xlu0 %v6109_v32 }
 0xa25   :  { %v3712_v35 = vpop.eup %3711 }
 0xa26   :  { %v3022_v63 = vmul.f32 %v3712_v35, %v3710_v62 }
 0xa28   :  { %3562 = vmatmul.mubr.f32.gmra.mxu0 %v3022_v63 }
 0xa9b   :  { %v6116_v28 = vpop.xlane.xlu1 %3162 }
 0xa9c   :  { %v3177_v42 = vsub.f32 %v6093_v23, %v6116_v28 }
 0xa9d   :  { %v6112_v24 = vpop.xlane.xlu0 %3160 }
 0xa9e   :  { %v3176_v43 = vsub.f32 %v6095_v37, %v6112_v24  ;;  %v3186_v44 = vmul.f32 1.442695, %v3177_v42 }
 0xaa0   :  { %v3184_v47 = vmul.f32 1.442695, %v3176_v43  ;;  %3713 = vpow2.f32 %v3186_v44 }
 0xaa1   :  { %v6114_v29 = vpop.xlane.xlu0 %3166 }
 0xaa2   :  { %v3179_v45 = vsub.f32 %v6100_v36, %v6114_v29  ;;  %3715 = vpow2.f32 %v3184_v47 }
 0xaa4   :  { %v3190_v50 = vmul.f32 1.442695, %v3179_v45 }
 0xaa5   :  { %v6118_v38 = vpop.xlane.xlu0 %3164  ;;  %v6130_v49 = vpop.xlane.xlu1 %3168 }
 0xaa6   :  { %v3178_v48 = vsub.f32 %v6103_v19, %v6118_v38  ;;  %v3180_v52 = vsub.f32 %v6105_v20, %v6130_v49  ;;  %3717 = vpow2.f32 %v3190_v50 }
 0xaa8   :  { %v3188_v53 = vmul.f32 1.442695, %v3178_v48  ;;  %v3192_v55 = vmul.f32 1.442695, %v3180_v52 }
 0xaa9   :  { %v6126_v46 = vpop.xlane.xlu0 %3170 }
 0xaaa   :  { %v3181_v51 = vsub.f32 %v6109_v32, %v6126_v46  ;;  %3719 = vpow2.f32 %v3188_v53 }
 0xaac   :  { %v3194_v54 = vmul.f32 1.442695, %v3181_v51 }
 0xaad   :  { %v3714_v2 = vpop.eup %3713 }
 0xaae   :  { %3721 = vpow2.f32 %v3194_v54 }
 0xaaf   :  { %3723 = vpow2.f32 %v3192_v55  ;;  %v3716_v3 = vpop.eup %3715 }
 0xab3   :  { %v3718_v4 = vpop.eup %3717 }
 0xab7   :  { %v3720_v5 = vpop.eup %3719 }
 0xabb   :  { %v3722_v6 = vpop.eup %3721 }
 0xabc   :  { %v3724_v7 = vpop.eup %3723 }
 0xae8   :  { %v3563_v56 = vpop.f32.mrf.mxu0 }
 0xae9   :  { %v6136_v57 = vadd.f32 %v3563_v56, %v3322_v17 }
 0xaea   :  { %v3151_v58 = vpop.f32.mrf.mxu0 }
 0xaeb   :  { %v6138_v60 = vadd.f32 %v3322_v17, %v3151_v58  ;;  %3174 = vmax.xlane.f32.xlu0 %v6136_v57 }
 0xaed   :  { %3172 = vmax.xlane.f32.xlu1 %v6138_v60 }
 0xaef   :  { %3202 = vadd.xlane.f32.xlu0 %v3714_v2 }
 0xaf1   :  { %3200 = vadd.xlane.f32.xlu1 %v3716_v3 }
 0xaf3   :  { %3206 = vadd.xlane.f32.xlu0 %v3718_v4 }
 0xaf5   :  { %3204 = vadd.xlane.f32.xlu1 %v3720_v5 }
 0xaf7   :  { %3210 = vadd.xlane.f32.xlu0 %v3722_v6 }
 0xaf9   :  { %3208 = vadd.xlane.f32.xlu1 %v3724_v7 }
 0xb74   :  { %v3175_v8 = vpop.xlane.xlu0 %3174 }
 0xb75   :  { %v3183_v9 = vsub.f32 %v6136_v57, %v3175_v8 }
 0xb76   :  { %v6143_v39 = vpop.xlane.xlu1 %3172 }
 0xb77   :  { %v3198_v10 = vmul.f32 1.442695, %v3183_v9  ;;  %v3182_v11 = vsub.f32 %v6138_v60, %v6143_v39 }
 0xb78   :  { %v3203_v1 = vpop.xlane.xlu0 %3202 }
 0xb79   :  { %3725 = vpow2.f32 %v3198_v10  ;;  %v3196_v12 = vmul.f32 1.442695, %v3182_v11 }
 0xb7a   :  { %3727 = vlog2.f32 %v3203_v1  ;;  %v3201_v13 = vpop.xlane.xlu1 %3200 }
 0xb7b   :  { %3729 = vpow2.f32 %v3196_v12 }
 0xb7c   :  { %3731 = vlog2.f32 %v3201_v13  ;;  %v3207_v14 = vpop.xlane.xlu0 %3206 }
 0xb7d   :  { %3733 = vlog2.f32 %v3207_v14 }
 0xb7e   :  { %v3205_v33 = vpop.xlane.xlu1 %3204 }
 0xb7f   :  { %3735 = vlog2.f32 %v3205_v33 }
 0xb80   :  { %v3211_v15 = vpop.xlane.xlu0 %3210 }
 0xb81   :  { %3737 = vlog2.f32 %v3211_v15 }
 0xb82   :  { %v3209_v16 = vpop.xlane.xlu1 %3208 }
 0xb83   :  { %3739 = vlog2.f32 %v3209_v16 }
 0xb86   :  { %v3726_v17 = vpop.eup %3725 }
 0xb87   :  { %v3728_v25 = vpop.eup %3727  ;;  %3214 = vadd.xlane.f32.xlu0 %v3726_v17 }
 0xb88   :  { %v3730_v18 = vpop.eup %3729  ;;  %v3219_v21 = vmul.f32 0.6931472, %v3728_v25 }
 0xb89   :  { %v3732_v31 = vpop.eup %3731  ;;  %3212 = vadd.xlane.f32.xlu1 %v3730_v18 }
 0xb8a   :  { %v3734_v30 = vpop.eup %3733  ;;  %v3233_v41 = vadd.f32 %v3219_v21, %v6116_v28  ;;  %v3217_v40 = vmul.f32 0.6931472, %v3732_v31 }
 0xb8b   :  { %v3223_v59 = vmul.f32 0.6931472, %v3734_v30 }
 0xb8c   :  { %v3736_v27 = vpop.eup %3735  ;;  %v3241_v22 = vsub.f32 %v6093_v23, %v3233_v41  ;;  %v3232_v34 = vadd.f32 %v3217_v40, %v6112_v24 }
 0xb8d   :  { %v3235_v61 = vadd.f32 %v3223_v59, %v6114_v29  ;;  %v3221_v26 = vmul.f32 0.6931472, %v3736_v27 }
 0xb8e   :  { %v3738_v0 = vpop.eup %3737  ;;  %3249 = vst [vmem:[%s6196_s10 + $0x8] sm:$0xff] %v3241_v22  ;;  %v3240_v62 = vsub.f32 %v6095_v37, %v3232_v34 }
 0xb8f   :  { %v3243_v35 = vsub.f32 %v6100_v36, %v3235_v61  ;;  %v3234_v63 = vadd.f32 %v3221_v26, %v6118_v38  ;;  %v3227_v28 = vmul.f32 0.6931472, %v3738_v0 }
 0xb90   :  { %v3740_v42 = vpop.eup %3739  ;;  %3248 = vst [vmem:[%s6196_s10] sm:$0xff] %v3240_v62 }
 0xb91   :  { %3251 = vst [vmem:[%s6196_s10 + $0x18] sm:$0xff] %v3243_v35  ;;  %v3242_v23 = vsub.f32 %v6103_v19, %v3234_v63  ;;  %v3237_v24 = vadd.f32 %v3227_v28, %v6126_v46  ;;  %v3225_v29 = vmul.f32 0.6931472, %v3740_v42 }
 0xb93   :  { %3250 = vst [vmem:[%s6196_s10 + $0x10] sm:$0xff] %v3242_v23  ;;  %v3245_v37 = vsub.f32 %v6109_v32, %v3237_v24  ;;  %v3236_v36 = vadd.f32 %v3225_v29, %v6130_v49 }
 0xb95   :  { %3253 = vst [vmem:[%s6196_s10 + $0x28] sm:$0xff] %v3245_v37  ;;  %v3244_v38 = vsub.f32 %v6105_v20, %v3236_v36 }
 0xb97   :  { %3252 = vst [vmem:[%s6196_s10 + $0x20] sm:$0xff] %v3244_v38 }
 0xc10   :  { %v3215_v19 = vpop.xlane.xlu0 %3214 }
 0xc11   :  { %3741 = vlog2.f32 %v3215_v19 }
 0xc12   :  { %v3213_v43 = vpop.xlane.xlu1 %3212 }
 0xc13   :  { %3743 = vlog2.f32 %v3213_v43 }
 0xc1e   :  { %v3742_v44 = vpop.eup %3741 }
 0xc1f   :  { %v3231_v45 = vmul.f32 0.6931472, %v3742_v44 }
 0xc20   :  { %v3744_v46 = vpop.eup %3743 }
 0xc21   :  { %v3239_v32 = vadd.f32 %v3231_v45, %v3175_v8  ;;  %v3229_v47 = vmul.f32 0.6931472, %v3744_v46 }
 0xc23   :  { %v3247_v48 = vsub.f32 %v6136_v57, %v3239_v32  ;;  %v3238_v49 = vadd.f32 %v3229_v47, %v6143_v39 }
 0xc25   :  { %3255 = vst [vmem:[%s6196_s10 + $0x38] sm:$0xff] %v3247_v48  ;;  %v3246_v20 = vsub.f32 %v6138_v60, %v3238_v49 }
 0xc27   :  { %3254 = vst [vmem:[%s6196_s10 + $0x30] sm:$0xff] %v3246_v20 }

</bundles_post_ra>
